<compile_context>
chip_gen: v6e
topology: v6e:2x2x1
jax: 0.10.0
libtpu: 0.0.40
codegen_flags: <defaults>
</compile_context>

<pallas_src>
import functools

import jax
import jax.numpy as jnp
from jax.experimental import pallas as pl
from jax.experimental.pallas import tpu as pltpu

_HIGHEST = jax.lax.Precision.HIGHEST


def char_rnn_kernel(ids_ref, h0_ref, embed_ref, wih_ref, whh_ref, b_ref,
                    wfc_ref, bfc_ref, out_ref, hlast_ref, x_buf,
                    *, batch, batch_pad, seq_len):
    """Single-invocation CharRNN forward.

    ids_ref:   (B*T,)        int32, SMEM, row-major (b*T + t)
    h0_ref:    (B_pad, H)    f32 initial hidden state (rows >= B are zero padding)
    embed_ref: (V, H)        embedding table (VMEM resident)
    wih_ref:   (H, H)        W_ih^T
    whh_ref:   (H, H)        W_hh^T
    b_ref:     (1, H)        b_ih + b_hh
    wfc_ref:   (H, V)        W_fc^T
    bfc_ref:   (1, V)        b_fc
    out_ref:   (B, T*V)      logits, batch-major (free reshape to (B, T, V) outside)
    hlast_ref: (B, H)        final hidden state
    x_buf:     (T*B_pad, H)  VMEM scratch: time-major embedded inputs
    """
    vocab, hidden = embed_ref.shape

    # ---- Fused embedding gather (exact, off the serial path) -------------------
    # Zero the scratch so padded batch rows hold finite values (they are never
    # read back into real rows, but keep them clean).
    x_buf[...] = jnp.zeros_like(x_buf)
    for t in range(seq_len):
        for bb in range(batch):
            tok = ids_ref[bb * seq_len + t]                      # scalar from SMEM
            x_buf[pl.ds(t * batch_pad + bb, 1), :] = embed_ref[pl.ds(tok, 1), :]

    # ---- Hoisted input projection for all timesteps (one MXU push) -------------
    x = x_buf[...]                                               # (T*B_pad, H)
    xp = jnp.dot(x, wih_ref[...], precision=_HIGHEST,
                 preferred_element_type=jnp.float32) + b_ref[...]

    # Loop-invariant operands hoisted once (incl. the bfc broadcast: JAX does not
    # CSE broadcast_in_dim inside the unrolled loop).
    whh = whh_ref[...]
    wfc = wfc_ref[...]
    bfc = jnp.broadcast_to(bfc_ref[...], (batch_pad, vocab))
    h = h0_ref[...]                                              # (B_pad, H) f32

    # ---- Serial recurrence, fully unrolled (static T) ---------------------------
    # Only xp_t + h @ W_hh^T + tanh sits on the serial dependency chain; the per-step
    # FC + store depend on h_t but nothing depends on them, so they overlap with the
    # next step's recurrence matmul.
    for t in range(seq_len):
        xp_t = xp[t * batch_pad:(t + 1) * batch_pad, :]          # aligned vreg tile
        h = jnp.tanh(xp_t + jnp.dot(h, whh, precision=_HIGHEST,
                                    preferred_element_type=jnp.float32))
        logits_t = jnp.dot(h, wfc, precision=_HIGHEST,
                           preferred_element_type=jnp.float32) + bfc
        # Batch-major store: out[b, t*V + v] = logits_t[b, v]
        out_ref[:, pl.ds(t * vocab, vocab)] = logits_t[:batch, :]

    hlast_ref[...] = h[:batch, :]


def char_rnn_forward(x_ids, hidden, params):
    """x_ids: (B, T) int32, hidden: (1, B, H) f32 -> (out (B, T, V), hidden (1, B, H))."""
    B, T = x_ids.shape
    H = params["w_ih"].shape[1]
    V = params["w_fc"].shape[0]
    Bp = ((B + 7) // 8) * 8                                      # sublane-group pad

    # Tiny scalar-side prep only (no activation-sized wrapper data movement):
    ids_flat = x_ids.reshape(B * T).astype(jnp.int32)            # free row-major view
    h0_pad = jnp.zeros((Bp, H), jnp.float32).at[:B, :].set(hidden[0])
    wih_t = params["w_ih"].T                                     # (H, H)
    whh_t = params["w_hh"].T                                     # (H, H)
    b_sum = (params["b_ih"] + params["b_hh"]).reshape(1, H)      # (1, H)
    wfc_t = params["w_fc"].T                                     # (H, V)
    bfc = params["b_fc"].reshape(1, V)                           # (1, V)

    vmem = functools.partial(pl.BlockSpec, memory_space=pltpu.MemorySpace.VMEM)
    smem = functools.partial(pl.BlockSpec, memory_space=pltpu.MemorySpace.SMEM)

    out_flat, h_last = pl.pallas_call(
        functools.partial(char_rnn_kernel, batch=B, batch_pad=Bp, seq_len=T),
        out_shape=(jax.ShapeDtypeStruct((B, T * V), jnp.float32),
                   jax.ShapeDtypeStruct((B, H), jnp.float32)),
        in_specs=[smem(),                  # token ids (scalars)
                  vmem(),                  # h0 (padded)
                  vmem(),                  # embedding table
                  vmem(), vmem(), vmem(),  # W_ih^T, W_hh^T, b_ih+b_hh
                  vmem(), vmem()],         # W_fc^T, b_fc
        out_specs=(vmem(), vmem()),
        scratch_shapes=[pltpu.VMEM((T * Bp, H), jnp.float32)],   # embedded inputs
    )(ids_flat, h0_pad, params["embed"], wih_t, whh_t, b_sum, wfc_t, bfc)

    out = out_flat.reshape(B, T, V)        # row-major view: no data movement
    return out, h_last[None]               # hidden: (1, B, H)


def char_rnn_reference(x_ids, hidden, params):
    """Pure-JAX reference matching torch nn.Embedding + nn.RNN + nn.Linear semantics."""
    emb = params["embed"][x_ids]                                 # (B, T, H)
    x_tbh = jnp.transpose(emb, (1, 0, 2))                        # (T, B, H)

    def step(h, x_t):
        h_new = jnp.tanh(
            jnp.dot(x_t, params["w_ih"].T, precision=_HIGHEST) + params["b_ih"]
            + jnp.dot(h, params["w_hh"].T, precision=_HIGHEST) + params["b_hh"])
        return h_new, h_new

    h_last, hs = jax.lax.scan(step, hidden[0], x_tbh)            # hs: (T, B, H)
    out = jnp.dot(hs, params["w_fc"].T, precision=_HIGHEST) + params["b_fc"]
    return jnp.transpose(out, (1, 0, 2)), h_last[None]


if __name__ == "__main__":
    vocab_size, hidden_size, seq_length, batch = 32, 32, 8, 2

    key = jax.random.PRNGKey(0)
    ks = jax.random.split(key, 9)
    s = float(1.0 / jnp.sqrt(hidden_size))
    params = {
        # nn.Embedding default: N(0,1); nn.RNN / nn.Linear default: U(-1/sqrt(H), 1/sqrt(H))
        "embed": jax.random.normal(ks[0], (vocab_size, hidden_size), jnp.float32),
        "w_ih": jax.random.uniform(ks[1], (hidden_size, hidden_size), jnp.float32, -s, s),
        "w_hh": jax.random.uniform(ks[2], (hidden_size, hidden_size), jnp.float32, -s, s),
        "b_ih": jax.random.uniform(ks[3], (hidden_size,), jnp.float32, -s, s),
        "b_hh": jax.random.uniform(ks[4], (hidden_size,), jnp.float32, -s, s),
        "w_fc": jax.random.uniform(ks[5], (vocab_size, hidden_size), jnp.float32, -s, s),
        "b_fc": jax.random.uniform(ks[6], (vocab_size,), jnp.float32, -s, s),
    }
    x = jax.random.randint(ks[7], (batch, seq_length), 0, vocab_size, dtype=jnp.int32)
    # CharRNN.init_hidden would give zeros; a small random hidden exercises the
    # h0 propagation / padding path as well.
    hidden = 0.25 * jax.random.normal(ks[8], (1, batch, hidden_size), jnp.float32)

    fwd = jax.jit(char_rnn_forward)
    out, h_out = fwd(x, hidden, params)
    jax.block_until_ready((out, h_out))

    ref_out, ref_h = char_rnn_reference(x, hidden, params)
    assert out.shape == (batch, seq_length, vocab_size)
    assert h_out.shape == (1, batch, hidden_size)
    # Tolerance is kept loose enough to absorb MXU default-precision differences
    # (typical observed error is <1e-5 when HIGHEST is honored) while still catching
    # any layout / indexing / semantics bug, which would produce O(1) mismatches.
    assert jnp.allclose(out, ref_out, atol=1e-2, rtol=1e-2), \
        f"logits mismatch, max abs diff {jnp.max(jnp.abs(out - ref_out))}"
    assert jnp.allclose(h_out, ref_h, atol=1e-2, rtol=1e-2), \
        f"hidden mismatch, max abs diff {jnp.max(jnp.abs(h_out - ref_h))}"
    print("KERNEL_OK")
</pallas_src>

<mosaic_0001>
module attributes {stable_mosaic.version = 11 : i64} {
  func.func @char_rnn_kernel(%arg0: memref<16xi32, #tpu.memory_space<smem>>, %arg1: memref<8x32xf32, #tpu.memory_space<vmem>>, %arg2: memref<32x32xf32, #tpu.memory_space<vmem>>, %arg3: memref<32x32xf32, #tpu.memory_space<vmem>>, %arg4: memref<32x32xf32, #tpu.memory_space<vmem>>, %arg5: memref<1x32xf32, #tpu.memory_space<vmem>>, %arg6: memref<32x32xf32, #tpu.memory_space<vmem>>, %arg7: memref<1x32xf32, #tpu.memory_space<vmem>>, %arg8: memref<2x256xf32, #tpu.memory_space<vmem>>, %arg9: memref<2x32xf32, #tpu.memory_space<vmem>>, %arg10: memref<64x32xf32, #tpu.memory_space<vmem>>) attributes {dimension_semantics = [], scalar_prefetch = 0 : i64, scratch_operands = 1 : i64, tpu.core_type = #tpu.core_type<tc>} {
    %cst = arith.constant 0.000000e+00 : f32
    %0 = vector.broadcast %cst : f32 to vector<64x32xf32>
    %c0 = arith.constant 0 : index
    %c0_0 = arith.constant 0 : index
    %1 = vector.load %arg10[%c0, %c0_0] : memref<64x32xf32, #tpu.memory_space<vmem>>, vector<64x32xf32>
    tpu.vector_store %arg10[%c0, %c0_0], %0 {strides = array<i32>} : memref<64x32xf32, #tpu.memory_space<vmem>>, vector<64x32xf32>,
    %c0_1 = arith.constant 0 : index
    %2 = memref.load %arg0[%c0_1] : memref<16xi32, #tpu.memory_space<smem>>
    %3 = arith.index_cast %2 : i32 to index
    %c0_2 = arith.constant 0 : index
    %4 = vector.load %arg2[%3, %c0_2] : memref<32x32xf32, #tpu.memory_space<vmem>>, vector<1x32xf32>
    %c0_3 = arith.constant 0 : index
    %c0_4 = arith.constant 0 : index
    %5 = vector.load %arg10[%c0_3, %c0_4] : memref<64x32xf32, #tpu.memory_space<vmem>>, vector<1x32xf32>
    tpu.vector_store %arg10[%c0_3, %c0_4], %4 {strides = array<i32>} : memref<64x32xf32, #tpu.memory_space<vmem>>, vector<1x32xf32>,
    %c8 = arith.constant 8 : index
    %6 = memref.load %arg0[%c8] : memref<16xi32, #tpu.memory_space<smem>>
    %7 = arith.index_cast %6 : i32 to index
    %c0_5 = arith.constant 0 : index
    %8 = vector.load %arg2[%7, %c0_5] : memref<32x32xf32, #tpu.memory_space<vmem>>, vector<1x32xf32>
    %c1 = arith.constant 1 : index
    %c0_6 = arith.constant 0 : index
    %9 = vector.load %arg10[%c1, %c0_6] : memref<64x32xf32, #tpu.memory_space<vmem>>, vector<1x32xf32>
    tpu.vector_store %arg10[%c1, %c0_6], %8 {strides = array<i32>} : memref<64x32xf32, #tpu.memory_space<vmem>>, vector<1x32xf32>,
    %c1_7 = arith.constant 1 : index
    %10 = memref.load %arg0[%c1_7] : memref<16xi32, #tpu.memory_space<smem>>
    %11 = arith.index_cast %10 : i32 to index
    %c0_8 = arith.constant 0 : index
    %12 = vector.load %arg2[%11, %c0_8] : memref<32x32xf32, #tpu.memory_space<vmem>>, vector<1x32xf32>
    %c8_9 = arith.constant 8 : index
    %c0_10 = arith.constant 0 : index
    %13 = vector.load %arg10[%c8_9, %c0_10] : memref<64x32xf32, #tpu.memory_space<vmem>>, vector<1x32xf32>
    tpu.vector_store %arg10[%c8_9, %c0_10], %12 {strides = array<i32>} : memref<64x32xf32, #tpu.memory_space<vmem>>, vector<1x32xf32>,
    %c9 = arith.constant 9 : index
    %14 = memref.load %arg0[%c9] : memref<16xi32, #tpu.memory_space<smem>>
    %15 = arith.index_cast %14 : i32 to index
    %c0_11 = arith.constant 0 : index
    %16 = vector.load %arg2[%15, %c0_11] : memref<32x32xf32, #tpu.memory_space<vmem>>, vector<1x32xf32>
    %c9_12 = arith.constant 9 : index
    %c0_13 = arith.constant 0 : index
    %17 = vector.load %arg10[%c9_12, %c0_13] : memref<64x32xf32, #tpu.memory_space<vmem>>, vector<1x32xf32>
    tpu.vector_store %arg10[%c9_12, %c0_13], %16 {strides = array<i32>} : memref<64x32xf32, #tpu.memory_space<vmem>>, vector<1x32xf32>,
    %c2 = arith.constant 2 : index
    %18 = memref.load %arg0[%c2] : memref<16xi32, #tpu.memory_space<smem>>
    %19 = arith.index_cast %18 : i32 to index
    %c0_14 = arith.constant 0 : index
    %20 = vector.load %arg2[%19, %c0_14] : memref<32x32xf32, #tpu.memory_space<vmem>>, vector<1x32xf32>
    %c16 = arith.constant 16 : index
    %c0_15 = arith.constant 0 : index
    %21 = vector.load %arg10[%c16, %c0_15] : memref<64x32xf32, #tpu.memory_space<vmem>>, vector<1x32xf32>
    tpu.vector_store %arg10[%c16, %c0_15], %20 {strides = array<i32>} : memref<64x32xf32, #tpu.memory_space<vmem>>, vector<1x32xf32>,
    %c10 = arith.constant 10 : index
    %22 = memref.load %arg0[%c10] : memref<16xi32, #tpu.memory_space<smem>>
    %23 = arith.index_cast %22 : i32 to index
    %c0_16 = arith.constant 0 : index
    %24 = vector.load %arg2[%23, %c0_16] : memref<32x32xf32, #tpu.memory_space<vmem>>, vector<1x32xf32>
    %c17 = arith.constant 17 : index
    %c0_17 = arith.constant 0 : index
    %25 = vector.load %arg10[%c17, %c0_17] : memref<64x32xf32, #tpu.memory_space<vmem>>, vector<1x32xf32>
    tpu.vector_store %arg10[%c17, %c0_17], %24 {strides = array<i32>} : memref<64x32xf32, #tpu.memory_space<vmem>>, vector<1x32xf32>,
    %c3 = arith.constant 3 : index
    %26 = memref.load %arg0[%c3] : memref<16xi32, #tpu.memory_space<smem>>
    %27 = arith.index_cast %26 : i32 to index
    %c0_18 = arith.constant 0 : index
    %28 = vector.load %arg2[%27, %c0_18] : memref<32x32xf32, #tpu.memory_space<vmem>>, vector<1x32xf32>
    %c24 = arith.constant 24 : index
    %c0_19 = arith.constant 0 : index
    %29 = vector.load %arg10[%c24, %c0_19] : memref<64x32xf32, #tpu.memory_space<vmem>>, vector<1x32xf32>
    tpu.vector_store %arg10[%c24, %c0_19], %28 {strides = array<i32>} : memref<64x32xf32, #tpu.memory_space<vmem>>, vector<1x32xf32>,
    %c11 = arith.constant 11 : index
    %30 = memref.load %arg0[%c11] : memref<16xi32, #tpu.memory_space<smem>>
    %31 = arith.index_cast %30 : i32 to index
    %c0_20 = arith.constant 0 : index
    %32 = vector.load %arg2[%31, %c0_20] : memref<32x32xf32, #tpu.memory_space<vmem>>, vector<1x32xf32>
    %c25 = arith.constant 25 : index
    %c0_21 = arith.constant 0 : index
    %33 = vector.load %arg10[%c25, %c0_21] : memref<64x32xf32, #tpu.memory_space<vmem>>, vector<1x32xf32>
    tpu.vector_store %arg10[%c25, %c0_21], %32 {strides = array<i32>} : memref<64x32xf32, #tpu.memory_space<vmem>>, vector<1x32xf32>,
    %c4 = arith.constant 4 : index
    %34 = memref.load %arg0[%c4] : memref<16xi32, #tpu.memory_space<smem>>
    %35 = arith.index_cast %34 : i32 to index
    %c0_22 = arith.constant 0 : index
    %36 = vector.load %arg2[%35, %c0_22] : memref<32x32xf32, #tpu.memory_space<vmem>>, vector<1x32xf32>
    %c32 = arith.constant 32 : index
    %c0_23 = arith.constant 0 : index
    %37 = vector.load %arg10[%c32, %c0_23] : memref<64x32xf32, #tpu.memory_space<vmem>>, vector<1x32xf32>
    tpu.vector_store %arg10[%c32, %c0_23], %36 {strides = array<i32>} : memref<64x32xf32, #tpu.memory_space<vmem>>, vector<1x32xf32>,
    %c12 = arith.constant 12 : index
    %38 = memref.load %arg0[%c12] : memref<16xi32, #tpu.memory_space<smem>>
    %39 = arith.index_cast %38 : i32 to index
    %c0_24 = arith.constant 0 : index
    %40 = vector.load %arg2[%39, %c0_24] : memref<32x32xf32, #tpu.memory_space<vmem>>, vector<1x32xf32>
    %c33 = arith.constant 33 : index
    %c0_25 = arith.constant 0 : index
    %41 = vector.load %arg10[%c33, %c0_25] : memref<64x32xf32, #tpu.memory_space<vmem>>, vector<1x32xf32>
    tpu.vector_store %arg10[%c33, %c0_25], %40 {strides = array<i32>} : memref<64x32xf32, #tpu.memory_space<vmem>>, vector<1x32xf32>,
    %c5 = arith.constant 5 : index
    %42 = memref.load %arg0[%c5] : memref<16xi32, #tpu.memory_space<smem>>
    %43 = arith.index_cast %42 : i32 to index
    %c0_26 = arith.constant 0 : index
    %44 = vector.load %arg2[%43, %c0_26] : memref<32x32xf32, #tpu.memory_space<vmem>>, vector<1x32xf32>
    %c40 = arith.constant 40 : index
    %c0_27 = arith.constant 0 : index
    %45 = vector.load %arg10[%c40, %c0_27] : memref<64x32xf32, #tpu.memory_space<vmem>>, vector<1x32xf32>
    tpu.vector_store %arg10[%c40, %c0_27], %44 {strides = array<i32>} : memref<64x32xf32, #tpu.memory_space<vmem>>, vector<1x32xf32>,
    %c13 = arith.constant 13 : index
    %46 = memref.load %arg0[%c13] : memref<16xi32, #tpu.memory_space<smem>>
    %47 = arith.index_cast %46 : i32 to index
    %c0_28 = arith.constant 0 : index
    %48 = vector.load %arg2[%47, %c0_28] : memref<32x32xf32, #tpu.memory_space<vmem>>, vector<1x32xf32>
    %c41 = arith.constant 41 : index
    %c0_29 = arith.constant 0 : index
    %49 = vector.load %arg10[%c41, %c0_29] : memref<64x32xf32, #tpu.memory_space<vmem>>, vector<1x32xf32>
    tpu.vector_store %arg10[%c41, %c0_29], %48 {strides = array<i32>} : memref<64x32xf32, #tpu.memory_space<vmem>>, vector<1x32xf32>,
    %c6 = arith.constant 6 : index
    %50 = memref.load %arg0[%c6] : memref<16xi32, #tpu.memory_space<smem>>
    %51 = arith.index_cast %50 : i32 to index
    %c0_30 = arith.constant 0 : index
    %52 = vector.load %arg2[%51, %c0_30] : memref<32x32xf32, #tpu.memory_space<vmem>>, vector<1x32xf32>
    %c48 = arith.constant 48 : index
    %c0_31 = arith.constant 0 : index
    %53 = vector.load %arg10[%c48, %c0_31] : memref<64x32xf32, #tpu.memory_space<vmem>>, vector<1x32xf32>
    tpu.vector_store %arg10[%c48, %c0_31], %52 {strides = array<i32>} : memref<64x32xf32, #tpu.memory_space<vmem>>, vector<1x32xf32>,
    %c14 = arith.constant 14 : index
    %54 = memref.load %arg0[%c14] : memref<16xi32, #tpu.memory_space<smem>>
    %55 = arith.index_cast %54 : i32 to index
    %c0_32 = arith.constant 0 : index
    %56 = vector.load %arg2[%55, %c0_32] : memref<32x32xf32, #tpu.memory_space<vmem>>, vector<1x32xf32>
    %c49 = arith.constant 49 : index
    %c0_33 = arith.constant 0 : index
    %57 = vector.load %arg10[%c49, %c0_33] : memref<64x32xf32, #tpu.memory_space<vmem>>, vector<1x32xf32>
    tpu.vector_store %arg10[%c49, %c0_33], %56 {strides = array<i32>} : memref<64x32xf32, #tpu.memory_space<vmem>>, vector<1x32xf32>,
    %c7 = arith.constant 7 : index
    %58 = memref.load %arg0[%c7] : memref<16xi32, #tpu.memory_space<smem>>
    %59 = arith.index_cast %58 : i32 to index
    %c0_34 = arith.constant 0 : index
    %60 = vector.load %arg2[%59, %c0_34] : memref<32x32xf32, #tpu.memory_space<vmem>>, vector<1x32xf32>
    %c56 = arith.constant 56 : index
    %c0_35 = arith.constant 0 : index
    %61 = vector.load %arg10[%c56, %c0_35] : memref<64x32xf32, #tpu.memory_space<vmem>>, vector<1x32xf32>
    tpu.vector_store %arg10[%c56, %c0_35], %60 {strides = array<i32>} : memref<64x32xf32, #tpu.memory_space<vmem>>, vector<1x32xf32>,
    %c15 = arith.constant 15 : index
    %62 = memref.load %arg0[%c15] : memref<16xi32, #tpu.memory_space<smem>>
    %63 = arith.index_cast %62 : i32 to index
    %c0_36 = arith.constant 0 : index
    %64 = vector.load %arg2[%63, %c0_36] : memref<32x32xf32, #tpu.memory_space<vmem>>, vector<1x32xf32>
    %c57 = arith.constant 57 : index
    %c0_37 = arith.constant 0 : index
    %65 = vector.load %arg10[%c57, %c0_37] : memref<64x32xf32, #tpu.memory_space<vmem>>, vector<1x32xf32>
    tpu.vector_store %arg10[%c57, %c0_37], %64 {strides = array<i32>} : memref<64x32xf32, #tpu.memory_space<vmem>>, vector<1x32xf32>,
    %c0_38 = arith.constant 0 : index
    %c0_39 = arith.constant 0 : index
    %66 = vector.load %arg10[%c0_38, %c0_39] : memref<64x32xf32, #tpu.memory_space<vmem>>, vector<64x32xf32>
    %c0_40 = arith.constant 0 : index
    %c0_41 = arith.constant 0 : index
    %67 = vector.load %arg3[%c0_40, %c0_41] : memref<32x32xf32, #tpu.memory_space<vmem>>, vector<32x32xf32>
    %cst_42 = arith.constant dense<0.000000e+00> : vector<64x32xf32>
    %68 = tpu.matmul %66, %67, %cst_42 {dimension_numbers = #tpu.dot_dimension_numbers<[1], [0], [0], [1], [0, 0, 1, 1], [], []>, precision = #tpu.contract_precision<fp32>} : vector<64x32xf32>, vector<32x32xf32>, vector<64x32xf32> -> vector<64x32xf32>
    %c0_43 = arith.constant 0 : index
    %c0_44 = arith.constant 0 : index
    %69 = vector.load %arg5[%c0_43, %c0_44] : memref<1x32xf32, #tpu.memory_space<vmem>>, vector<1x32xf32>
    %70 = vector.broadcast %69 : vector<1x32xf32> to vector<64x32xf32>
    %71 = arith.addf %68, %70 : vector<64x32xf32>
    %c0_45 = arith.constant 0 : index
    %c0_46 = arith.constant 0 : index
    %72 = vector.load %arg4[%c0_45, %c0_46] : memref<32x32xf32, #tpu.memory_space<vmem>>, vector<32x32xf32>
    %c0_47 = arith.constant 0 : index
    %c0_48 = arith.constant 0 : index
    %73 = vector.load %arg6[%c0_47, %c0_48] : memref<32x32xf32, #tpu.memory_space<vmem>>, vector<32x32xf32>
    %c0_49 = arith.constant 0 : index
    %c0_50 = arith.constant 0 : index
    %74 = vector.load %arg7[%c0_49, %c0_50] : memref<1x32xf32, #tpu.memory_space<vmem>>, vector<1x32xf32>
    %75 = vector.shape_cast %74 : vector<1x32xf32> to vector<1x32xf32>
    %76 = vector.broadcast %75 : vector<1x32xf32> to vector<8x32xf32>
    %c0_51 = arith.constant 0 : index
    %c0_52 = arith.constant 0 : index
    %77 = vector.load %arg1[%c0_51, %c0_52] : memref<8x32xf32, #tpu.memory_space<vmem>>, vector<8x32xf32>
    %78 = vector.extract_strided_slice %71 {offsets = [0, 0], sizes = [8, 32], strides = [1, 1]} : vector<64x32xf32> to vector<8x32xf32>
    %cst_53 = arith.constant dense<0.000000e+00> : vector<8x32xf32>
    %79 = tpu.matmul %77, %72, %cst_53 {dimension_numbers = #tpu.dot_dimension_numbers<[1], [0], [0], [1], [0, 0, 1, 1], [], []>, precision = #tpu.contract_precision<fp32>} : vector<8x32xf32>, vector<32x32xf32>, vector<8x32xf32> -> vector<8x32xf32>
    %80 = arith.addf %78, %79 : vector<8x32xf32>
    %81 = math.tanh %80 : vector<8x32xf32>
    %cst_54 = arith.constant dense<0.000000e+00> : vector<8x32xf32>
    %82 = tpu.matmul %81, %73, %cst_54 {dimension_numbers = #tpu.dot_dimension_numbers<[1], [0], [0], [1], [0, 0, 1, 1], [], []>, precision = #tpu.contract_precision<fp32>} : vector<8x32xf32>, vector<32x32xf32>, vector<8x32xf32> -> vector<8x32xf32>
    %83 = arith.addf %82, %76 : vector<8x32xf32>
    %84 = vector.extract_strided_slice %83 {offsets = [0, 0], sizes = [2, 32], strides = [1, 1]} : vector<8x32xf32> to vector<2x32xf32>
    %c0_55 = arith.constant 0 : index
    %c0_56 = arith.constant 0 : index
    %85 = vector.load %arg8[%c0_55, %c0_56] : memref<2x256xf32, #tpu.memory_space<vmem>>, vector<2x32xf32>
    tpu.vector_store %arg8[%c0_55, %c0_56], %84 {strides = array<i32>} : memref<2x256xf32, #tpu.memory_space<vmem>>, vector<2x32xf32>,
    %86 = vector.extract_strided_slice %71 {offsets = [8, 0], sizes = [8, 32], strides = [1, 1]} : vector<64x32xf32> to vector<8x32xf32>
    %cst_57 = arith.constant dense<0.000000e+00> : vector<8x32xf32>
    %87 = tpu.matmul %81, %72, %cst_57 {dimension_numbers = #tpu.dot_dimension_numbers<[1], [0], [0], [1], [0, 0, 1, 1], [], []>, precision = #tpu.contract_precision<fp32>} : vector<8x32xf32>, vector<32x32xf32>, vector<8x32xf32> -> vector<8x32xf32>
    %88 = arith.addf %86, %87 : vector<8x32xf32>
    %89 = math.tanh %88 : vector<8x32xf32>
    %cst_58 = arith.constant dense<0.000000e+00> : vector<8x32xf32>
    %90 = tpu.matmul %89, %73, %cst_58 {dimension_numbers = #tpu.dot_dimension_numbers<[1], [0], [0], [1], [0, 0, 1, 1], [], []>, precision = #tpu.contract_precision<fp32>} : vector<8x32xf32>, vector<32x32xf32>, vector<8x32xf32> -> vector<8x32xf32>
    %91 = arith.addf %90, %76 : vector<8x32xf32>
    %92 = vector.extract_strided_slice %91 {offsets = [0, 0], sizes = [2, 32], strides = [1, 1]} : vector<8x32xf32> to vector<2x32xf32>
    %c0_59 = arith.constant 0 : index
    %c32_60 = arith.constant 32 : index
    %93 = vector.load %arg8[%c0_59, %c32_60] : memref<2x256xf32, #tpu.memory_space<vmem>>, vector<2x32xf32>
    tpu.vector_store %arg8[%c0_59, %c32_60], %92 {strides = array<i32>} : memref<2x256xf32, #tpu.memory_space<vmem>>, vector<2x32xf32>,
    %94 = vector.extract_strided_slice %71 {offsets = [16, 0], sizes = [8, 32], strides = [1, 1]} : vector<64x32xf32> to vector<8x32xf32>
    %cst_61 = arith.constant dense<0.000000e+00> : vector<8x32xf32>
    %95 = tpu.matmul %89, %72, %cst_61 {dimension_numbers = #tpu.dot_dimension_numbers<[1], [0], [0], [1], [0, 0, 1, 1], [], []>, precision = #tpu.contract_precision<fp32>} : vector<8x32xf32>, vector<32x32xf32>, vector<8x32xf32> -> vector<8x32xf32>
    %96 = arith.addf %94, %95 : vector<8x32xf32>
    %97 = math.tanh %96 : vector<8x32xf32>
    %cst_62 = arith.constant dense<0.000000e+00> : vector<8x32xf32>
    %98 = tpu.matmul %97, %73, %cst_62 {dimension_numbers = #tpu.dot_dimension_numbers<[1], [0], [0], [1], [0, 0, 1, 1], [], []>, precision = #tpu.contract_precision<fp32>} : vector<8x32xf32>, vector<32x32xf32>, vector<8x32xf32> -> vector<8x32xf32>
    %99 = arith.addf %98, %76 : vector<8x32xf32>
    %100 = vector.extract_strided_slice %99 {offsets = [0, 0], sizes = [2, 32], strides = [1, 1]} : vector<8x32xf32> to vector<2x32xf32>
    %c0_63 = arith.constant 0 : index
    %c64 = arith.constant 64 : index
    %101 = vector.load %arg8[%c0_63, %c64] : memref<2x256xf32, #tpu.memory_space<vmem>>, vector<2x32xf32>
    tpu.vector_store %arg8[%c0_63, %c64], %100 {strides = array<i32>} : memref<2x256xf32, #tpu.memory_space<vmem>>, vector<2x32xf32>,
    %102 = vector.extract_strided_slice %71 {offsets = [24, 0], sizes = [8, 32], strides = [1, 1]} : vector<64x32xf32> to vector<8x32xf32>
    %cst_64 = arith.constant dense<0.000000e+00> : vector<8x32xf32>
    %103 = tpu.matmul %97, %72, %cst_64 {dimension_numbers = #tpu.dot_dimension_numbers<[1], [0], [0], [1], [0, 0, 1, 1], [], []>, precision = #tpu.contract_precision<fp32>} : vector<8x32xf32>, vector<32x32xf32>, vector<8x32xf32> -> vector<8x32xf32>
    %104 = arith.addf %102, %103 : vector<8x32xf32>
    %105 = math.tanh %104 : vector<8x32xf32>
    %cst_65 = arith.constant dense<0.000000e+00> : vector<8x32xf32>
    %106 = tpu.matmul %105, %73, %cst_65 {dimension_numbers = #tpu.dot_dimension_numbers<[1], [0], [0], [1], [0, 0, 1, 1], [], []>, precision = #tpu.contract_precision<fp32>} : vector<8x32xf32>, vector<32x32xf32>, vector<8x32xf32> -> vector<8x32xf32>
    %107 = arith.addf %106, %76 : vector<8x32xf32>
    %108 = vector.extract_strided_slice %107 {offsets = [0, 0], sizes = [2, 32], strides = [1, 1]} : vector<8x32xf32> to vector<2x32xf32>
    %c0_66 = arith.constant 0 : index
    %c96 = arith.constant 96 : index
    %109 = vector.load %arg8[%c0_66, %c96] : memref<2x256xf32, #tpu.memory_space<vmem>>, vector<2x32xf32>
    tpu.vector_store %arg8[%c0_66, %c96], %108 {strides = array<i32>} : memref<2x256xf32, #tpu.memory_space<vmem>>, vector<2x32xf32>,
    %110 = vector.extract_strided_slice %71 {offsets = [32, 0], sizes = [8, 32], strides = [1, 1]} : vector<64x32xf32> to vector<8x32xf32>
    %cst_67 = arith.constant dense<0.000000e+00> : vector<8x32xf32>
    %111 = tpu.matmul %105, %72, %cst_67 {dimension_numbers = #tpu.dot_dimension_numbers<[1], [0], [0], [1], [0, 0, 1, 1], [], []>, precision = #tpu.contract_precision<fp32>} : vector<8x32xf32>, vector<32x32xf32>, vector<8x32xf32> -> vector<8x32xf32>
    %112 = arith.addf %110, %111 : vector<8x32xf32>
    %113 = math.tanh %112 : vector<8x32xf32>
    %cst_68 = arith.constant dense<0.000000e+00> : vector<8x32xf32>
    %114 = tpu.matmul %113, %73, %cst_68 {dimension_numbers = #tpu.dot_dimension_numbers<[1], [0], [0], [1], [0, 0, 1, 1], [], []>, precision = #tpu.contract_precision<fp32>} : vector<8x32xf32>, vector<32x32xf32>, vector<8x32xf32> -> vector<8x32xf32>
    %115 = arith.addf %114, %76 : vector<8x32xf32>
    %116 = vector.extract_strided_slice %115 {offsets = [0, 0], sizes = [2, 32], strides = [1, 1]} : vector<8x32xf32> to vector<2x32xf32>
    %c0_69 = arith.constant 0 : index
    %c128 = arith.constant 128 : index
    %117 = vector.load %arg8[%c0_69, %c128] : memref<2x256xf32, #tpu.memory_space<vmem>>, vector<2x32xf32>
    tpu.vector_store %arg8[%c0_69, %c128], %116 {strides = array<i32>} : memref<2x256xf32, #tpu.memory_space<vmem>>, vector<2x32xf32>,
    %118 = vector.extract_strided_slice %71 {offsets = [40, 0], sizes = [8, 32], strides = [1, 1]} : vector<64x32xf32> to vector<8x32xf32>
    %cst_70 = arith.constant dense<0.000000e+00> : vector<8x32xf32>
    %119 = tpu.matmul %113, %72, %cst_70 {dimension_numbers = #tpu.dot_dimension_numbers<[1], [0], [0], [1], [0, 0, 1, 1], [], []>, precision = #tpu.contract_precision<fp32>} : vector<8x32xf32>, vector<32x32xf32>, vector<8x32xf32> -> vector<8x32xf32>
    %120 = arith.addf %118, %119 : vector<8x32xf32>
    %121 = math.tanh %120 : vector<8x32xf32>
    %cst_71 = arith.constant dense<0.000000e+00> : vector<8x32xf32>
    %122 = tpu.matmul %121, %73, %cst_71 {dimension_numbers = #tpu.dot_dimension_numbers<[1], [0], [0], [1], [0, 0, 1, 1], [], []>, precision = #tpu.contract_precision<fp32>} : vector<8x32xf32>, vector<32x32xf32>, vector<8x32xf32> -> vector<8x32xf32>
    %123 = arith.addf %122, %76 : vector<8x32xf32>
    %124 = vector.extract_strided_slice %123 {offsets = [0, 0], sizes = [2, 32], strides = [1, 1]} : vector<8x32xf32> to vector<2x32xf32>
    %c0_72 = arith.constant 0 : index
    %c160 = arith.constant 160 : index
    %125 = vector.load %arg8[%c0_72, %c160] : memref<2x256xf32, #tpu.memory_space<vmem>>, vector<2x32xf32>
    tpu.vector_store %arg8[%c0_72, %c160], %124 {strides = array<i32>} : memref<2x256xf32, #tpu.memory_space<vmem>>, vector<2x32xf32>,
    %126 = vector.extract_strided_slice %71 {offsets = [48, 0], sizes = [8, 32], strides = [1, 1]} : vector<64x32xf32> to vector<8x32xf32>
    %cst_73 = arith.constant dense<0.000000e+00> : vector<8x32xf32>
    %127 = tpu.matmul %121, %72, %cst_73 {dimension_numbers = #tpu.dot_dimension_numbers<[1], [0], [0], [1], [0, 0, 1, 1], [], []>, precision = #tpu.contract_precision<fp32>} : vector<8x32xf32>, vector<32x32xf32>, vector<8x32xf32> -> vector<8x32xf32>
    %128 = arith.addf %126, %127 : vector<8x32xf32>
    %129 = math.tanh %128 : vector<8x32xf32>
    %cst_74 = arith.constant dense<0.000000e+00> : vector<8x32xf32>
    %130 = tpu.matmul %129, %73, %cst_74 {dimension_numbers = #tpu.dot_dimension_numbers<[1], [0], [0], [1], [0, 0, 1, 1], [], []>, precision = #tpu.contract_precision<fp32>} : vector<8x32xf32>, vector<32x32xf32>, vector<8x32xf32> -> vector<8x32xf32>
    %131 = arith.addf %130, %76 : vector<8x32xf32>
    %132 = vector.extract_strided_slice %131 {offsets = [0, 0], sizes = [2, 32], strides = [1, 1]} : vector<8x32xf32> to vector<2x32xf32>
    %c0_75 = arith.constant 0 : index
    %c192 = arith.constant 192 : index
    %133 = vector.load %arg8[%c0_75, %c192] : memref<2x256xf32, #tpu.memory_space<vmem>>, vector<2x32xf32>
    tpu.vector_store %arg8[%c0_75, %c192], %132 {strides = array<i32>} : memref<2x256xf32, #tpu.memory_space<vmem>>, vector<2x32xf32>,
    %134 = vector.extract_strided_slice %71 {offsets = [56, 0], sizes = [8, 32], strides = [1, 1]} : vector<64x32xf32> to vector<8x32xf32>
    %cst_76 = arith.constant dense<0.000000e+00> : vector<8x32xf32>
    %135 = tpu.matmul %129, %72, %cst_76 {dimension_numbers = #tpu.dot_dimension_numbers<[1], [0], [0], [1], [0, 0, 1, 1], [], []>, precision = #tpu.contract_precision<fp32>} : vector<8x32xf32>, vector<32x32xf32>, vector<8x32xf32> -> vector<8x32xf32>
    %136 = arith.addf %134, %135 : vector<8x32xf32>
    %137 = math.tanh %136 : vector<8x32xf32>
    %cst_77 = arith.constant dense<0.000000e+00> : vector<8x32xf32>
    %138 = tpu.matmul %137, %73, %cst_77 {dimension_numbers = #tpu.dot_dimension_numbers<[1], [0], [0], [1], [0, 0, 1, 1], [], []>, precision = #tpu.contract_precision<fp32>} : vector<8x32xf32>, vector<32x32xf32>, vector<8x32xf32> -> vector<8x32xf32>
    %139 = arith.addf %138, %76 : vector<8x32xf32>
    %140 = vector.extract_strided_slice %139 {offsets = [0, 0], sizes = [2, 32], strides = [1, 1]} : vector<8x32xf32> to vector<2x32xf32>
    %c0_78 = arith.constant 0 : index
    %c224 = arith.constant 224 : index
    %141 = vector.load %arg8[%c0_78, %c224] : memref<2x256xf32, #tpu.memory_space<vmem>>, vector<2x32xf32>
    tpu.vector_store %arg8[%c0_78, %c224], %140 {strides = array<i32>} : memref<2x256xf32, #tpu.memory_space<vmem>>, vector<2x32xf32>,
    %142 = vector.extract_strided_slice %137 {offsets = [0, 0], sizes = [2, 32], strides = [1, 1]} : vector<8x32xf32> to vector<2x32xf32>
    %c0_79 = arith.constant 0 : index
    %c0_80 = arith.constant 0 : index
    %143 = vector.load %arg9[%c0_79, %c0_80] : memref<2x32xf32, #tpu.memory_space<vmem>>, vector<2x32xf32>
    tpu.vector_store %arg9[%c0_79, %c0_80], %142 {strides = array<i32>} : memref<2x32xf32, #tpu.memory_space<vmem>>, vector<2x32xf32>,
    return
  }
}

</mosaic_0001>

<bundles_post_ra>
// kernel: char_rnn_forward.1
= control target key start
LH: loop header
LB: loop body
LE: loop exit
PB: predicated region body
PF: predicated region fallthrough
CT: control target
= control target key end

     0   :  { %15 = vsyncpa [#allocation5], 0  ;;  %s12435_s0 = inlined_call_operand.vmem [shape: s32[16], index: 0, kind: input, shape index: {}]   ;;  %s12436_s1 = inlined_call_operand.vmem [shape: f32[8,32], index: 1, kind: input, shape index: {}]   ;;  %s12437_s2 = inlined_call_operand.vmem [shape: f32[32,32], index: 2, kind: input, shape index: {}]   ;;  %s12438_s3 = inlined_call_operand.vmem [shape: f32[32,32], index: 3, kind: input, shape index: {}]   ;;  %s12439_s4 = inlined_call_operand.vmem [shape: f32[32,32], index: 4, kind: input, shape index: {}]   ;;  %s12440_s5 = inlined_call_operand.vmem [shape: f32[1,32], index: 5, kind: input, shape index: {}]   ;;  %s12441_s6 = inlined_call_operand.vmem [shape: f32[32,32], index: 6, kind: input, shape index: {}]   ;;  %s12442_s7 = inlined_call_operand.vmem [shape: f32[1,32], index: 7, kind: input, shape index: {}]   ;;  %s12443_s8 = inlined_call_operand.vmem [shape: f32[2,256], index: 8, kind: output, shape index: {0}]   ;;  %s12444_s9 = inlined_call_operand.hbm [shape: f32[2,32], index: 9, kind: output, shape index: {1}]  }
   0x1   :  { %16 = vsyncpa [#allocation4], 0  ;;  %s23_s11 = sshll.u32 %s12435_s0, 4  ;;  %s24_s11 = int_to_ptr.vmem [resolvable:$true] %s23_s11 }
   0x2   :  { %s10651_s12 = scalar_lea.vmem %s24_s11, 16  ;;  %p10656_p1 = scmp.lt.s32.totalorder %s24_s11, %s24_s11 }
   0x3   :  { %p10652_p0 = scmp.ne.s32.totalorder %s24_s11, %s10651_s12  ;;  %p10657_p2 = scmp.lt.s32.totalorder %s10651_s12, %s10651_s12 }
   0x5   :  { %p10658_p3 = por %p10657_p2, %p10656_p1 }
   0x7   :  { %p10659_p4 = pnand %p10658_p3, %p10652_p0 }
   0x9   :  { %10662 = shalt.err (!%p10659_p4)
}
   0xa   :  { %s10687_s13 = smov [#allocation3]  }
   0xb   :  { %26 = dma.vmem_to_smem %s24_s11, 16, %s10687_s13, [#allocation5]  }
   0xc   :  { %10683 = dma.done.wait [#allocation5], 16  }
   0xd   :  { %10684 = vsyncadd [#allocation5], 4294967280 }
   0xe   :  { %44 = sfence }
   0xf   :  { %v130_v0 = vld [vmem:[%s12438_s3 + $0x18] sm:$0xff]  ;;  %v129_v1 = vld [vmem:[%s12438_s3 + $0x10] sm:$0xff]  ;;  %v128_v2 = vld [vmem:[%s12438_s3 + $0x8] sm:$0xff]  ;;  %vm45_vm0 = vcmask 261120   ;;  %v12445_v7 = vmov 0.0   ;;  %s10768_s21 = sld [smem:[#allocation3]] }
  0x10   :  { %v10757_v3 = vand.u32 4294901760, %v130_v0  ;;  %v10759_v4 = vand.u32 4294901760, %v129_v1  ;;  %v10761_v5 = vand.u32 4294901760, %v128_v2  ;;  %v127_v6 = vld [vmem:[%s12438_s3] sm:$0xff]  ;;  %46 = vst.msk [vmem:[#allocation2] sm:$0xff] %vm45_vm0, %v12445_v7  ;;  %47 = vst.msk [vmem:[#allocation2 + $0x8] sm:$0xff] %vm45_vm0, %v12445_v7 }
  0x11   :  { %48 = vst.msk [vmem:[#allocation2 + $0x10] sm:$0xff] %vm45_vm0, %v12445_v7  ;;  %49 = vst.msk [vmem:[#allocation2 + $0x18] sm:$0xff] %vm45_vm0, %v12445_v7  ;;  %v10784_v8 = vand.u32 4294901760, %v127_v6  ;;  %s10786_s3 = sld [smem:[#allocation3 + $0x8]]  ;;  %vm57_vm1 = vcmask 253952   ;;  %vm10689_vm2 = vmmov 0  }
  0x12   :  { %50 = vst.msk [vmem:[#allocation2 + $0x20] sm:$0xff] %vm45_vm0, %v12445_v7  ;;  %51 = vst.msk [vmem:[#allocation2 + $0x28] sm:$0xff] %vm45_vm0, %v12445_v7  ;;  %9450 = vmatprep.subr.mxu0 %v10757_v3  ;;  %v10790_v9 = vsub.f32 %v130_v0, %v10757_v3  ;;  %v10793_v10 = vsub.f32 %v129_v1, %v10759_v4  ;;  %v10796_v11 = vsub.f32 %v128_v2, %v10761_v5  ;;  %s10798_s22 = sld [smem:[#allocation3 + $0x1]]  ;;  %vm1942_vm3 = vcmask 254976  }
  0x13   :  { %52 = vst.msk [vmem:[#allocation2 + $0x30] sm:$0xff] %vm45_vm0, %v12445_v7  ;;  %53 = vst.msk [vmem:[#allocation2 + $0x38] sm:$0xff] %vm45_vm0, %v12445_v7  ;;  %9451 = vmatpush3.msra.mxu0 %v10757_v3  ;;  %v10802_v12 = vsub.f32 %v127_v6, %v10784_v8  ;;  %s10804_s23 = sld [smem:[#allocation3 + $0x9]]  ;;  %vm2930_vm4 = vcmask 517376   ;;  %vm3918_vm5 = vcmask 779776   ;;  %vm4906_vm6 = vcmask 1042176  }
  0x14   :  { %v10807_v13 = vand.u32 4294901760, %v10790_v9  ;;  %9452 = vmatprep.subr.mxu0 %v10759_v4  ;;  %v10811_v14 = vand.u32 4294901760, %v10793_v10  ;;  %v10814_v15 = vand.u32 4294901760, %v10796_v11  ;;  %s10816_s24 = sld [smem:[#allocation3 + $0x2]] }
  0x15   :  { %9453 = vmatpush3.msra.mxu0 %v10759_v4  ;;  %v10820_v16 = vand.u32 4294901760, %v10802_v12  ;;  %s10822_s25 = sld [smem:[#allocation3 + $0xa]]  ;;  %s55_s28 = scalar_lea.vmem %s12437_s2, %s10768_s21 }
  0x16   :  { %v339_v17 = vsub.f32 %v10790_v9, %v10807_v13  ;;  %v346_v18 = vsub.f32 %v10793_v10, %v10811_v14  ;;  %9454 = vmatprep.subr.mxu0 %v10761_v5  ;;  %v353_v19 = vsub.f32 %v10796_v11, %v10814_v15  ;;  %s10835_s29 = sld [smem:[#allocation3 + $0x3]]  ;;  %v56_v20 = vld [vmem:[%s55_s28] sm:$0x1] }
  0x17   :  { %9455 = vmatpush3.msra.mxu0 %v10761_v5  ;;  %s60_s11 = scalar_lea.vmem %s12437_s2, %s10786_s3  ;;  %s10842_s12 = sld [smem:[#allocation3 + $0xb]]  ;;  %v360_v23 = vsub.f32 %v10802_v12, %v10820_v16  ;;  %58 = vst.msk [vmem:[#allocation2] sm:$0x1] %vm57_vm1, %v56_v20 }
  0x18   :  { %v340_v21 = vand.u32 4294901760, %v339_v17  ;;  %v347_v22 = vand.u32 4294901760, %v346_v18  ;;  %9456 = vmatprep.subr.mxu0 %v10784_v8  ;;  %v61_v24 = vld [vmem:[%s60_s11] sm:$0x1]  ;;  %s64_s15 = scalar_lea.vmem %s12437_s2, %s10798_s22  ;;  %s10858_s18 = sld [smem:[#allocation3 + $0x4]]  ;;  %v354_v26 = vand.u32 4294901760, %v353_v19 }
  0x19   :  { %9457 = vmatpush3.msra.mxu0 %v10784_v8  ;;  %62 = vst.msk [vmem:[#allocation2 + $0x1] sm:$0x1] %vm57_vm1, %v61_v24  ;;  %v65_v25 = vld [vmem:[%s64_s15] sm:$0x1]  ;;  %s68_s0 = scalar_lea.vmem %s12437_s2, %s10804_s23  ;;  %s10866_s3 = sld [smem:[#allocation3 + $0xc]]  ;;  %v361_v29 = vand.u32 4294901760, %v360_v23 }
  0x1a   :  { %9470 = vmatprep.subr.mxu1 %v340_v21  ;;  %9490 = vmatprep.subr.mxu0 %v10790_v9  ;;  %66 = vst.msk [vmem:[#allocation2 + $0x8] sm:$0x1] %vm57_vm1, %v65_v25  ;;  %v69_v27 = vld [vmem:[%s68_s0] sm:$0x1]  ;;  %s72_s21 = scalar_lea.vmem %s12437_s2, %s10816_s24  ;;  %s10873_s27 = sld [smem:[#allocation3 + $0x5]] }
  0x1b   :  { %9471 = vmatpush3.msra.mxu1 %v340_v21  ;;  %70 = vst.msk [vmem:[#allocation2 + $0x9] sm:$0x1] %vm57_vm1, %v69_v27  ;;  %v73_v28 = vld [vmem:[%s72_s21] sm:$0x1]  ;;  %s76_s26 = scalar_lea.vmem %s12437_s2, %s10822_s25  ;;  %s10880_s10 = sld [smem:[#allocation3 + $0xd]] }
  0x1c   :  { %9472 = vmatprep.subr.mxu1 %v347_v22  ;;  %74 = vst.msk [vmem:[#allocation2 + $0x10] sm:$0x1] %vm57_vm1, %v73_v28  ;;  %v77_v30 = vld [vmem:[%s76_s26] sm:$0x1]  ;;  %s80_s30 = scalar_lea.vmem %s12437_s2, %s10835_s29  ;;  %s10887_s14 = sld [smem:[#allocation3 + $0x6]] }
  0x1d   :  { %9473 = vmatpush3.msra.mxu1 %v347_v22  ;;  %78 = vst.msk [vmem:[#allocation2 + $0x11] sm:$0x1] %vm57_vm1, %v77_v30  ;;  %v81_v31 = vld [vmem:[%s80_s30] sm:$0x1]  ;;  %s84_s13 = scalar_lea.vmem %s12437_s2, %s10842_s12  ;;  %s10890_s15 = sld [smem:[#allocation3 + $0xe]] }
  0x1e   :  { %9474 = vmatprep.subr.mxu1 %v354_v26  ;;  %82 = vst.msk [vmem:[#allocation2 + $0x18] sm:$0x1] %vm57_vm1, %v81_v31  ;;  %v85_v32 = vld [vmem:[%s84_s13] sm:$0x1]  ;;  %s88_s17 = scalar_lea.vmem %s12437_s2, %s10858_s18  ;;  %s10897_s0 = sld [smem:[#allocation3 + $0x7]] }
  0x1f   :  { %9475 = vmatpush3.msra.mxu1 %v354_v26  ;;  %86 = vst.msk [vmem:[#allocation2 + $0x19] sm:$0x1] %vm57_vm1, %v85_v32  ;;  %v89_v34 = vld [vmem:[%s88_s17] sm:$0x1]  ;;  %s92_s20 = scalar_lea.vmem %s12437_s2, %s10866_s3  ;;  %s10903_s21 = sld [smem:[#allocation3 + $0xf]] }
  0x20   :  { %9476 = vmatprep.subr.mxu1 %v361_v29  ;;  %v119_v33 = vld [vmem:[#allocation2] sm:$0xff]  ;;  %90 = vst.msk [vmem:[#allocation2 + $0x20] sm:$0x1] %vm57_vm1, %v89_v34  ;;  %s96_s23 = scalar_lea.vmem %s12437_s2, %s10873_s27  ;;  %s10694_s26 = smov [#allocation6]  }
  0x21   :  { %v139_v35 = vsel %vm45_vm0, %v119_v33, 0  ;;  %9477 = vmatpush3.msra.mxu1 %v361_v29  ;;  %v93_v36 = vld [vmem:[%s92_s20] sm:$0x1]  ;;  %s100_s24 = scalar_lea.vmem %s12437_s2, %s10880_s10 }
  0x22   :  { %v10911_v37 = vand.u32 4294901760, %v139_v35  ;;  %v120_v38 = vld [vmem:[#allocation2 + $0x8] sm:$0xff]  ;;  %9510 = vmatprep.subr.mxu1 %v10757_v3  ;;  %94 = vst.msk [vmem:[#allocation2 + $0x21] sm:$0x1] %vm57_vm1, %v93_v36  ;;  %v97_v39 = vld [vmem:[%s96_s23] sm:$0x1]  ;;  %s104_s30 = scalar_lea.vmem %s12437_s2, %s10887_s14 }
  0x23   :  { %v142_v40 = vsel %vm45_vm0, %v120_v38, 0  ;;  %98 = vst.msk [vmem:[#allocation2 + $0x28] sm:$0x1] %vm57_vm1, %v97_v39  ;;  %v101_v41 = vld [vmem:[%s100_s24] sm:$0x1]  ;;  %s108_s11 = scalar_lea.vmem %s12437_s2, %s10890_s15  ;;  %v951_v39 = vld [vmem:[%s12439_s4 + $0x18] sm:$0xff] }
  0x24   :  { %v10926_v42 = vsub.f32 %v139_v35, %v10911_v37  ;;  %9478 = vmatprep.mubr.f32.mxu1 %v10911_v37  ;;  %v10929_v43 = vand.u32 4294901760, %v142_v40  ;;  %v121_v44 = vld [vmem:[#allocation2 + $0x10] sm:$0xff]  ;;  %102 = vst.msk [vmem:[#allocation2 + $0x29] sm:$0x1] %vm57_vm1, %v101_v41  ;;  %v105_v45 = vld [vmem:[%s104_s30] sm:$0x1]  ;;  %s112_s29 = scalar_lea.vmem %s12437_s2, %s10897_s0 }
  0x25   :  { %v145_v46 = vsel %vm45_vm0, %v121_v44, 0  ;;  %106 = vst.msk [vmem:[#allocation2 + $0x30] sm:$0x1] %vm57_vm1, %v105_v45  ;;  %v109_v47 = vld [vmem:[%s108_s11] sm:$0x1]  ;;  %s116_s17 = scalar_lea.vmem %s12437_s2, %s10903_s21  ;;  %v950_v44 = vld [vmem:[%s12439_s4 + $0x10] sm:$0xff] }
  0x26   :  { %v233_v48 = vand.u32 4294901760, %v10926_v42  ;;  %v10944_v49 = vsub.f32 %v142_v40, %v10929_v43  ;;  %9479 = vmatmul.mubr.f32.vlgmr.msra.gmra.mxu1 %v10929_v43  ;;  %v10947_v50 = vand.u32 4294901760, %v145_v46  ;;  %v122_v51 = vld [vmem:[#allocation2 + $0x18] sm:$0xff]  ;;  %110 = vst.msk [vmem:[#allocation2 + $0x31] sm:$0x1] %vm57_vm1, %v109_v47  ;;  %v11041_v45 = vand.u32 4294901760, %v951_v39 }
  0x27   :  { %v113_v52 = vld [vmem:[%s112_s29] sm:$0x1]  ;;  %9511 = vmatpush3.msra.mxu1 %v10757_v3  ;;  %v148_v53 = vsel %vm45_vm0, %v122_v51, 0  ;;  %v949_v47 = vld [vmem:[%s12439_s4 + $0x8] sm:$0xff]  ;;  %s10691_s29 = smov 32   ;;  %s8854_s24 = sshll.u32 %s10694_s26, 4  ;;  %s8855_s24 = int_to_ptr.vmem [resolvable:$true] %s8854_s24 }
  0x28   :  { %114 = vst.msk [vmem:[#allocation2 + $0x38] sm:$0x1] %vm57_vm1, %v113_v52  ;;  %v117_v54 = vld [vmem:[%s116_s17] sm:$0x1]  ;;  %v234_v55 = vsub.f32 %v10926_v42, %v233_v48  ;;  %v243_v56 = vand.u32 4294901760, %v10944_v49  ;;  %v10962_v57 = vsub.f32 %v145_v46, %v10947_v50  ;;  %9481 = vmatprep.mubr.f32.mxu1 %v10947_v50  ;;  %v10965_v58 = vand.u32 4294901760, %v148_v53  ;;  %9512 = vmatprep.subr.mxu1 %v10759_v4  ;;  %p10668_p6 = scmp.lt.s32.totalorder %s8855_s24, %s8855_s24 }
  0x29   :  { %118 = vst.msk [vmem:[#allocation2 + $0x39] sm:$0x1] %vm57_vm1, %v117_v54  ;;  %9513 = vmatpush3.msra.mxu1 %v10759_v4  ;;  %v123_v59 = vld [vmem:[#allocation2 + $0x20] sm:$0xff]  ;;  %v11056_v52 = vsub.f32 %v951_v39, %v11041_v45  ;;  %s10692_s17 = smov 64   ;;  %s10663_s27 = scalar_lea.vmem %s8855_s24, 32 }
  0x2a   :  { %v235_v60 = vand.u32 4294901760, %v234_v55  ;;  %v244_v61 = vsub.f32 %v10944_v49, %v243_v56  ;;  %v253_v62 = vand.u32 4294901760, %v10962_v57  ;;  %v10975_v63 = vsub.f32 %v148_v53, %v10965_v58  ;;  %9482 = vmatmul.mubr.f32.gmra.mxu1 %v10965_v58  ;;  %9514 = vmatprep.subr.mxu1 %v10761_v5  ;;  %p10664_p5 = scmp.ne.s32.totalorder %s8855_s24, %s10663_s27  ;;  %p10669_p7 = scmp.lt.s32.totalorder %s10663_s27, %s10663_s27 }
  0x2b   :  { %v151_v0 = vsel %vm45_vm0, %v123_v59, 0  ;;  %v124_v1 = vld [vmem:[#allocation2 + $0x28] sm:$0xff]  ;;  %9515 = vmatpush3.msra.mxu1 %v10761_v5  ;;  %v11058_v53 = vand.u32 4294901760, %v949_v47  ;;  %v11070_v54 = vand.u32 4294901760, %v11056_v52 }
  0x2c   :  { %9458 = vmatprep.mubr.f32.mxu0 %v235_v60  ;;  %v245_v2 = vand.u32 4294901760, %v244_v61  ;;  %v254_v6 = vsub.f32 %v10962_v57, %v253_v62  ;;  %v263_v17 = vand.u32 4294901760, %v10975_v63  ;;  %v10985_v18 = vand.u32 4294901760, %v151_v0  ;;  %9516 = vmatprep.subr.mxu1 %v10784_v8  ;;  %p10670_p8 = por %p10669_p7, %p10668_p6 }
  0x2d   :  { %v154_v19 = vsel %vm45_vm0, %v124_v1, 0  ;;  %v125_v20 = vld [vmem:[#allocation2 + $0x30] sm:$0xff]  ;;  %9517 = vmatpush3.msra.mxu1 %v10784_v8  ;;  %v11073_v55 = vsub.f32 %v949_v47, %v11058_v53  ;;  %v955_v1 = vld [vmem:[%s12441_s6 + $0x18] sm:$0xff] }
  0x2e   :  { %9459 = vmatmul.mubr.f32.vlgmr.msra.gmra.mxu0 %v245_v2  ;;  %v255_v21 = vand.u32 4294901760, %v254_v6  ;;  %v264_v22 = vsub.f32 %v10975_v63, %v263_v17  ;;  %v10994_v23 = vsub.f32 %v151_v0, %v10985_v18  ;;  %9484 = vmatprep.mubr.f32.mxu1 %v10985_v18  ;;  %v10997_v24 = vand.u32 4294901760, %v154_v19  ;;  %v954_v6 = vld [vmem:[%s12441_s6 + $0x10] sm:$0xff]  ;;  %p10671_p9 = pnand %p10670_p8, %p10664_p5 }
  0x2f   :  { %9491 = vmatpush3.msra.mxu0 %v10790_v9  ;;  %v157_v25 = vsel %vm45_vm0, %v125_v20, 0  ;;  %9550 = vmatprep.subr.mxu1 %v10757_v3  ;;  %v11219_v2 = vand.u32 4294901760, %v955_v1 }
  0x30   :  { %v126_v26 = vld [vmem:[#allocation2 + $0x38] sm:$0xff]  ;;  %9461 = vmatprep.mubr.f32.mxu0 %v255_v21  ;;  %9492 = vmatprep.subr.mxu0 %v10793_v10  ;;  %v265_v27 = vand.u32 4294901760, %v264_v22  ;;  %v273_v28 = vand.u32 4294901760, %v10994_v23  ;;  %v11005_v29 = vsub.f32 %v154_v19, %v10997_v24  ;;  %v11007_v30 = vand.u32 4294901760, %v157_v25  ;;  %v953_v19 = vld [vmem:[%s12441_s6 + $0x8] sm:$0xff] }
  0x31   :  { %9493 = vmatpush3.msra.mxu0 %v10793_v10  ;;  %9485 = vmatmul.mubr.f32.gmra.mxu1 %v10997_v24  ;;  %v160_v9 = vsel %vm45_vm0, %v126_v26, 0  ;;  %v11240_v22 = vand.u32 4294901760, %v953_v19 }
  0x32   :  { %9462 = vmatmul.mubr.f32.gmra.mxu0 %v265_v27  ;;  %v274_v31 = vsub.f32 %v10994_v23, %v273_v28  ;;  %9494 = vmatprep.subr.mxu0 %v10796_v11  ;;  %v283_v32 = vand.u32 4294901760, %v11005_v29  ;;  %v11016_v33 = vsub.f32 %v157_v25, %v11007_v30  ;;  %v11018_v34 = vand.u32 4294901760, %v160_v9 }
  0x33   :  { %9495 = vmatpush3.msra.mxu0 %v10796_v11  ;;  %9487 = vmatprep.mubr.f32.mxu1 %v11007_v30  ;;  %v11253_v26 = vsub.f32 %v953_v19, %v11240_v22 }
  0x34   :  { %v275_v10 = vand.u32 4294901760, %v274_v31  ;;  %v284_v35 = vsub.f32 %v11005_v29, %v283_v32  ;;  %v293_v36 = vand.u32 4294901760, %v11016_v33  ;;  %9496 = vmatprep.subr.mxu0 %v10802_v12  ;;  %v11026_v38 = vsub.f32 %v160_v9, %v11018_v34 }
  0x35   :  { %9488 = vmatmul.mubr.f32.gmra.mxu1 %v11018_v34  ;;  %9497 = vmatpush3.msra.mxu0 %v10802_v12 }
  0x36   :  { %9464 = vmatprep.mubr.f32.mxu0 %v275_v10  ;;  %v285_v11 = vand.u32 4294901760, %v284_v35  ;;  %v294_v40 = vsub.f32 %v11016_v33, %v293_v36  ;;  %v303_v41 = vand.u32 4294901760, %v11026_v38  ;;  %9518 = vmatprep.mubr.f32.mxu1 %v233_v48  ;;  %v11049_v48 = vand.u32 4294901760, %v950_v44 }
  0x37   :  { %9530 = vmatprep.subr.mxu0 %v10807_v13 }
  0x38   :  { %9465 = vmatmul.mubr.f32.gmra.mxu0 %v285_v11  ;;  %v295_v46 = vand.u32 4294901760, %v294_v40  ;;  %v304_v12 = vsub.f32 %v11026_v38, %v303_v41  ;;  %v11297_v11 = vld [vmem:[%s12440_s5] ss:$0 sm:$0xff] }
  0x39   :  { %9519 = vmatmul.mubr.f32.vlgmr.msra.gmra.mxu1 %v243_v56 }
  0x3a   :  { %9467 = vmatprep.mubr.f32.mxu0 %v295_v46  ;;  %v305_v51 = vand.u32 4294901760, %v304_v12  ;;  %9551 = vmatpush3.msra.mxu1 %v10757_v3  ;;  %v11065_v3 = vsub.f32 %v950_v44, %v11049_v48 }
  0x3b   :  { %9521 = vmatprep.mubr.f32.mxu1 %v253_v62  ;;  %9552 = vmatprep.subr.mxu1 %v10759_v4 }
  0x3c   :  { %9468 = vmatmul.mubr.f32.gmra.mxu0 %v305_v51  ;;  %9553 = vmatpush3.msra.mxu1 %v10759_v4  ;;  %v948_v4 = vld [vmem:[%s12439_s4] sm:$0xff] }
  0x3d   :  { %9498 = vmatprep.mubr.f32.mxu0 %v10926_v42  ;;  %9522 = vmatmul.mubr.f32.gmra.mxu1 %v263_v17  ;;  %v1074_v42 = vsub.f32 %v11056_v52, %v11070_v54  ;;  %v11092_v56 = vand.u32 4294901760, %v948_v4  ;;  %v11225_v17 = vsub.f32 %v955_v1, %v11219_v2 }
  0x3e   :  { %9524 = vmatprep.mubr.f32.mxu1 %v273_v28  ;;  %9554 = vmatprep.subr.mxu1 %v10761_v5 }
  0x3f   :  { %9555 = vmatpush3.msra.mxu1 %v10761_v5  ;;  %v11083_v5 = vand.u32 4294901760, %v11065_v3  ;;  %v11235_v20 = vand.u32 4294901760, %v11225_v17 }
  0x40   :  { %9499 = vmatmul.mubr.f32.vlgmr.msra.gmra.mxu0 %v10944_v49  ;;  %9556 = vmatprep.subr.mxu1 %v10784_v8  ;;  %v11090_v49 = vand.u32 4294901760, %v11073_v55 }
  0x41   :  { %9531 = vmatpush3.msra.mxu0 %v10807_v13  ;;  %9501 = vmatprep.mubr.f32.mxu0 %v10962_v57  ;;  %12461 = vst [vmem:[#allocation9_spill] sm:$0xff] %v11083_v5  ;;  %v1081_v13 = vsub.f32 %v11065_v3, %v11083_v5  ;;  %v11106_v57 = vand.u32 4294901760, %v1074_v42 }
  0x42   :  { %9532 = vmatprep.subr.mxu0 %v10811_v14  ;;  %9525 = vmatmul.mubr.f32.gmra.mxu1 %v283_v32  ;;  %12462 = vst [vmem:[#allocation10_spill] sm:$0xff] %v11090_v49  ;;  %v1088_v59 = vsub.f32 %v11073_v55, %v11090_v49 }
  0x43   :  { %9533 = vmatpush3.msra.mxu0 %v10811_v14  ;;  %9527 = vmatprep.mubr.f32.mxu1 %v293_v36  ;;  %v963_v14 = vld [vmem:[%s12436_s1] sm:$0xff]  ;;  %v11117_v60 = vand.u32 4294901760, %v1081_v13 }
  0x44   :  { %9502 = vmatmul.mubr.f32.gmra.mxu0 %v10975_v63  ;;  %9534 = vmatprep.subr.mxu0 %v10814_v15 }
  0x45   :  { %9504 = vmatprep.mubr.f32.mxu0 %v10994_v23  ;;  %9535 = vmatpush3.msra.mxu0 %v10814_v15  ;;  %v11111_v15 = vsub.f32 %v948_v4, %v11092_v56  ;;  %v952_v23 = vld [vmem:[%s12441_s6] sm:$0xff] }
  0x46   :  { %9536 = vmatprep.subr.mxu0 %v10820_v16  ;;  %9528 = vmatmul.mubr.f32.gmra.mxu1 %v303_v41  ;;  %v11255_v27 = vand.u32 4294901760, %v952_v23 }
  0x47   :  { %9537 = vmatpush3.msra.mxu0 %v10820_v16  ;;  %9557 = vmatpush3.msra.mxu1 %v10784_v8  ;;  %v965_v8 = vsel %vm45_vm0, %v963_v14, 0  ;;  %v11124_v16 = vand.u32 4294901760, %v1088_v59  ;;  %v11127_v61 = vand.u32 4294901760, %v11111_v15 }
  0x48   :  { %9505 = vmatmul.mubr.f32.gmra.mxu0 %v11005_v29  ;;  %9558 = vmatprep.mubr.f32.mxu1 %v10911_v37  ;;  %v11131_v62 = vand.u32 4294901760, %v965_v8  ;;  %v11267_v9 = vsub.f32 %v952_v23, %v11255_v27 }
  0x49   :  { %9507 = vmatprep.mubr.f32.mxu0 %v11016_v33  ;;  %9570 = vmatprep.subr.mxu0 %v12445_v7  ;;  %12463 = vst [vmem:[#allocation11_spill] sm:$0xff] %v11127_v61  ;;  %v1095_v63 = vsub.f32 %v11111_v15, %v11127_v61 }
  0x4a   :  { %9559 = vmatmul.mubr.f32.vlgmr.msra.gmra.mxu1 %v10929_v43  ;;  %9581 = vmatprep.subr.mxu1 %v12445_v7  ;;  %v1037_v0 = vsub.f32 %v965_v8, %v11131_v62  ;;  %v11277_v33 = vand.u32 4294901760, %v11267_v9 }
  0x4b   :  { %9582 = vmatpush3.msra.mxu1 %v11106_v57  ;;  %9561 = vmatprep.mubr.f32.mxu1 %v10947_v50 }
  0x4c   :  { %9508 = vmatmul.mubr.f32.gmra.mxu0 %v11026_v38  ;;  %9583 = vmatprep.subr.mxu1 %v12445_v7  ;;  %v1585_v10 = vsub.f32 %v11267_v9, %v11277_v33 }
  0x4d   :  { %9538 = vmatprep.mubr.f32.mxu0 %v10911_v37  ;;  %9584 = vmatpush3.msra.mxu1 %v11117_v60  ;;  %v11150_v37 = vand.u32 4294901760, %v1095_v63 }
  0x4e   :  { %9562 = vmatmul.mubr.f32.gmra.mxu1 %v10965_v58  ;;  %9585 = vmatprep.subr.mxu1 %v12445_v7  ;;  %v11287_v35 = vand.u32 4294901760, %v1585_v10 }
  0x4f   :  { %9564 = vmatprep.mubr.f32.mxu1 %v10985_v18  ;;  %9586 = vmatpush3.msra.mxu1 %v11124_v16 }
  0x50   :  { %9539 = vmatmul.mubr.f32.vlgmr.msra.gmra.mxu0 %v10929_v43  ;;  %9587 = vmatprep.subr.mxu1 %v12445_v7  ;;  %v1038_v43 = vand.u32 4294901760, %v1037_v0  ;;  %12467 = vst [vmem:[#allocation15_spill] sm:$0xff] %v11287_v35 }
  0x51   :  { %9571 = vmatpush3.msra.mxu0 %v11041_v45  ;;  %9541 = vmatprep.mubr.f32.mxu0 %v10947_v50 }
  0x52   :  { %9572 = vmatprep.subr.mxu0 %v12445_v7  ;;  %9565 = vmatmul.mubr.f32.gmra.mxu1 %v10997_v24  ;;  %v1039_v50 = vsub.f32 %v1037_v0, %v1038_v43 }
  0x53   :  { %9573 = vmatpush3.msra.mxu0 %v11049_v48  ;;  %9567 = vmatprep.mubr.f32.mxu1 %v11007_v30 }
  0x54   :  { %9542 = vmatmul.mubr.f32.gmra.mxu0 %v10965_v58  ;;  %9574 = vmatprep.subr.mxu0 %v12445_v7  ;;  %v1040_v58 = vand.u32 4294901760, %v1039_v50 }
  0x55   :  { %9544 = vmatprep.mubr.f32.mxu0 %v10985_v18  ;;  %9575 = vmatpush3.msra.mxu0 %v11058_v53  ;;  %v11227_v18 = vand.u32 4294901760, %v954_v6 }
  0x56   :  { %9576 = vmatprep.subr.mxu0 %v12445_v7  ;;  %9568 = vmatmul.mubr.f32.gmra.mxu1 %v11018_v34 }
  0x57   :  { %9577 = vmatpush3.msra.mxu0 %v11092_v56  ;;  %9588 = vmatpush3.msra.mxu1 %v11150_v37  ;;  %v11238_v21 = vsub.f32 %v954_v6, %v11227_v18 }
  0x58   :  { %9545 = vmatmul.mubr.f32.gmra.mxu0 %v10997_v24  ;;  %9589 = vmatprep.mubr.msk.f32.mxu1 %vm10689_vm2, %v12445_v7  ;;  %v1564_v24 = vsub.f32 %v11225_v17, %v11235_v20 }
  0x59   :  { %9547 = vmatprep.mubr.f32.mxu0 %v11007_v30  ;;  %9592 = vmatprep.subr.mxu0 %v12445_v7  ;;  %v11250_v25 = vand.u32 4294901760, %v11238_v21  ;;  %v11264_v30 = vand.u32 4294901760, %v11253_v26 }
  0x5a   :  { %9603 = vmatprep.subr.mxu1 %v12445_v7  ;;  %9590 = vmatmul.mubr.f32.vlgmr.msra.gmra.mxu1 %v11131_v62  ;;  %v11259_v28 = vand.u32 4294901760, %v1564_v24 }
  0x5b   :  { %9604 = vmatpush3.msra.mxu1 %v11041_v45  ;;  %9611 = vmatprep.mubr.msk.f32.mxu1 %vm10689_vm2, %v12445_v7  ;;  %v1571_v29 = vsub.f32 %v11238_v21, %v11250_v25  ;;  %v1578_v32 = vsub.f32 %v11253_v26, %v11264_v30 }
  0x5c   :  { %9548 = vmatmul.mubr.f32.gmra.mxu0 %v11018_v34  ;;  %9605 = vmatprep.subr.mxu1 %v12445_v7  ;;  %12464 = vst [vmem:[#allocation12_spill] sm:$0xff] %v11259_v28 }
  0x5d   :  { %9578 = vmatprep.mubr.msk.f32.mxu0 %vm10689_vm2, %v12445_v7  ;;  %9606 = vmatpush3.msra.mxu1 %v11049_v48  ;;  %v11272_v31 = vand.u32 4294901760, %v1571_v29  ;;  %v11281_v34 = vand.u32 4294901760, %v1578_v32 }
  0x5e   :  { %9607 = vmatprep.subr.mxu1 %v12445_v7 }
  0x5f   :  { %9608 = vmatpush3.msra.mxu1 %v11058_v53  ;;  %12465 = vst [vmem:[#allocation13_spill] sm:$0xff] %v11272_v31  ;;  %12466 = vst [vmem:[#allocation14_spill] sm:$0xff] %v11281_v34 }
  0x60   :  { %9579 = vmatmul.mubr.f32.vlgmr.msra.gmra.mxu0 %v1040_v58  ;;  %9609 = vmatprep.subr.mxu1 %v12445_v7 }
  0x61   :  { %9593 = vmatpush3.msra.mxu0 %v11056_v52  ;;  %9600 = vmatprep.mubr.msk.f32.mxu0 %vm10689_vm2, %v12445_v7 }
  0x62   :  { %9594 = vmatprep.subr.mxu0 %v12445_v7  ;;  %9610 = vmatpush3.msra.mxu1 %v11092_v56 }
  0x63   :  { %9595 = vmatpush3.msra.mxu0 %v11065_v3  ;;  %9625 = vmatprep.subr.mxu1 %v12445_v7 }
  0x64   :  { %9596 = vmatprep.subr.mxu0 %v12445_v7  ;;  %9612 = vmatmul.mubr.f32.vlgmr.msra.gmra.mxu1 %v1038_v43 }
  0x65   :  { %9597 = vmatpush3.msra.mxu0 %v11073_v55  ;;  %9626 = vmatpush3.msra.mxu1 %v11041_v45 }
  0x66   :  { %9598 = vmatprep.subr.mxu0 %v12445_v7  ;;  %9627 = vmatprep.subr.mxu1 %v12445_v7 }
  0x67   :  { %9599 = vmatpush3.msra.mxu0 %v11111_v15  ;;  %9628 = vmatpush3.msra.mxu1 %v11049_v48 }
  0x68   :  { %9601 = vmatmul.mubr.f32.vlgmr.msra.gmra.mxu0 %v1037_v0  ;;  %9614 = vmatprep.subr.mxu0 %v12445_v7 }
  0x69   :  { %9615 = vmatpush3.msra.mxu0 %v11070_v54  ;;  %9629 = vmatprep.subr.mxu1 %v12445_v7 }
  0x6a   :  { %9616 = vmatprep.subr.mxu0 %v12445_v7  ;;  %9630 = vmatpush3.msra.mxu1 %v11058_v53 }
  0x6b   :  { %9617 = vmatpush3.msra.mxu0 %v11083_v5  ;;  %9631 = vmatprep.subr.mxu1 %v12445_v7 }
  0x6c   :  { %9618 = vmatprep.subr.mxu0 %v12445_v7  ;;  %9622 = vmatprep.mubr.msk.f32.mxu0 %vm10689_vm2, %v12445_v7 }
  0x6d   :  { %9619 = vmatpush3.msra.mxu0 %v11090_v49  ;;  %9632 = vmatpush3.msra.mxu1 %v11092_v56 }
  0x6e   :  { %9620 = vmatprep.subr.mxu0 %v12445_v7  ;;  %9633 = vmatprep.mubr.msk.f32.mxu1 %vm10689_vm2, %v12445_v7 }
  0x6f   :  { %9621 = vmatpush3.msra.mxu0 %v11127_v61  ;;  %9634 = vmatmul.mubr.f32.vlgmr.msra.gmra.mxu1 %v11131_v62 }
  0x70   :  { %9623 = vmatmul.mubr.f32.vlgmr.msra.gmra.mxu0 %v11131_v62  ;;  %9647 = vmatprep.subr.mxu1 %v12445_v7 }
  0x71   :  { %9636 = vmatprep.subr.mxu0 %v12445_v7  ;;  %9655 = vmatprep.mubr.msk.f32.mxu1 %vm10689_vm2, %v12445_v7 }
  0x72   :  { %9644 = vmatprep.mubr.msk.f32.mxu0 %vm10689_vm2, %v12445_v7  ;;  %9637 = vmatpush3.msra.mxu0 %v11219_v2 }
  0x73   :  { %9638 = vmatprep.subr.mxu0 %v12445_v7  ;;  %9648 = vmatpush3.msra.mxu1 %v11259_v28 }
  0x74   :  { %9639 = vmatpush3.msra.mxu0 %v11227_v18  ;;  %9649 = vmatprep.subr.mxu1 %v12445_v7 }
  0x75   :  { %9640 = vmatprep.subr.mxu0 %v12445_v7  ;;  %9650 = vmatpush3.msra.mxu1 %v11272_v31 }
  0x76   :  { %9641 = vmatpush3.msra.mxu0 %v11240_v22  ;;  %9651 = vmatprep.subr.mxu1 %v12445_v7 }
  0x77   :  { %9642 = vmatprep.subr.mxu0 %v12445_v7  ;;  %9652 = vmatpush3.msra.mxu1 %v11281_v34 }
  0x78   :  { %9643 = vmatpush3.msra.mxu0 %v11255_v27  ;;  %9653 = vmatprep.subr.mxu1 %v12445_v7 }
  0x79   :  { %9658 = vmatprep.subr.mxu0 %v12445_v7  ;;  %9654 = vmatpush3.msra.mxu1 %v11287_v35 }
  0x7a   :  { %9669 = vmatprep.subr.mxu1 %v12445_v7 }
  0xe6   :  { %v9480_v36 = vpop.f32.mrf.mxu1 }
  0xe8   :  { %v11292_v38 = vpop.f32.mrf.mxu1 }
  0xea   :  { %v9483_v39 = vpop.f32.mrf.mxu1 }
  0xec   :  { %v410_v40 = vpop.f32.mrf.mxu1 }
  0xee   :  { %v9460_v41 = vpop.f32.mrf.mxu0 }
  0xef   :  { %v248_v44 = vadd.f32 %v9460_v41, %v11297_v11 }
  0xf0   :  { %v11300_v46 = vpop.f32.mrf.mxu0 }
  0xf1   :  { %v405_v12 = vadd.f32 %v9480_v36, %v248_v44  ;;  %v9486_v47 = vpop.f32.mrf.mxu1 }
  0xf2   :  { %v9463_v51 = vpop.f32.mrf.mxu0 }
  0xf3   :  { %v268_v4 = vadd.f32 %v9463_v51, %v11297_v11  ;;  %v422_v42 = vpop.f32.mrf.mxu1 }
  0xf4   :  { %v257_v13 = vpop.f32.mrf.mxu0 }
  0xf5   :  { %v417_v14 = vadd.f32 %v9483_v39, %v268_v4  ;;  %v9489_v59 = vpop.f32.mrf.mxu1  ;;  %v258_v10 = vadd.f32 %v11297_v11, %v257_v13 }
  0xf7   :  { %v434_v8 = vpop.f32.mrf.mxu1 }
  0xf8   :  { %v9466_v62 = vpop.f32.mrf.mxu0 }
  0xf9   :  { %v288_v63 = vadd.f32 %v9466_v62, %v11297_v11  ;;  %v9520_v0 = vpop.f32.mrf.mxu1 }
  0xfa   :  { %v277_v43 = vpop.f32.mrf.mxu0 }
  0xfb   :  { %v429_v50 = vadd.f32 %v9486_v47, %v288_v63  ;;  %v11304_v58 = vpop.f32.mrf.mxu1  ;;  %v411_v47 = vadd.f32 %v410_v40, %v258_v10  ;;  %v278_v62 = vadd.f32 %v11297_v11, %v277_v43 }
  0xfc   :  { %v9469_v1 = vpop.f32.mrf.mxu0 }
  0xfd   :  { %v308_v6 = vadd.f32 %v9469_v1, %v11297_v11  ;;  %v9523_v19 = vpop.f32.mrf.mxu1  ;;  %v423_v61 = vadd.f32 %v422_v42, %v278_v62 }
  0xfe   :  { %v297_v23 = vpop.f32.mrf.mxu0 }
  0xff   :  { %v441_v24 = vadd.f32 %v9489_v59, %v308_v6  ;;  %v662_v29 = vpop.f32.mrf.mxu1  ;;  %v298_v13 = vadd.f32 %v11297_v11, %v297_v23 }
 0x100   :  { %v9500_v32 = vpop.f32.mrf.mxu0 }
 0x101   :  { %v528_v36 = vadd.f32 %v9500_v32, %v405_v12  ;;  %v435_v10 = vadd.f32 %v434_v8, %v298_v13 }
 0x102   :  { %v11308_v39 = vpop.f32.mrf.mxu0  ;;  %v9526_v41 = vpop.f32.mrf.mxu1 }
 0x103   :  { %v655_v44 = vadd.f32 %v9520_v0, %v528_v36 }
 0x104   :  { %v9503_v51 = vpop.f32.mrf.mxu0  ;;  %v678_v4 = vpop.f32.mrf.mxu1 }
 0x105   :  { %v542_v63 = vadd.f32 %v9503_v51, %v417_v14 }
 0x106   :  { %v534_v7 = vpop.f32.mrf.mxu0  ;;  %v9529_v1 = vpop.f32.mrf.mxu1 }
 0x107   :  { %v671_v35 = vadd.f32 %v9523_v19, %v542_v63  ;;  %v535_v34 = vadd.f32 %v534_v7, %v411_v47 }
 0x108   :  { %v9506_v59 = vpop.f32.mrf.mxu0  ;;  %v694_v6 = vpop.f32.mrf.mxu1 }
 0x109   :  { %v663_v12 = vadd.f32 %v662_v29, %v535_v34  ;;  %v556_v32 = vadd.f32 %v9506_v59, %v429_v50 }
 0x10a   :  { %v548_v31 = vpop.f32.mrf.mxu0  ;;  %v9560_v49 = vpop.f32.mrf.mxu1 }
 0x10b   :  { %v687_v0 = vadd.f32 %v9526_v41, %v556_v32  ;;  %v549_v36 = vadd.f32 %v548_v31, %v423_v61 }
 0x10c   :  { %v9509_v28 = vpop.f32.mrf.mxu0  ;;  %v902_v40 = vpop.f32.mrf.mxu1 }
 0x10d   :  { %v679_v43 = vadd.f32 %v678_v4, %v549_v36  ;;  %v570_v14 = vadd.f32 %v9509_v28, %v441_v24 }
 0x10e   :  { %v562_v51 = vpop.f32.mrf.mxu0  ;;  %v9563_v5 = vpop.f32.mrf.mxu1 }
 0x10f   :  { %v703_v19 = vadd.f32 %v9529_v1, %v570_v14  ;;  %v563_v7 = vadd.f32 %v562_v51, %v435_v10 }
 0x110   :  { %v9540_v47 = vpop.f32.mrf.mxu0  ;;  %v914_v63 = vpop.f32.mrf.mxu1 }
 0x111   :  { %v695_v42 = vadd.f32 %v694_v6, %v563_v7  ;;  %v792_v62 = vadd.f32 %v9540_v47, %v655_v44 }
 0x112   :  { %v785_v23 = vpop.f32.mrf.mxu0  ;;  %v9566_v34 = vpop.f32.mrf.mxu1 }
 0x113   :  { %v11312_v50 = vadd.f32 %v9560_v49, %v792_v62 }
 0x114   :  { %v9543_v29 = vpop.f32.mrf.mxu0  ;;  %v926_v41 = vpop.f32.mrf.mxu1 }
 0x115   :  { %v804_v61 = vadd.f32 %v9543_v29, %v671_v35 }
 0x116   :  { %v797_v31 = vpop.f32.mrf.mxu0  ;;  %v9569_v59 = vpop.f32.mrf.mxu1 }
 0x117   :  { %v11314_v8 = vadd.f32 %v9563_v5, %v804_v61  ;;  %v798_v28 = vadd.f32 %v797_v31, %v663_v12 }
 0x118   :  { %v9546_v24 = vpop.f32.mrf.mxu0  ;;  %v938_v4 = vpop.f32.mrf.mxu1 }
 0x119   :  { %v11316_v1 = vadd.f32 %v914_v63, %v798_v28  ;;  %v816_v13 = vadd.f32 %v9546_v24, %v687_v0  ;;  %v238_v0 = vadd.f32 %v11297_v11, %v11300_v46 }
 0x11a   :  { %v809_v32 = vpop.f32.mrf.mxu0  ;;  %v1133_v6 = vpop.f32.mrf.mxu1 }
 0x11b   :  { %v11318_v44 = vadd.f32 %v9566_v34, %v816_v13  ;;  %v810_v36 = vadd.f32 %v809_v32, %v679_v43  ;;  %v399_v43 = vadd.f32 %v11292_v38, %v238_v0  ;;  %v12473_v0 = vld [vmem:[#allocation11_spill] sm:$0xff] }
 0x11c   :  { %v9549_v49 = vpop.f32.mrf.mxu0  ;;  %v9591_v10 = vpop.f32.mrf.mxu1 }
 0x11d   :  { %v11320_v14 = vadd.f32 %v926_v41, %v810_v36  ;;  %v828_v35 = vadd.f32 %v9549_v49, %v703_v19  ;;  %v521_v41 = vadd.f32 %v11308_v39, %v399_v43 }
 0x11e   :  { %v821_v51 = vpop.f32.mrf.mxu0 }
 0x11f   :  { %v11322_v7 = vadd.f32 %v9569_v59, %v828_v35  ;;  %v822_v5 = vadd.f32 %v821_v51, %v695_v42  ;;  %v647_v59 = vadd.f32 %v11304_v58, %v521_v41  ;;  %v12469_v51 = vld [vmem:[#allocation9_spill] sm:$0xff] }
 0x120   :  { %v1042_v12 = vpop.f32.mrf.mxu0 }
 0x121   :  { %v11324_v47 = vadd.f32 %v938_v4, %v822_v5  ;;  %v1134_v61 = vadd.f32 %v1133_v6, %v1042_v12  ;;  %v786_v42 = vadd.f32 %v785_v23, %v647_v59  ;;  %v12468_v23 = vmov 0.0   ;;  %v12470_v5 = vld [vmem:[#allocation12_spill] sm:$0xff]  ;;  %v12471_v12 = vld [vmem:[#allocation10_spill] sm:$0xff] }
 0x122   :  { %v9580_v63 = vpop.f32.mrf.mxu0  ;;  %v11475_v59 = vld [vmem:[%s12442_s7] ss:$0 sm:$0xff] }
 0x123   :  { %v903_v11 = vadd.f32 %v902_v40, %v786_v42  ;;  %v12472_v63 = vld [vmem:[#allocation13_spill] sm:$0xff] }
 0x124   :  { %v1290_v62 = vpop.f32.mrf.mxu1 }
 0x126   :  { %v9613_v34 = vpop.f32.mrf.mxu1 }
 0x127   :  { %v12475_v34 = vld [vmem:[#allocation15_spill] sm:$0xff] }
 0x128   :  { %v1213_v29 = vpop.f32.mrf.mxu0 }
 0x129   :  { %v1214_v31 = vadd.f32 %v1213_v29, %v1134_v61 }
 0x12a   :  { %v9602_v19 = vpop.f32.mrf.mxu0 }
 0x12b   :  { %v1291_v28 = vadd.f32 %v1290_v62, %v1214_v31  ;;  %v12474_v62 = vld [vmem:[#allocation14_spill] sm:$0xff] }
 0x12f   :  { %v1448_v24 = vpop.f32.mrf.mxu1 }
 0x130   :  { %v1373_v4 = vpop.f32.mrf.mxu0 }
 0x131   :  { %v1374_v13 = vadd.f32 %v1373_v4, %v1291_v28  ;;  %v9635_v32 = vpop.f32.mrf.mxu1 }
 0x132   :  { %v9624_v36 = vpop.f32.mrf.mxu0 }
 0x133   :  { %v1449_v46 = vadd.f32 %v1448_v24, %v1374_v13 }
 0x135   :  { %v1452_v49 = vadd.f32 %v1449_v46, %v903_v11 }
 0x137   :  { %10634 = vtanh.f32 %v1452_v49 }
 0x144   :  { %v10635_v38 = vpop.eup %10634 }
 0x145   :  { %v1455_v10 = vsel %vm45_vm0, %v10635_v38, 0 }
 0x146   :  { %v11332_v39 = vand.u32 4294901760, %v1455_v10 }
 0x148   :  { %9656 = vmatmul.mubr.f32.vlgmr.msra.gmra.mxu1 %v11332_v39  ;;  %v11336_v58 = vsub.f32 %v1455_v10, %v11332_v39 }
 0x149   :  { %9670 = vmatpush3.msra.mxu1 %v11219_v2  ;;  %9677 = vmatprep.mubr.msk.f32.mxu1 %vm10689_vm2, %v12468_v23 }
 0x14a   :  { %9671 = vmatprep.subr.mxu1 %v12468_v23  ;;  %v11343_v40 = vand.u32 4294901760, %v11336_v58 }
 0x14b   :  { %9672 = vmatpush3.msra.mxu1 %v11227_v18 }
 0x14c   :  { %9673 = vmatprep.subr.mxu1 %v12468_v23  ;;  %v1529_v6 = vsub.f32 %v11336_v58, %v11343_v40 }
 0x14d   :  { %9674 = vmatpush3.msra.mxu1 %v11240_v22 }
 0x14e   :  { %9675 = vmatprep.subr.mxu1 %v12468_v23  ;;  %v1530_v35 = vand.u32 4294901760, %v1529_v6 }
 0x14f   :  { %9676 = vmatpush3.msra.mxu1 %v11255_v27 }
 0x150   :  { %9678 = vmatmul.mubr.f32.vlgmr.msra.gmra.mxu1 %v11343_v40  ;;  %9691 = vmatprep.subr.mxu1 %v12468_v23 }
 0x151   :  { %9645 = vmatmul.mubr.f32.vlgmr.msra.gmra.mxu0 %v1530_v35  ;;  %9692 = vmatpush3.msra.mxu1 %v11219_v2 }
 0x152   :  { %9659 = vmatpush3.msra.mxu0 %v11225_v17  ;;  %9693 = vmatprep.subr.mxu1 %v12468_v23 }
 0x153   :  { %9660 = vmatprep.subr.mxu0 %v12468_v23  ;;  %9694 = vmatpush3.msra.mxu1 %v11227_v18 }
 0x154   :  { %9661 = vmatpush3.msra.mxu0 %v11238_v21  ;;  %9695 = vmatprep.subr.mxu1 %v12468_v23 }
 0x155   :  { %9662 = vmatprep.subr.mxu0 %v12468_v23  ;;  %9696 = vmatpush3.msra.mxu1 %v11240_v22 }
 0x156   :  { %9663 = vmatpush3.msra.mxu0 %v11253_v26  ;;  %9697 = vmatprep.subr.mxu1 %v12468_v23 }
 0x157   :  { %9664 = vmatprep.subr.mxu0 %v12468_v23  ;;  %9666 = vmatprep.mubr.msk.f32.mxu0 %vm10689_vm2, %v12468_v23 }
 0x158   :  { %9665 = vmatpush3.msra.mxu0 %v11267_v9  ;;  %9698 = vmatpush3.msra.mxu1 %v11255_v27 }
 0x159   :  { %9699 = vmatprep.mubr.msk.f32.mxu1 %vm10689_vm2, %v12468_v23  ;;  %9667 = vmatmul.mubr.f32.vlgmr.msra.gmra.mxu0 %v11336_v58 }
 0x15a   :  { %9680 = vmatprep.subr.mxu0 %v12468_v23  ;;  %9700 = vmatmul.mubr.f32.vlgmr.msra.gmra.mxu1 %v11332_v39 }
 0x15b   :  { %9713 = vmatprep.subr.mxu1 %v12468_v23  ;;  %9681 = vmatpush3.msra.mxu0 %v11235_v20 }
 0x15c   :  { %9714 = vmatpush3.msra.mxu1 %v11106_v57  ;;  %9682 = vmatprep.subr.mxu0 %v12468_v23 }
 0x15d   :  { %9715 = vmatprep.subr.mxu1 %v12468_v23  ;;  %9683 = vmatpush3.msra.mxu0 %v11250_v25 }
 0x15e   :  { %9716 = vmatpush3.msra.mxu1 %v11117_v60  ;;  %9684 = vmatprep.subr.mxu0 %v12468_v23 }
 0x15f   :  { %9717 = vmatprep.subr.mxu1 %v12468_v23  ;;  %9685 = vmatpush3.msra.mxu0 %v11264_v30 }
 0x160   :  { %9718 = vmatpush3.msra.mxu1 %v11124_v16  ;;  %9686 = vmatprep.subr.mxu0 %v12468_v23 }
 0x161   :  { %9719 = vmatprep.subr.mxu1 %v12468_v23  ;;  %9687 = vmatpush3.msra.mxu0 %v11277_v33 }
 0x162   :  { %9688 = vmatprep.mubr.msk.f32.mxu0 %vm10689_vm2, %v12468_v23  ;;  %9720 = vmatpush3.msra.mxu1 %v11150_v37 }
 0x163   :  { %9721 = vmatprep.mubr.msk.f32.mxu1 %vm10689_vm2, %v12468_v23  ;;  %9689 = vmatmul.mubr.f32.vlgmr.msra.gmra.mxu0 %v11332_v39 }
 0x164   :  { %9702 = vmatprep.subr.mxu0 %v12468_v23  ;;  %9722 = vmatmul.mubr.f32.vlgmr.msra.gmra.mxu1 %v11332_v39 }
 0x165   :  { %9735 = vmatprep.subr.mxu1 %v12468_v23  ;;  %9703 = vmatpush3.msra.mxu0 %v11041_v45 }
 0x166   :  { %9736 = vmatpush3.msra.mxu1 %v11041_v45  ;;  %9704 = vmatprep.subr.mxu0 %v12468_v23 }
 0x167   :  { %9737 = vmatprep.subr.mxu1 %v12468_v23  ;;  %9705 = vmatpush3.msra.mxu0 %v11049_v48 }
 0x168   :  { %9738 = vmatpush3.msra.mxu1 %v11049_v48  ;;  %9706 = vmatprep.subr.mxu0 %v12468_v23 }
 0x169   :  { %9739 = vmatprep.subr.mxu1 %v12468_v23  ;;  %9707 = vmatpush3.msra.mxu0 %v11058_v53 }
 0x16a   :  { %9740 = vmatpush3.msra.mxu1 %v11058_v53  ;;  %9708 = vmatprep.subr.mxu0 %v12468_v23 }
 0x16b   :  { %9741 = vmatprep.subr.mxu1 %v12468_v23  ;;  %9709 = vmatpush3.msra.mxu0 %v11092_v56 }
 0x16c   :  { %9710 = vmatprep.mubr.msk.f32.mxu0 %vm10689_vm2, %v12468_v23  ;;  %9742 = vmatpush3.msra.mxu1 %v11092_v56 }
 0x16d   :  { %9743 = vmatprep.mubr.msk.f32.mxu1 %vm10689_vm2, %v12468_v23  ;;  %9711 = vmatmul.mubr.f32.vlgmr.msra.gmra.mxu0 %v1530_v35 }
 0x16e   :  { %9724 = vmatprep.subr.mxu0 %v12468_v23  ;;  %9744 = vmatmul.mubr.f32.vlgmr.msra.gmra.mxu1 %v11343_v40 }
 0x16f   :  { %9757 = vmatprep.subr.mxu1 %v12468_v23  ;;  %9725 = vmatpush3.msra.mxu0 %v11056_v52 }
 0x170   :  { %9758 = vmatpush3.msra.mxu1 %v11041_v45  ;;  %9726 = vmatprep.subr.mxu0 %v12468_v23 }
 0x171   :  { %9759 = vmatprep.subr.mxu1 %v12468_v23  ;;  %9727 = vmatpush3.msra.mxu0 %v11065_v3 }
 0x172   :  { %9760 = vmatpush3.msra.mxu1 %v11049_v48  ;;  %9728 = vmatprep.subr.mxu0 %v12468_v23 }
 0x173   :  { %9761 = vmatprep.subr.mxu1 %v12468_v23  ;;  %9729 = vmatpush3.msra.mxu0 %v11073_v55 }
 0x174   :  { %9762 = vmatpush3.msra.mxu1 %v11058_v53  ;;  %9730 = vmatprep.subr.mxu0 %v12468_v23 }
 0x175   :  { %9763 = vmatprep.subr.mxu1 %v12468_v23  ;;  %9731 = vmatpush3.msra.mxu0 %v11111_v15 }
 0x176   :  { %9732 = vmatprep.mubr.msk.f32.mxu0 %vm10689_vm2, %v12468_v23  ;;  %9764 = vmatpush3.msra.mxu1 %v11092_v56 }
 0x177   :  { %9765 = vmatprep.mubr.msk.f32.mxu1 %vm10689_vm2, %v12468_v23  ;;  %9733 = vmatmul.mubr.f32.vlgmr.msra.gmra.mxu0 %v11336_v58 }
 0x178   :  { %9746 = vmatprep.subr.mxu0 %v12468_v23  ;;  %9766 = vmatmul.mubr.f32.vlgmr.msra.gmra.mxu1 %v11332_v39 }
 0x179   :  { %9747 = vmatpush3.msra.mxu0 %v11070_v54  ;;  %9754 = vmatprep.mubr.msk.f32.mxu0 %vm10689_vm2, %v12468_v23 }
 0x17a   :  { %9748 = vmatprep.subr.mxu0 %v12468_v23  ;;  %9779 = vmatprep.subr.mxu1 %v12468_v23 }
 0x17b   :  { %9749 = vmatpush3.msra.mxu0 %v12469_v51  ;;  %9780 = vmatpush3.msra.mxu1 %v12470_v5 }
 0x17c   :  { %9750 = vmatprep.subr.mxu0 %v12468_v23  ;;  %9781 = vmatprep.subr.mxu1 %v12468_v23 }
 0x17d   :  { %9751 = vmatpush3.msra.mxu0 %v12471_v12  ;;  %9782 = vmatpush3.msra.mxu1 %v12472_v63 }
 0x17e   :  { %9752 = vmatprep.subr.mxu0 %v12468_v23  ;;  %9783 = vmatprep.subr.mxu1 %v12468_v23 }
 0x17f   :  { %9753 = vmatpush3.msra.mxu0 %v12473_v0  ;;  %9784 = vmatpush3.msra.mxu1 %v12474_v62 }
 0x180   :  { %9755 = vmatmul.mubr.f32.vlgmr.msra.gmra.mxu0 %v11332_v39  ;;  %9785 = vmatprep.subr.mxu1 %v12468_v23 }
 0x181   :  { %9786 = vmatpush3.msra.mxu1 %v12475_v34  ;;  %9768 = vmatprep.subr.mxu0 %v12468_v23 }
 0x182   :  { %9787 = vmatprep.mubr.msk.f32.mxu1 %vm10689_vm2, %v12468_v23  ;;  %9801 = vmatprep.subr.mxu1 %v12468_v23 }
 0x183   :  { %9769 = vmatpush3.msra.mxu0 %v11219_v2  ;;  %9776 = vmatprep.mubr.msk.f32.mxu0 %vm10689_vm2, %v12468_v23 }
 0x184   :  { %9770 = vmatprep.subr.mxu0 %v12468_v23 }
 0x185   :  { %9771 = vmatpush3.msra.mxu0 %v11227_v18 }
 0x186   :  { %9772 = vmatprep.subr.mxu0 %v12468_v23 }
 0x187   :  { %9773 = vmatpush3.msra.mxu0 %v11240_v22 }
 0x188   :  { %9774 = vmatprep.subr.mxu0 %v12468_v23 }
 0x189   :  { %9775 = vmatpush3.msra.mxu0 %v11255_v27 }
 0x18a   :  { %9790 = vmatprep.subr.mxu0 %v12468_v23 }
 0x208   :  { %v1623_v43 = vpop.f32.mrf.mxu1 }
 0x20a   :  { %v9657_v29 = vpop.f32.mrf.mxu1 }
 0x210   :  { %v1780_v41 = vpop.f32.mrf.mxu1 }
 0x211   :  { %v1532_v61 = vpop.f32.mrf.mxu0 }
 0x212   :  { %v9679_v19 = vpop.f32.mrf.mxu1  ;;  %v1533_v42 = vadd.f32 %v11475_v59, %v1532_v61 }
 0x213   :  { %v9646_v31 = vpop.f32.mrf.mxu0 }
 0x214   :  { %v1624_v13 = vadd.f32 %v1623_v43, %v1533_v42 }
 0x219   :  { %v1703_v28 = vpop.f32.mrf.mxu0 }
 0x21a   :  { %v1938_v24 = vpop.f32.mrf.mxu1  ;;  %v1704_v36 = vadd.f32 %v1703_v28, %v1624_v13 }
 0x21b   :  { %v9668_v4 = vpop.f32.mrf.mxu0 }
 0x21c   :  { %v9701_v32 = vpop.f32.mrf.mxu1  ;;  %v1781_v11 = vadd.f32 %v1780_v41, %v1704_v36 }
 0x223   :  { %v1863_v46 = vpop.f32.mrf.mxu0 }
 0x224   :  { %v1864_v49 = vadd.f32 %v1863_v46, %v1781_v11  ;;  %v2110_v38 = vpop.f32.mrf.mxu1 }
 0x225   :  { %v9690_v10 = vpop.f32.mrf.mxu0 }
 0x226   :  { %v1939_v39 = vadd.f32 %v1938_v24, %v1864_v49  ;;  %v9723_v58 = vpop.f32.mrf.mxu1 }
 0x228   :  { %1943 = vst.msk [vmem:[%s12443_s8] sm:$0x3] %vm1942_vm3, %v1939_v39 }
 0x22d   :  { %v2019_v40 = vpop.f32.mrf.mxu0 }
 0x22e   :  { %v2267_v6 = vpop.f32.mrf.mxu1  ;;  %v2111_v19 = vadd.f32 %v2110_v38, %v2019_v40 }
 0x22f   :  { %v9712_v35 = vpop.f32.mrf.mxu0 }
 0x230   :  { %v9745_v29 = vpop.f32.mrf.mxu1 }
 0x237   :  { %v2190_v43 = vpop.f32.mrf.mxu0 }
 0x238   :  { %v2425_v61 = vpop.f32.mrf.mxu1  ;;  %v2191_v42 = vadd.f32 %v2190_v43, %v2111_v19 }
 0x239   :  { %v9734_v41 = vpop.f32.mrf.mxu0 }
 0x23a   :  { %v9767_v31 = vpop.f32.mrf.mxu1  ;;  %v2268_v28 = vadd.f32 %v2267_v6, %v2191_v42 }
 0x240   :  { %v2350_v4 = vpop.f32.mrf.mxu0 }
 0x241   :  { %v2351_v13 = vadd.f32 %v2350_v4, %v2268_v28  ;;  %v10690_v4 = vmov 1983009808  }
 0x242   :  { %v9756_v24 = vpop.f32.mrf.mxu0 }
 0x243   :  { %v2426_v32 = vadd.f32 %v2425_v61, %v2351_v13  ;;  %v2921_v13 = vunpack.c.l.s4 %v10690_v4  ;;  %v2923_v24 = vlaneseq }
 0x245   :  { %v2429_v36 = vadd.f32 %v2426_v32, %v11312_v50 }
 0x247   :  { %10636 = vtanh.f32 %v2429_v36  ;;  %v2922_v36 = vunpack.c.0.s8 %v2921_v13 }
 0x254   :  { %v10637_v11 = vpop.eup %10636 }
 0x255   :  { %v2432_v46 = vsel %vm45_vm0, %v10637_v11, 0  ;;  %v2924_v11 = vshrl.u32 %v2923_v24, 7 }
 0x256   :  { %v11484_v49 = vand.u32 4294901760, %v2432_v46 }
 0x258   :  { %9788 = vmatmul.mubr.f32.vlgmr.msra.gmra.mxu1 %v11484_v49  ;;  %v11488_v38 = vsub.f32 %v2432_v46, %v11484_v49 }
 0x259   :  { %9802 = vmatpush3.msra.mxu1 %v11219_v2  ;;  %9809 = vmatprep.mubr.msk.f32.mxu1 %vm10689_vm2, %v12468_v23 }
 0x25a   :  { %9803 = vmatprep.subr.mxu1 %v12468_v23  ;;  %v11495_v50 = vand.u32 4294901760, %v11488_v38 }
 0x25b   :  { %9804 = vmatpush3.msra.mxu1 %v11227_v18 }
 0x25c   :  { %9805 = vmatprep.subr.mxu1 %v12468_v23  ;;  %v2506_v10 = vsub.f32 %v11488_v38, %v11495_v50 }
 0x25d   :  { %9806 = vmatpush3.msra.mxu1 %v11240_v22 }
 0x25e   :  { %9807 = vmatprep.subr.mxu1 %v12468_v23  ;;  %v2507_v39 = vand.u32 4294901760, %v2506_v10  ;;  %v11625_v10 = vsub.s32 %v2922_v36, %v2924_v11 }
 0x25f   :  { %9808 = vmatpush3.msra.mxu1 %v11255_v27 }
 0x260   :  { %9810 = vmatmul.mubr.f32.vlgmr.msra.gmra.mxu1 %v11495_v50  ;;  %9823 = vmatprep.subr.mxu1 %v12468_v23 }
 0x261   :  { %9777 = vmatmul.mubr.f32.vlgmr.msra.gmra.mxu0 %v2507_v39  ;;  %9824 = vmatpush3.msra.mxu1 %v11219_v2 }
 0x262   :  { %9791 = vmatpush3.msra.mxu0 %v11225_v17  ;;  %9825 = vmatprep.subr.mxu1 %v12468_v23 }
 0x263   :  { %9792 = vmatprep.subr.mxu0 %v12468_v23  ;;  %9826 = vmatpush3.msra.mxu1 %v11227_v18 }
 0x264   :  { %9793 = vmatpush3.msra.mxu0 %v11238_v21  ;;  %9827 = vmatprep.subr.mxu1 %v12468_v23 }
 0x265   :  { %9794 = vmatprep.subr.mxu0 %v12468_v23  ;;  %9828 = vmatpush3.msra.mxu1 %v11240_v22 }
 0x266   :  { %9795 = vmatpush3.msra.mxu0 %v11253_v26  ;;  %9829 = vmatprep.subr.mxu1 %v12468_v23 }
 0x267   :  { %9796 = vmatprep.subr.mxu0 %v12468_v23  ;;  %9798 = vmatprep.mubr.msk.f32.mxu0 %vm10689_vm2, %v12468_v23 }
 0x268   :  { %9797 = vmatpush3.msra.mxu0 %v11267_v9  ;;  %9830 = vmatpush3.msra.mxu1 %v11255_v27 }
 0x269   :  { %9831 = vmatprep.mubr.msk.f32.mxu1 %vm10689_vm2, %v12468_v23  ;;  %9799 = vmatmul.mubr.f32.vlgmr.msra.gmra.mxu0 %v11488_v38 }
 0x26a   :  { %9812 = vmatprep.subr.mxu0 %v12468_v23  ;;  %9832 = vmatmul.mubr.f32.vlgmr.msra.gmra.mxu1 %v11484_v49 }
 0x26b   :  { %9845 = vmatprep.subr.mxu1 %v12468_v23  ;;  %9813 = vmatpush3.msra.mxu0 %v11235_v20 }
 0x26c   :  { %9846 = vmatpush3.msra.mxu1 %v11106_v57  ;;  %9814 = vmatprep.subr.mxu0 %v12468_v23 }
 0x26d   :  { %9847 = vmatprep.subr.mxu1 %v12468_v23  ;;  %9815 = vmatpush3.msra.mxu0 %v11250_v25 }
 0x26e   :  { %9848 = vmatpush3.msra.mxu1 %v11117_v60  ;;  %9816 = vmatprep.subr.mxu0 %v12468_v23 }
 0x26f   :  { %9849 = vmatprep.subr.mxu1 %v12468_v23  ;;  %9817 = vmatpush3.msra.mxu0 %v11264_v30 }
 0x270   :  { %9850 = vmatpush3.msra.mxu1 %v11124_v16  ;;  %9818 = vmatprep.subr.mxu0 %v12468_v23 }
 0x271   :  { %9851 = vmatprep.subr.mxu1 %v12468_v23  ;;  %9819 = vmatpush3.msra.mxu0 %v11277_v33 }
 0x272   :  { %9820 = vmatprep.mubr.msk.f32.mxu0 %vm10689_vm2, %v12468_v23  ;;  %9852 = vmatpush3.msra.mxu1 %v11150_v37 }
 0x273   :  { %9853 = vmatprep.mubr.msk.f32.mxu1 %vm10689_vm2, %v12468_v23  ;;  %9821 = vmatmul.mubr.f32.vlgmr.msra.gmra.mxu0 %v11484_v49 }
 0x274   :  { %9834 = vmatprep.subr.mxu0 %v12468_v23  ;;  %9854 = vmatmul.mubr.f32.vlgmr.msra.gmra.mxu1 %v11484_v49 }
 0x275   :  { %9867 = vmatprep.subr.mxu1 %v12468_v23  ;;  %9835 = vmatpush3.msra.mxu0 %v11041_v45 }
 0x276   :  { %9868 = vmatpush3.msra.mxu1 %v11041_v45  ;;  %9836 = vmatprep.subr.mxu0 %v12468_v23 }
 0x277   :  { %9869 = vmatprep.subr.mxu1 %v12468_v23  ;;  %9837 = vmatpush3.msra.mxu0 %v11049_v48 }
 0x278   :  { %9870 = vmatpush3.msra.mxu1 %v11049_v48  ;;  %9838 = vmatprep.subr.mxu0 %v12468_v23 }
 0x279   :  { %9871 = vmatprep.subr.mxu1 %v12468_v23  ;;  %9839 = vmatpush3.msra.mxu0 %v11058_v53 }
 0x27a   :  { %9872 = vmatpush3.msra.mxu1 %v11058_v53  ;;  %9840 = vmatprep.subr.mxu0 %v12468_v23 }
 0x27b   :  { %9873 = vmatprep.subr.mxu1 %v12468_v23  ;;  %9841 = vmatpush3.msra.mxu0 %v11092_v56 }
 0x27c   :  { %9842 = vmatprep.mubr.msk.f32.mxu0 %vm10689_vm2, %v12468_v23  ;;  %9874 = vmatpush3.msra.mxu1 %v11092_v56 }
 0x27d   :  { %9875 = vmatprep.mubr.msk.f32.mxu1 %vm10689_vm2, %v12468_v23  ;;  %9843 = vmatmul.mubr.f32.vlgmr.msra.gmra.mxu0 %v2507_v39 }
 0x27e   :  { %9856 = vmatprep.subr.mxu0 %v12468_v23  ;;  %9876 = vmatmul.mubr.f32.vlgmr.msra.gmra.mxu1 %v11495_v50 }
 0x27f   :  { %9889 = vmatprep.subr.mxu1 %v12468_v23  ;;  %9857 = vmatpush3.msra.mxu0 %v11056_v52 }
 0x280   :  { %9890 = vmatpush3.msra.mxu1 %v11041_v45  ;;  %9858 = vmatprep.subr.mxu0 %v12468_v23 }
 0x281   :  { %9891 = vmatprep.subr.mxu1 %v12468_v23  ;;  %9859 = vmatpush3.msra.mxu0 %v11065_v3 }
 0x282   :  { %9892 = vmatpush3.msra.mxu1 %v11049_v48  ;;  %9860 = vmatprep.subr.mxu0 %v12468_v23 }
 0x283   :  { %9893 = vmatprep.subr.mxu1 %v12468_v23  ;;  %9861 = vmatpush3.msra.mxu0 %v11073_v55 }
 0x284   :  { %9894 = vmatpush3.msra.mxu1 %v11058_v53  ;;  %9862 = vmatprep.subr.mxu0 %v12468_v23 }
 0x285   :  { %9895 = vmatprep.subr.mxu1 %v12468_v23  ;;  %9863 = vmatpush3.msra.mxu0 %v11111_v15 }
 0x286   :  { %9864 = vmatprep.mubr.msk.f32.mxu0 %vm10689_vm2, %v12468_v23  ;;  %9896 = vmatpush3.msra.mxu1 %v11092_v56 }
 0x287   :  { %9897 = vmatprep.mubr.msk.f32.mxu1 %vm10689_vm2, %v12468_v23  ;;  %9865 = vmatmul.mubr.f32.vlgmr.msra.gmra.mxu0 %v11488_v38 }
 0x288   :  { %9878 = vmatprep.subr.mxu0 %v12468_v23  ;;  %9898 = vmatmul.mubr.f32.vlgmr.msra.gmra.mxu1 %v11484_v49 }
 0x289   :  { %9879 = vmatpush3.msra.mxu0 %v11070_v54  ;;  %9886 = vmatprep.mubr.msk.f32.mxu0 %vm10689_vm2, %v12468_v23 }
 0x28a   :  { %9880 = vmatprep.subr.mxu0 %v12468_v23  ;;  %9911 = vmatprep.subr.mxu1 %v12468_v23 }
 0x28b   :  { %9881 = vmatpush3.msra.mxu0 %v12469_v51  ;;  %9912 = vmatpush3.msra.mxu1 %v12470_v5 }
 0x28c   :  { %9882 = vmatprep.subr.mxu0 %v12468_v23  ;;  %9913 = vmatprep.subr.mxu1 %v12468_v23 }
 0x28d   :  { %9883 = vmatpush3.msra.mxu0 %v12471_v12  ;;  %9914 = vmatpush3.msra.mxu1 %v12472_v63 }
 0x28e   :  { %9884 = vmatprep.subr.mxu0 %v12468_v23  ;;  %9915 = vmatprep.subr.mxu1 %v12468_v23 }
 0x28f   :  { %9885 = vmatpush3.msra.mxu0 %v12473_v0  ;;  %9916 = vmatpush3.msra.mxu1 %v12474_v62 }
 0x290   :  { %9887 = vmatmul.mubr.f32.vlgmr.msra.gmra.mxu0 %v11484_v49  ;;  %9917 = vmatprep.subr.mxu1 %v12468_v23 }
 0x291   :  { %9918 = vmatpush3.msra.mxu1 %v12475_v34  ;;  %9900 = vmatprep.subr.mxu0 %v12468_v23 }
 0x292   :  { %9919 = vmatprep.mubr.msk.f32.mxu1 %vm10689_vm2, %v12468_v23  ;;  %9933 = vmatprep.subr.mxu1 %v12468_v23 }
 0x293   :  { %9901 = vmatpush3.msra.mxu0 %v11219_v2  ;;  %9908 = vmatprep.mubr.msk.f32.mxu0 %vm10689_vm2, %v12468_v23 }
 0x294   :  { %9902 = vmatprep.subr.mxu0 %v12468_v23 }
 0x295   :  { %9903 = vmatpush3.msra.mxu0 %v11227_v18 }
 0x296   :  { %9904 = vmatprep.subr.mxu0 %v12468_v23 }
 0x297   :  { %9905 = vmatpush3.msra.mxu0 %v11240_v22 }
 0x298   :  { %9906 = vmatprep.subr.mxu0 %v12468_v23 }
 0x299   :  { %9907 = vmatpush3.msra.mxu0 %v11255_v27 }
 0x29a   :  { %9922 = vmatprep.subr.mxu0 %v12468_v23 }
 0x318   :  { %v2600_v58 = vpop.f32.mrf.mxu1 }
 0x31a   :  { %v9789_v40 = vpop.f32.mrf.mxu1 }
 0x320   :  { %v2757_v6 = vpop.f32.mrf.mxu1 }
 0x321   :  { %v2509_v35 = vpop.f32.mrf.mxu0 }
 0x322   :  { %v9811_v29 = vpop.f32.mrf.mxu1  ;;  %v2510_v61 = vadd.f32 %v11475_v59, %v2509_v35 }
 0x323   :  { %v9778_v43 = vpop.f32.mrf.mxu0 }
 0x324   :  { %v2601_v42 = vadd.f32 %v2600_v58, %v2510_v61 }
 0x329   :  { %v2680_v19 = vpop.f32.mrf.mxu0 }
 0x32a   :  { %v2915_v41 = vpop.f32.mrf.mxu1  ;;  %v2681_v32 = vadd.f32 %v2680_v19, %v2601_v42 }
 0x32b   :  { %v9800_v31 = vpop.f32.mrf.mxu0 }
 0x32c   :  { %v9833_v28 = vpop.f32.mrf.mxu1  ;;  %v2758_v46 = vadd.f32 %v2757_v6, %v2681_v32 }
 0x333   :  { %v2840_v49 = vpop.f32.mrf.mxu0 }
 0x334   :  { %v2841_v38 = vadd.f32 %v2840_v49, %v2758_v46  ;;  %v3098_v50 = vpop.f32.mrf.mxu1 }
 0x335   :  { %v9822_v39 = vpop.f32.mrf.mxu0 }
 0x336   :  { %v2916_v40 = vadd.f32 %v2915_v41, %v2841_v38  ;;  %v9855_v35 = vpop.f32.mrf.mxu1 }
 0x338   :  { %v2926_v29 = vrot.slane %v2916_v40, %v11625_v10 }
 0x33a   :  { %2927 = vrot.lane.b32.xlu0 %v2926_v29, %s10691_s29 }
 0x33d   :  { %v3007_v58 = vpop.f32.mrf.mxu0 }
 0x33e   :  { %v3255_v43 = vpop.f32.mrf.mxu1  ;;  %v3099_v6 = vadd.f32 %v3098_v50, %v3007_v58 }
 0x33f   :  { %v9844_v61 = vpop.f32.mrf.mxu0 }
 0x340   :  { %v9877_v19 = vpop.f32.mrf.mxu1 }
 0x347   :  { %v3178_v31 = vpop.f32.mrf.mxu0 }
 0x348   :  { %v3413_v42 = vpop.f32.mrf.mxu1  ;;  %v3179_v13 = vadd.f32 %v3178_v31, %v3099_v6 }
 0x349   :  { %v9866_v28 = vpop.f32.mrf.mxu0 }
 0x34a   :  { %v9899_v4 = vpop.f32.mrf.mxu1  ;;  %v3256_v24 = vadd.f32 %v3255_v43, %v3179_v13 }
 0x350   :  { %v3338_v32 = vpop.f32.mrf.mxu0 }
 0x351   :  { %v3339_v36 = vadd.f32 %v3338_v32, %v3256_v24 }
 0x352   :  { %v9888_v41 = vpop.f32.mrf.mxu0 }
 0x353   :  { %v3414_v11 = vadd.f32 %v3413_v42, %v3339_v36 }
 0x355   :  { %v3417_v46 = vadd.f32 %v3414_v11, %v11316_v1 }
 0x357   :  { %10638 = vtanh.f32 %v3417_v46 }
 0x364   :  { %v10639_v49 = vpop.eup %10638 }
 0x365   :  { %v3420_v38 = vsel %vm45_vm0, %v10639_v49, 0 }
 0x366   :  { %v11631_v39 = vand.u32 4294901760, %v3420_v38 }
 0x368   :  { %9920 = vmatmul.mubr.f32.vlgmr.msra.gmra.mxu1 %v11631_v39  ;;  %v11635_v50 = vsub.f32 %v3420_v38, %v11631_v39 }
 0x369   :  { %9934 = vmatpush3.msra.mxu1 %v11219_v2  ;;  %9941 = vmatprep.mubr.msk.f32.mxu1 %vm10689_vm2, %v12468_v23 }
 0x36a   :  { %9935 = vmatprep.subr.mxu1 %v12468_v23  ;;  %v11642_v1 = vand.u32 4294901760, %v11635_v50 }
 0x36b   :  { %9936 = vmatpush3.msra.mxu1 %v11227_v18 }
 0x36c   :  { %9937 = vmatprep.subr.mxu1 %v12468_v23  ;;  %v3494_v40 = vsub.f32 %v11635_v50, %v11642_v1 }
 0x36d   :  { %9938 = vmatpush3.msra.mxu1 %v11240_v22 }
 0x36e   :  { %9939 = vmatprep.subr.mxu1 %v12468_v23  ;;  %v3495_v35 = vand.u32 4294901760, %v3494_v40 }
 0x36f   :  { %9940 = vmatpush3.msra.mxu1 %v11255_v27 }
 0x370   :  { %9942 = vmatmul.mubr.f32.vlgmr.msra.gmra.mxu1 %v11642_v1  ;;  %9955 = vmatprep.subr.mxu1 %v12468_v23 }
 0x371   :  { %9909 = vmatmul.mubr.f32.vlgmr.msra.gmra.mxu0 %v3495_v35  ;;  %9956 = vmatpush3.msra.mxu1 %v11219_v2 }
 0x372   :  { %9923 = vmatpush3.msra.mxu0 %v11225_v17  ;;  %9957 = vmatprep.subr.mxu1 %v12468_v23 }
 0x373   :  { %9924 = vmatprep.subr.mxu0 %v12468_v23  ;;  %9958 = vmatpush3.msra.mxu1 %v11227_v18 }
 0x374   :  { %9925 = vmatpush3.msra.mxu0 %v11238_v21  ;;  %9959 = vmatprep.subr.mxu1 %v12468_v23 }
 0x375   :  { %9926 = vmatprep.subr.mxu0 %v12468_v23  ;;  %9960 = vmatpush3.msra.mxu1 %v11240_v22 }
 0x376   :  { %9927 = vmatpush3.msra.mxu0 %v11253_v26  ;;  %9961 = vmatprep.subr.mxu1 %v12468_v23 }
 0x377   :  { %9928 = vmatprep.subr.mxu0 %v12468_v23  ;;  %9930 = vmatprep.mubr.msk.f32.mxu0 %vm10689_vm2, %v12468_v23 }
 0x378   :  { %9929 = vmatpush3.msra.mxu0 %v11267_v9  ;;  %9962 = vmatpush3.msra.mxu1 %v11255_v27 }
 0x379   :  { %9963 = vmatprep.mubr.msk.f32.mxu1 %vm10689_vm2, %v12468_v23  ;;  %9931 = vmatmul.mubr.f32.vlgmr.msra.gmra.mxu0 %v11635_v50 }
 0x37a   :  { %9944 = vmatprep.subr.mxu0 %v12468_v23  ;;  %9964 = vmatmul.mubr.f32.vlgmr.msra.gmra.mxu1 %v11631_v39 }
 0x37b   :  { %9977 = vmatprep.subr.mxu1 %v12468_v23  ;;  %9945 = vmatpush3.msra.mxu0 %v11235_v20 }
 0x37c   :  { %9978 = vmatpush3.msra.mxu1 %v11106_v57  ;;  %9946 = vmatprep.subr.mxu0 %v12468_v23 }
 0x37d   :  { %9979 = vmatprep.subr.mxu1 %v12468_v23  ;;  %9947 = vmatpush3.msra.mxu0 %v11250_v25 }
 0x37e   :  { %9980 = vmatpush3.msra.mxu1 %v11117_v60  ;;  %9948 = vmatprep.subr.mxu0 %v12468_v23 }
 0x37f   :  { %9981 = vmatprep.subr.mxu1 %v12468_v23  ;;  %9949 = vmatpush3.msra.mxu0 %v11264_v30 }
 0x380   :  { %9982 = vmatpush3.msra.mxu1 %v11124_v16  ;;  %9950 = vmatprep.subr.mxu0 %v12468_v23 }
 0x381   :  { %9983 = vmatprep.subr.mxu1 %v12468_v23  ;;  %9951 = vmatpush3.msra.mxu0 %v11277_v33 }
 0x382   :  { %9952 = vmatprep.mubr.msk.f32.mxu0 %vm10689_vm2, %v12468_v23  ;;  %9984 = vmatpush3.msra.mxu1 %v11150_v37 }
 0x383   :  { %9985 = vmatprep.mubr.msk.f32.mxu1 %vm10689_vm2, %v12468_v23  ;;  %9953 = vmatmul.mubr.f32.vlgmr.msra.gmra.mxu0 %v11631_v39 }
 0x384   :  { %9966 = vmatprep.subr.mxu0 %v12468_v23  ;;  %9986 = vmatmul.mubr.f32.vlgmr.msra.gmra.mxu1 %v11631_v39 }
 0x385   :  { %9999 = vmatprep.subr.mxu1 %v12468_v23  ;;  %9967 = vmatpush3.msra.mxu0 %v11041_v45 }
 0x386   :  { %10000 = vmatpush3.msra.mxu1 %v11041_v45  ;;  %9968 = vmatprep.subr.mxu0 %v12468_v23 }
 0x387   :  { %10001 = vmatprep.subr.mxu1 %v12468_v23  ;;  %9969 = vmatpush3.msra.mxu0 %v11049_v48 }
 0x388   :  { %10002 = vmatpush3.msra.mxu1 %v11049_v48  ;;  %9970 = vmatprep.subr.mxu0 %v12468_v23 }
 0x389   :  { %10003 = vmatprep.subr.mxu1 %v12468_v23  ;;  %9971 = vmatpush3.msra.mxu0 %v11058_v53 }
 0x38a   :  { %10004 = vmatpush3.msra.mxu1 %v11058_v53  ;;  %9972 = vmatprep.subr.mxu0 %v12468_v23 }
 0x38b   :  { %10005 = vmatprep.subr.mxu1 %v12468_v23  ;;  %9973 = vmatpush3.msra.mxu0 %v11092_v56 }
 0x38c   :  { %9974 = vmatprep.mubr.msk.f32.mxu0 %vm10689_vm2, %v12468_v23  ;;  %10006 = vmatpush3.msra.mxu1 %v11092_v56 }
 0x38d   :  { %10007 = vmatprep.mubr.msk.f32.mxu1 %vm10689_vm2, %v12468_v23  ;;  %9975 = vmatmul.mubr.f32.vlgmr.msra.gmra.mxu0 %v3495_v35 }
 0x38e   :  { %9988 = vmatprep.subr.mxu0 %v12468_v23  ;;  %10008 = vmatmul.mubr.f32.vlgmr.msra.gmra.mxu1 %v11642_v1 }
 0x38f   :  { %10021 = vmatprep.subr.mxu1 %v12468_v23  ;;  %9989 = vmatpush3.msra.mxu0 %v11056_v52 }
 0x390   :  { %10022 = vmatpush3.msra.mxu1 %v11041_v45  ;;  %9990 = vmatprep.subr.mxu0 %v12468_v23 }
 0x391   :  { %10023 = vmatprep.subr.mxu1 %v12468_v23  ;;  %9991 = vmatpush3.msra.mxu0 %v11065_v3 }
 0x392   :  { %10024 = vmatpush3.msra.mxu1 %v11049_v48  ;;  %9992 = vmatprep.subr.mxu0 %v12468_v23 }
 0x393   :  { %10025 = vmatprep.subr.mxu1 %v12468_v23  ;;  %9993 = vmatpush3.msra.mxu0 %v11073_v55 }
 0x394   :  { %10026 = vmatpush3.msra.mxu1 %v11058_v53  ;;  %9994 = vmatprep.subr.mxu0 %v12468_v23 }
 0x395   :  { %10027 = vmatprep.subr.mxu1 %v12468_v23  ;;  %9995 = vmatpush3.msra.mxu0 %v11111_v15 }
 0x396   :  { %9996 = vmatprep.mubr.msk.f32.mxu0 %vm10689_vm2, %v12468_v23  ;;  %10028 = vmatpush3.msra.mxu1 %v11092_v56 }
 0x397   :  { %10029 = vmatprep.mubr.msk.f32.mxu1 %vm10689_vm2, %v12468_v23  ;;  %9997 = vmatmul.mubr.f32.vlgmr.msra.gmra.mxu0 %v11635_v50 }
 0x398   :  { %10010 = vmatprep.subr.mxu0 %v12468_v23  ;;  %10030 = vmatmul.mubr.f32.vlgmr.msra.gmra.mxu1 %v11631_v39 }
 0x399   :  { %10011 = vmatpush3.msra.mxu0 %v11070_v54  ;;  %10018 = vmatprep.mubr.msk.f32.mxu0 %vm10689_vm2, %v12468_v23 }
 0x39a   :  { %10012 = vmatprep.subr.mxu0 %v12468_v23  ;;  %10043 = vmatprep.subr.mxu1 %v12468_v23 }
 0x39b   :  { %10013 = vmatpush3.msra.mxu0 %v12469_v51  ;;  %10044 = vmatpush3.msra.mxu1 %v12470_v5 }
 0x39c   :  { %10014 = vmatprep.subr.mxu0 %v12468_v23  ;;  %10045 = vmatprep.subr.mxu1 %v12468_v23 }
 0x39d   :  { %10015 = vmatpush3.msra.mxu0 %v12471_v12  ;;  %10046 = vmatpush3.msra.mxu1 %v12472_v63 }
 0x39e   :  { %10016 = vmatprep.subr.mxu0 %v12468_v23  ;;  %10047 = vmatprep.subr.mxu1 %v12468_v23 }
 0x39f   :  { %10017 = vmatpush3.msra.mxu0 %v12473_v0  ;;  %10048 = vmatpush3.msra.mxu1 %v12474_v62 }
 0x3a0   :  { %10019 = vmatmul.mubr.f32.vlgmr.msra.gmra.mxu0 %v11631_v39  ;;  %10049 = vmatprep.subr.mxu1 %v12468_v23 }
 0x3a1   :  { %10050 = vmatpush3.msra.mxu1 %v12475_v34  ;;  %10032 = vmatprep.subr.mxu0 %v12468_v23 }
 0x3a2   :  { %10051 = vmatprep.mubr.msk.f32.mxu1 %vm10689_vm2, %v12468_v23  ;;  %10065 = vmatprep.subr.mxu1 %v12468_v23 }
 0x3a3   :  { %10033 = vmatpush3.msra.mxu0 %v11219_v2  ;;  %10040 = vmatprep.mubr.msk.f32.mxu0 %vm10689_vm2, %v12468_v23 }
 0x3a4   :  { %10034 = vmatprep.subr.mxu0 %v12468_v23 }
 0x3a5   :  { %10035 = vmatpush3.msra.mxu0 %v11227_v18 }
 0x3a6   :  { %10036 = vmatprep.subr.mxu0 %v12468_v23 }
 0x3a7   :  { %10037 = vmatpush3.msra.mxu0 %v11240_v22 }
 0x3a8   :  { %10038 = vmatprep.subr.mxu0 %v12468_v23 }
 0x3a9   :  { %10039 = vmatpush3.msra.mxu0 %v11255_v27 }
 0x3aa   :  { %10054 = vmatprep.subr.mxu0 %v12468_v23 }
 0x3ac   :  { %v2928_v29 = vpop.permute.xlu0 %2927 }
 0x3ad   :  { %2931 = vst.msk [vmem:[%s12443_s8] sm:$0x3] %vm2930_vm4, %v2928_v29 }
 0x428   :  { %v3588_v58 = vpop.f32.mrf.mxu1 }
 0x42a   :  { %v9921_v43 = vpop.f32.mrf.mxu1 }
 0x430   :  { %v3745_v61 = vpop.f32.mrf.mxu1 }
 0x431   :  { %v3497_v19 = vpop.f32.mrf.mxu0 }
 0x432   :  { %v9943_v31 = vpop.f32.mrf.mxu1  ;;  %v3498_v6 = vadd.f32 %v11475_v59, %v3497_v19 }
 0x433   :  { %v9910_v42 = vpop.f32.mrf.mxu0 }
 0x434   :  { %v3589_v24 = vadd.f32 %v3588_v58, %v3498_v6 }
 0x439   :  { %v3668_v28 = vpop.f32.mrf.mxu0 }
 0x43a   :  { %v3903_v4 = vpop.f32.mrf.mxu1  ;;  %v3669_v36 = vadd.f32 %v3668_v28, %v3589_v24 }
 0x43b   :  { %v9932_v13 = vpop.f32.mrf.mxu0 }
 0x43c   :  { %v9965_v32 = vpop.f32.mrf.mxu1  ;;  %v3746_v41 = vadd.f32 %v3745_v61, %v3669_v36 }
 0x443   :  { %v3828_v11 = vpop.f32.mrf.mxu0 }
 0x444   :  { %v3829_v46 = vadd.f32 %v3828_v11, %v3746_v41  ;;  %v4086_v49 = vpop.f32.mrf.mxu1 }
 0x445   :  { %v9954_v38 = vpop.f32.mrf.mxu0 }
 0x446   :  { %v3904_v39 = vadd.f32 %v3903_v4, %v3829_v46  ;;  %v9987_v50 = vpop.f32.mrf.mxu1 }
 0x448   :  { %v3914_v1 = vrot.slane %v3904_v39, %v11625_v10 }
 0x44a   :  { %3915 = vrot.lane.b32.xlu1 %v3914_v1, %s10692_s17 }
 0x44d   :  { %v3995_v40 = vpop.f32.mrf.mxu0 }
 0x44e   :  { %v4243_v35 = vpop.f32.mrf.mxu1  ;;  %v4087_v31 = vadd.f32 %v4086_v49, %v3995_v40 }
 0x44f   :  { %v9976_v29 = vpop.f32.mrf.mxu0 }
 0x450   :  { %v10009_v43 = vpop.f32.mrf.mxu1 }
 0x457   :  { %v4166_v19 = vpop.f32.mrf.mxu0 }
 0x458   :  { %v4401_v58 = vpop.f32.mrf.mxu1  ;;  %v4167_v6 = vadd.f32 %v4166_v19, %v4087_v31 }
 0x459   :  { %v9998_v42 = vpop.f32.mrf.mxu0 }
 0x45a   :  { %v10031_v61 = vpop.f32.mrf.mxu1  ;;  %v4244_v28 = vadd.f32 %v4243_v35, %v4167_v6 }
 0x460   :  { %v4326_v13 = vpop.f32.mrf.mxu0 }
 0x461   :  { %v4327_v24 = vadd.f32 %v4326_v13, %v4244_v28 }
 0x462   :  { %v10020_v4 = vpop.f32.mrf.mxu0 }
 0x463   :  { %v4402_v32 = vadd.f32 %v4401_v58, %v4327_v24 }
 0x465   :  { %v4405_v36 = vadd.f32 %v4402_v32, %v11314_v8 }
 0x467   :  { %10640 = vtanh.f32 %v4405_v36 }
 0x474   :  { %v10641_v41 = vpop.eup %10640 }
 0x475   :  { %v4408_v11 = vsel %vm45_vm0, %v10641_v41, 0 }
 0x476   :  { %v11780_v46 = vand.u32 4294901760, %v4408_v11 }
 0x478   :  { %10052 = vmatmul.mubr.f32.vlgmr.msra.gmra.mxu1 %v11780_v46  ;;  %v11784_v49 = vsub.f32 %v4408_v11, %v11780_v46 }
 0x479   :  { %10066 = vmatpush3.msra.mxu1 %v11219_v2  ;;  %10073 = vmatprep.mubr.msk.f32.mxu1 %vm10689_vm2, %v12468_v23 }
 0x47a   :  { %10067 = vmatprep.subr.mxu1 %v12468_v23  ;;  %v11791_v8 = vand.u32 4294901760, %v11784_v49 }
 0x47b   :  { %10068 = vmatpush3.msra.mxu1 %v11227_v18 }
 0x47c   :  { %10069 = vmatprep.subr.mxu1 %v12468_v23  ;;  %v4482_v38 = vsub.f32 %v11784_v49, %v11791_v8 }
 0x47d   :  { %10070 = vmatpush3.msra.mxu1 %v11240_v22 }
 0x47e   :  { %10071 = vmatprep.subr.mxu1 %v12468_v23  ;;  %v4483_v39 = vand.u32 4294901760, %v4482_v38 }
 0x47f   :  { %10072 = vmatpush3.msra.mxu1 %v11255_v27 }
 0x480   :  { %10074 = vmatmul.mubr.f32.vlgmr.msra.gmra.mxu1 %v11791_v8  ;;  %10087 = vmatprep.subr.mxu1 %v12468_v23 }
 0x481   :  { %10041 = vmatmul.mubr.f32.vlgmr.msra.gmra.mxu0 %v4483_v39  ;;  %10088 = vmatpush3.msra.mxu1 %v11219_v2 }
 0x482   :  { %10055 = vmatpush3.msra.mxu0 %v11225_v17  ;;  %10089 = vmatprep.subr.mxu1 %v12468_v23 }
 0x483   :  { %10056 = vmatprep.subr.mxu0 %v12468_v23  ;;  %10090 = vmatpush3.msra.mxu1 %v11227_v18 }
 0x484   :  { %10057 = vmatpush3.msra.mxu0 %v11238_v21  ;;  %10091 = vmatprep.subr.mxu1 %v12468_v23 }
 0x485   :  { %10058 = vmatprep.subr.mxu0 %v12468_v23  ;;  %10092 = vmatpush3.msra.mxu1 %v11240_v22 }
 0x486   :  { %10059 = vmatpush3.msra.mxu0 %v11253_v26  ;;  %10093 = vmatprep.subr.mxu1 %v12468_v23 }
 0x487   :  { %10060 = vmatprep.subr.mxu0 %v12468_v23  ;;  %10062 = vmatprep.mubr.msk.f32.mxu0 %vm10689_vm2, %v12468_v23 }
 0x488   :  { %10061 = vmatpush3.msra.mxu0 %v11267_v9  ;;  %10094 = vmatpush3.msra.mxu1 %v11255_v27 }
 0x489   :  { %10095 = vmatprep.mubr.msk.f32.mxu1 %vm10689_vm2, %v12468_v23  ;;  %10063 = vmatmul.mubr.f32.vlgmr.msra.gmra.mxu0 %v11784_v49 }
 0x48a   :  { %10076 = vmatprep.subr.mxu0 %v12468_v23  ;;  %10096 = vmatmul.mubr.f32.vlgmr.msra.gmra.mxu1 %v11780_v46 }
 0x48b   :  { %10109 = vmatprep.subr.mxu1 %v12468_v23  ;;  %10077 = vmatpush3.msra.mxu0 %v11235_v20 }
 0x48c   :  { %10110 = vmatpush3.msra.mxu1 %v11106_v57  ;;  %10078 = vmatprep.subr.mxu0 %v12468_v23 }
 0x48d   :  { %10111 = vmatprep.subr.mxu1 %v12468_v23  ;;  %10079 = vmatpush3.msra.mxu0 %v11250_v25 }
 0x48e   :  { %10112 = vmatpush3.msra.mxu1 %v11117_v60  ;;  %10080 = vmatprep.subr.mxu0 %v12468_v23 }
 0x48f   :  { %10113 = vmatprep.subr.mxu1 %v12468_v23  ;;  %10081 = vmatpush3.msra.mxu0 %v11264_v30 }
 0x490   :  { %10114 = vmatpush3.msra.mxu1 %v11124_v16  ;;  %10082 = vmatprep.subr.mxu0 %v12468_v23 }
 0x491   :  { %10115 = vmatprep.subr.mxu1 %v12468_v23  ;;  %10083 = vmatpush3.msra.mxu0 %v11277_v33 }
 0x492   :  { %10084 = vmatprep.mubr.msk.f32.mxu0 %vm10689_vm2, %v12468_v23  ;;  %10116 = vmatpush3.msra.mxu1 %v11150_v37 }
 0x493   :  { %10117 = vmatprep.mubr.msk.f32.mxu1 %vm10689_vm2, %v12468_v23  ;;  %10085 = vmatmul.mubr.f32.vlgmr.msra.gmra.mxu0 %v11780_v46 }
 0x494   :  { %10098 = vmatprep.subr.mxu0 %v12468_v23  ;;  %10118 = vmatmul.mubr.f32.vlgmr.msra.gmra.mxu1 %v11780_v46 }
 0x495   :  { %10131 = vmatprep.subr.mxu1 %v12468_v23  ;;  %10099 = vmatpush3.msra.mxu0 %v11041_v45 }
 0x496   :  { %10132 = vmatpush3.msra.mxu1 %v11041_v45  ;;  %10100 = vmatprep.subr.mxu0 %v12468_v23 }
 0x497   :  { %10133 = vmatprep.subr.mxu1 %v12468_v23  ;;  %10101 = vmatpush3.msra.mxu0 %v11049_v48 }
 0x498   :  { %10134 = vmatpush3.msra.mxu1 %v11049_v48  ;;  %10102 = vmatprep.subr.mxu0 %v12468_v23 }
 0x499   :  { %10135 = vmatprep.subr.mxu1 %v12468_v23  ;;  %10103 = vmatpush3.msra.mxu0 %v11058_v53 }
 0x49a   :  { %10136 = vmatpush3.msra.mxu1 %v11058_v53  ;;  %10104 = vmatprep.subr.mxu0 %v12468_v23 }
 0x49b   :  { %10137 = vmatprep.subr.mxu1 %v12468_v23  ;;  %10105 = vmatpush3.msra.mxu0 %v11092_v56 }
 0x49c   :  { %10106 = vmatprep.mubr.msk.f32.mxu0 %vm10689_vm2, %v12468_v23  ;;  %10138 = vmatpush3.msra.mxu1 %v11092_v56 }
 0x49d   :  { %10139 = vmatprep.mubr.msk.f32.mxu1 %vm10689_vm2, %v12468_v23  ;;  %10107 = vmatmul.mubr.f32.vlgmr.msra.gmra.mxu0 %v4483_v39 }
 0x49e   :  { %10120 = vmatprep.subr.mxu0 %v12468_v23  ;;  %10140 = vmatmul.mubr.f32.vlgmr.msra.gmra.mxu1 %v11791_v8 }
 0x49f   :  { %10153 = vmatprep.subr.mxu1 %v12468_v23  ;;  %10121 = vmatpush3.msra.mxu0 %v11056_v52 }
 0x4a0   :  { %10154 = vmatpush3.msra.mxu1 %v11041_v45  ;;  %10122 = vmatprep.subr.mxu0 %v12468_v23 }
 0x4a1   :  { %10155 = vmatprep.subr.mxu1 %v12468_v23  ;;  %10123 = vmatpush3.msra.mxu0 %v11065_v3 }
 0x4a2   :  { %10156 = vmatpush3.msra.mxu1 %v11049_v48  ;;  %10124 = vmatprep.subr.mxu0 %v12468_v23 }
 0x4a3   :  { %10157 = vmatprep.subr.mxu1 %v12468_v23  ;;  %10125 = vmatpush3.msra.mxu0 %v11073_v55 }
 0x4a4   :  { %10158 = vmatpush3.msra.mxu1 %v11058_v53  ;;  %10126 = vmatprep.subr.mxu0 %v12468_v23 }
 0x4a5   :  { %10159 = vmatprep.subr.mxu1 %v12468_v23  ;;  %10127 = vmatpush3.msra.mxu0 %v11111_v15 }
 0x4a6   :  { %10128 = vmatprep.mubr.msk.f32.mxu0 %vm10689_vm2, %v12468_v23  ;;  %10160 = vmatpush3.msra.mxu1 %v11092_v56 }
 0x4a7   :  { %10161 = vmatprep.mubr.msk.f32.mxu1 %vm10689_vm2, %v12468_v23  ;;  %10129 = vmatmul.mubr.f32.vlgmr.msra.gmra.mxu0 %v11784_v49 }
 0x4a8   :  { %10142 = vmatprep.subr.mxu0 %v12468_v23  ;;  %10162 = vmatmul.mubr.f32.vlgmr.msra.gmra.mxu1 %v11780_v46 }
 0x4a9   :  { %10143 = vmatpush3.msra.mxu0 %v11070_v54  ;;  %10150 = vmatprep.mubr.msk.f32.mxu0 %vm10689_vm2, %v12468_v23 }
 0x4aa   :  { %10144 = vmatprep.subr.mxu0 %v12468_v23  ;;  %10175 = vmatprep.subr.mxu1 %v12468_v23 }
 0x4ab   :  { %10145 = vmatpush3.msra.mxu0 %v12469_v51  ;;  %10176 = vmatpush3.msra.mxu1 %v12470_v5 }
 0x4ac   :  { %10146 = vmatprep.subr.mxu0 %v12468_v23  ;;  %10177 = vmatprep.subr.mxu1 %v12468_v23 }
 0x4ad   :  { %10147 = vmatpush3.msra.mxu0 %v12471_v12  ;;  %10178 = vmatpush3.msra.mxu1 %v12472_v63 }
 0x4ae   :  { %10148 = vmatprep.subr.mxu0 %v12468_v23  ;;  %10179 = vmatprep.subr.mxu1 %v12468_v23 }
 0x4af   :  { %10149 = vmatpush3.msra.mxu0 %v12473_v0  ;;  %10180 = vmatpush3.msra.mxu1 %v12474_v62 }
 0x4b0   :  { %10151 = vmatmul.mubr.f32.vlgmr.msra.gmra.mxu0 %v11780_v46  ;;  %10181 = vmatprep.subr.mxu1 %v12468_v23 }
 0x4b1   :  { %10182 = vmatpush3.msra.mxu1 %v12475_v34  ;;  %10164 = vmatprep.subr.mxu0 %v12468_v23 }
 0x4b2   :  { %10183 = vmatprep.mubr.msk.f32.mxu1 %vm10689_vm2, %v12468_v23  ;;  %10197 = vmatprep.subr.mxu1 %v12468_v23 }
 0x4b3   :  { %10165 = vmatpush3.msra.mxu0 %v11219_v2  ;;  %10172 = vmatprep.mubr.msk.f32.mxu0 %vm10689_vm2, %v12468_v23 }
 0x4b4   :  { %10166 = vmatprep.subr.mxu0 %v12468_v23 }
 0x4b5   :  { %10167 = vmatpush3.msra.mxu0 %v11227_v18 }
 0x4b6   :  { %10168 = vmatprep.subr.mxu0 %v12468_v23 }
 0x4b7   :  { %10169 = vmatpush3.msra.mxu0 %v11240_v22 }
 0x4b8   :  { %10170 = vmatprep.subr.mxu0 %v12468_v23 }
 0x4b9   :  { %10171 = vmatpush3.msra.mxu0 %v11255_v27 }
 0x4ba   :  { %10186 = vmatprep.subr.mxu0 %v12468_v23 }
 0x4bc   :  { %v3916_v50 = vpop.permute.xlu1 %3915 }
 0x4bd   :  { %3919 = vst.msk [vmem:[%s12443_s8] sm:$0x3] %vm3918_vm5, %v3916_v50 }
 0x538   :  { %v4576_v1 = vpop.f32.mrf.mxu1 }
 0x53a   :  { %v10053_v40 = vpop.f32.mrf.mxu1 }
 0x540   :  { %v4733_v35 = vpop.f32.mrf.mxu1 }
 0x541   :  { %v4485_v29 = vpop.f32.mrf.mxu0 }
 0x542   :  { %v4486_v43 = vadd.f32 %v11475_v59, %v4485_v29  ;;  %v10075_v19 = vpop.f32.mrf.mxu1 }
 0x543   :  { %v10042_v58 = vpop.f32.mrf.mxu0 }
 0x544   :  { %v4577_v31 = vadd.f32 %v4576_v1, %v4486_v43 }
 0x549   :  { %v4656_v42 = vpop.f32.mrf.mxu0 }
 0x54a   :  { %v4657_v61 = vadd.f32 %v4656_v42, %v4577_v31  ;;  %v4891_v6 = vpop.f32.mrf.mxu1 }
 0x54b   :  { %v10064_v28 = vpop.f32.mrf.mxu0 }
 0x54c   :  { %v10097_v13 = vpop.f32.mrf.mxu1  ;;  %v4734_v24 = vadd.f32 %v4733_v35, %v4657_v61 }
 0x553   :  { %v4816_v4 = vpop.f32.mrf.mxu0 }
 0x554   :  { %v4817_v32 = vadd.f32 %v4816_v4, %v4734_v24  ;;  %v5074_v36 = vpop.f32.mrf.mxu1 }
 0x555   :  { %v10086_v41 = vpop.f32.mrf.mxu0 }
 0x556   :  { %v11925_v11 = vadd.f32 %v4891_v6, %v4817_v32  ;;  %v10119_v46 = vpop.f32.mrf.mxu1 }
 0x55d   :  { %v4983_v49 = vpop.f32.mrf.mxu0 }
 0x55e   :  { %v5231_v8 = vpop.f32.mrf.mxu1  ;;  %v5075_v1 = vadd.f32 %v5074_v36, %v4983_v49 }
 0x55f   :  { %v10108_v38 = vpop.f32.mrf.mxu0 }
 0x560   :  { %v10141_v59 = vpop.f32.mrf.mxu1 }
 0x561   :  { %v12072_v59 = vld [vmem:[%s12442_s7] ss:$0 sm:$0xff]  ;;  %s10693_s7 = smov 96  }
 0x567   :  { %v5154_v39 = vpop.f32.mrf.mxu0 }
 0x568   :  { %v5389_v50 = vpop.f32.mrf.mxu1  ;;  %v5155_v43 = vadd.f32 %v5154_v39, %v5075_v1 }
 0x569   :  { %v10130_v40 = vpop.f32.mrf.mxu0 }
 0x56a   :  { %v10163_v29 = vpop.f32.mrf.mxu1  ;;  %v5232_v19 = vadd.f32 %v5231_v8, %v5155_v43 }
 0x570   :  { %v5314_v58 = vpop.f32.mrf.mxu0 }
 0x571   :  { %v5315_v35 = vadd.f32 %v5314_v58, %v5232_v19 }
 0x572   :  { %v10152_v31 = vpop.f32.mrf.mxu0 }
 0x573   :  { %v5390_v42 = vadd.f32 %v5389_v50, %v5315_v35 }
 0x575   :  { %v5393_v61 = vadd.f32 %v5390_v42, %v11320_v14 }
 0x577   :  { %10642 = vtanh.f32 %v5393_v61 }
 0x584   :  { %v10643_v6 = vpop.eup %10642 }
 0x585   :  { %v5396_v28 = vsel %vm45_vm0, %v10643_v6, 0 }
 0x586   :  { %v11929_v13 = vand.u32 4294901760, %v5396_v28 }
 0x588   :  { %10184 = vmatmul.mubr.f32.vlgmr.msra.gmra.mxu1 %v11929_v13  ;;  %v11933_v24 = vsub.f32 %v5396_v28, %v11929_v13 }
 0x589   :  { %10198 = vmatpush3.msra.mxu1 %v11219_v2  ;;  %10205 = vmatprep.mubr.msk.f32.mxu1 %vm10689_vm2, %v12468_v23 }
 0x58a   :  { %10199 = vmatprep.subr.mxu1 %v12468_v23  ;;  %v11940_v14 = vand.u32 4294901760, %v11933_v24 }
 0x58b   :  { %10200 = vmatpush3.msra.mxu1 %v11227_v18 }
 0x58c   :  { %10201 = vmatprep.subr.mxu1 %v12468_v23  ;;  %v5470_v4 = vsub.f32 %v11933_v24, %v11940_v14 }
 0x58d   :  { %10202 = vmatpush3.msra.mxu1 %v11240_v22 }
 0x58e   :  { %10203 = vmatprep.subr.mxu1 %v12468_v23  ;;  %v5471_v32 = vand.u32 4294901760, %v5470_v4 }
 0x58f   :  { %10204 = vmatpush3.msra.mxu1 %v11255_v27 }
 0x590   :  { %10206 = vmatmul.mubr.f32.vlgmr.msra.gmra.mxu1 %v11940_v14  ;;  %10219 = vmatprep.subr.mxu1 %v12468_v23 }
 0x591   :  { %10173 = vmatmul.mubr.f32.vlgmr.msra.gmra.mxu0 %v5471_v32  ;;  %10220 = vmatpush3.msra.mxu1 %v11219_v2 }
 0x592   :  { %10187 = vmatpush3.msra.mxu0 %v11225_v17  ;;  %10221 = vmatprep.subr.mxu1 %v12468_v23 }
 0x593   :  { %10188 = vmatprep.subr.mxu0 %v12468_v23  ;;  %10222 = vmatpush3.msra.mxu1 %v11227_v18 }
 0x594   :  { %10189 = vmatpush3.msra.mxu0 %v11238_v21  ;;  %10223 = vmatprep.subr.mxu1 %v12468_v23 }
 0x595   :  { %10190 = vmatprep.subr.mxu0 %v12468_v23  ;;  %10224 = vmatpush3.msra.mxu1 %v11240_v22 }
 0x596   :  { %10191 = vmatpush3.msra.mxu0 %v11253_v26  ;;  %10225 = vmatprep.subr.mxu1 %v12468_v23 }
 0x597   :  { %10192 = vmatprep.subr.mxu0 %v12468_v23  ;;  %10194 = vmatprep.mubr.msk.f32.mxu0 %vm10689_vm2, %v12468_v23 }
 0x598   :  { %10193 = vmatpush3.msra.mxu0 %v11267_v9  ;;  %10226 = vmatpush3.msra.mxu1 %v11255_v27 }
 0x599   :  { %10227 = vmatprep.mubr.msk.f32.mxu1 %vm10689_vm2, %v12468_v23  ;;  %10195 = vmatmul.mubr.f32.vlgmr.msra.gmra.mxu0 %v11933_v24 }
 0x59a   :  { %10208 = vmatprep.subr.mxu0 %v12468_v23  ;;  %10228 = vmatmul.mubr.f32.vlgmr.msra.gmra.mxu1 %v11929_v13 }
 0x59b   :  { %10241 = vmatprep.subr.mxu1 %v12468_v23  ;;  %10209 = vmatpush3.msra.mxu0 %v11235_v20 }
 0x59c   :  { %10242 = vmatpush3.msra.mxu1 %v11106_v57  ;;  %10210 = vmatprep.subr.mxu0 %v12468_v23 }
 0x59d   :  { %10243 = vmatprep.subr.mxu1 %v12468_v23  ;;  %10211 = vmatpush3.msra.mxu0 %v11250_v25 }
 0x59e   :  { %10244 = vmatpush3.msra.mxu1 %v11117_v60  ;;  %10212 = vmatprep.subr.mxu0 %v12468_v23 }
 0x59f   :  { %10245 = vmatprep.subr.mxu1 %v12468_v23  ;;  %10213 = vmatpush3.msra.mxu0 %v11264_v30 }
 0x5a0   :  { %10246 = vmatpush3.msra.mxu1 %v11124_v16  ;;  %10214 = vmatprep.subr.mxu0 %v12468_v23 }
 0x5a1   :  { %10247 = vmatprep.subr.mxu1 %v12468_v23  ;;  %10215 = vmatpush3.msra.mxu0 %v11277_v33 }
 0x5a2   :  { %10216 = vmatprep.mubr.msk.f32.mxu0 %vm10689_vm2, %v12468_v23  ;;  %10248 = vmatpush3.msra.mxu1 %v11150_v37 }
 0x5a3   :  { %10249 = vmatprep.mubr.msk.f32.mxu1 %vm10689_vm2, %v12468_v23  ;;  %10217 = vmatmul.mubr.f32.vlgmr.msra.gmra.mxu0 %v11929_v13 }
 0x5a4   :  { %10230 = vmatprep.subr.mxu0 %v12468_v23  ;;  %10250 = vmatmul.mubr.f32.vlgmr.msra.gmra.mxu1 %v11929_v13 }
 0x5a5   :  { %10263 = vmatprep.subr.mxu1 %v12468_v23  ;;  %10231 = vmatpush3.msra.mxu0 %v11041_v45 }
 0x5a6   :  { %10264 = vmatpush3.msra.mxu1 %v11041_v45  ;;  %10232 = vmatprep.subr.mxu0 %v12468_v23 }
 0x5a7   :  { %10265 = vmatprep.subr.mxu1 %v12468_v23  ;;  %10233 = vmatpush3.msra.mxu0 %v11049_v48 }
 0x5a8   :  { %10266 = vmatpush3.msra.mxu1 %v11049_v48  ;;  %10234 = vmatprep.subr.mxu0 %v12468_v23 }
 0x5a9   :  { %10267 = vmatprep.subr.mxu1 %v12468_v23  ;;  %10235 = vmatpush3.msra.mxu0 %v11058_v53 }
 0x5aa   :  { %10268 = vmatpush3.msra.mxu1 %v11058_v53  ;;  %10236 = vmatprep.subr.mxu0 %v12468_v23 }
 0x5ab   :  { %10269 = vmatprep.subr.mxu1 %v12468_v23  ;;  %10237 = vmatpush3.msra.mxu0 %v11092_v56 }
 0x5ac   :  { %10238 = vmatprep.mubr.msk.f32.mxu0 %vm10689_vm2, %v12468_v23  ;;  %10270 = vmatpush3.msra.mxu1 %v11092_v56 }
 0x5ad   :  { %10271 = vmatprep.mubr.msk.f32.mxu1 %vm10689_vm2, %v12468_v23  ;;  %10239 = vmatmul.mubr.f32.vlgmr.msra.gmra.mxu0 %v5471_v32 }
 0x5ae   :  { %10252 = vmatprep.subr.mxu0 %v12468_v23  ;;  %10272 = vmatmul.mubr.f32.vlgmr.msra.gmra.mxu1 %v11940_v14 }
 0x5af   :  { %10285 = vmatprep.subr.mxu1 %v12468_v23  ;;  %10253 = vmatpush3.msra.mxu0 %v11056_v52 }
 0x5b0   :  { %10286 = vmatpush3.msra.mxu1 %v11041_v45  ;;  %10254 = vmatprep.subr.mxu0 %v12468_v23 }
 0x5b1   :  { %10287 = vmatprep.subr.mxu1 %v12468_v23  ;;  %10255 = vmatpush3.msra.mxu0 %v11065_v3 }
 0x5b2   :  { %10288 = vmatpush3.msra.mxu1 %v11049_v48  ;;  %10256 = vmatprep.subr.mxu0 %v12468_v23 }
 0x5b3   :  { %10289 = vmatprep.subr.mxu1 %v12468_v23  ;;  %10257 = vmatpush3.msra.mxu0 %v11073_v55 }
 0x5b4   :  { %10290 = vmatpush3.msra.mxu1 %v11058_v53  ;;  %10258 = vmatprep.subr.mxu0 %v12468_v23 }
 0x5b5   :  { %10291 = vmatprep.subr.mxu1 %v12468_v23  ;;  %10259 = vmatpush3.msra.mxu0 %v11111_v15 }
 0x5b6   :  { %10260 = vmatprep.mubr.msk.f32.mxu0 %vm10689_vm2, %v12468_v23  ;;  %10292 = vmatpush3.msra.mxu1 %v11092_v56 }
 0x5b7   :  { %10293 = vmatprep.mubr.msk.f32.mxu1 %vm10689_vm2, %v12468_v23  ;;  %10261 = vmatmul.mubr.f32.vlgmr.msra.gmra.mxu0 %v11933_v24 }
 0x5b8   :  { %10274 = vmatprep.subr.mxu0 %v12468_v23  ;;  %10294 = vmatmul.mubr.f32.vlgmr.msra.gmra.mxu1 %v11929_v13 }
 0x5b9   :  { %10275 = vmatpush3.msra.mxu0 %v11070_v54  ;;  %10282 = vmatprep.mubr.msk.f32.mxu0 %vm10689_vm2, %v12468_v23 }
 0x5ba   :  { %10276 = vmatprep.subr.mxu0 %v12468_v23  ;;  %10307 = vmatprep.subr.mxu1 %v12468_v23 }
 0x5bb   :  { %10277 = vmatpush3.msra.mxu0 %v12469_v51  ;;  %10308 = vmatpush3.msra.mxu1 %v12470_v5 }
 0x5bc   :  { %10278 = vmatprep.subr.mxu0 %v12468_v23  ;;  %10309 = vmatprep.subr.mxu1 %v12468_v23 }
 0x5bd   :  { %10279 = vmatpush3.msra.mxu0 %v12471_v12  ;;  %10310 = vmatpush3.msra.mxu1 %v12472_v63 }
 0x5be   :  { %10280 = vmatprep.subr.mxu0 %v12468_v23  ;;  %10311 = vmatprep.subr.mxu1 %v12468_v23 }
 0x5bf   :  { %10281 = vmatpush3.msra.mxu0 %v12473_v0  ;;  %10312 = vmatpush3.msra.mxu1 %v12474_v62 }
 0x5c0   :  { %10283 = vmatmul.mubr.f32.vlgmr.msra.gmra.mxu0 %v11929_v13  ;;  %10313 = vmatprep.subr.mxu1 %v12468_v23 }
 0x5c1   :  { %10314 = vmatpush3.msra.mxu1 %v12475_v34  ;;  %10296 = vmatprep.subr.mxu0 %v12468_v23 }
 0x5c2   :  { %10315 = vmatprep.mubr.msk.f32.mxu1 %vm10689_vm2, %v12468_v23  ;;  %10329 = vmatprep.subr.mxu1 %v12468_v23 }
 0x5c3   :  { %10297 = vmatpush3.msra.mxu0 %v11219_v2  ;;  %10304 = vmatprep.mubr.msk.f32.mxu0 %vm10689_vm2, %v12468_v23 }
 0x5c4   :  { %10298 = vmatprep.subr.mxu0 %v12468_v23 }
 0x5c5   :  { %10299 = vmatpush3.msra.mxu0 %v11227_v18 }
 0x5c6   :  { %10300 = vmatprep.subr.mxu0 %v12468_v23 }
 0x5c7   :  { %10301 = vmatpush3.msra.mxu0 %v11240_v22 }
 0x5c8   :  { %10302 = vmatprep.subr.mxu0 %v12468_v23 }
 0x5c9   :  { %10303 = vmatpush3.msra.mxu0 %v11255_v27 }
 0x5ca   :  { %10318 = vmatprep.subr.mxu0 %v12468_v23 }
 0x648   :  { %v5564_v36 = vpop.f32.mrf.mxu1 }
 0x64a   :  { %v10185_v41 = vpop.f32.mrf.mxu1 }
 0x650   :  { %v5721_v46 = vpop.f32.mrf.mxu1 }
 0x651   :  { %v5473_v49 = vpop.f32.mrf.mxu0 }
 0x652   :  { %v10207_v8 = vpop.f32.mrf.mxu1  ;;  %v5474_v39 = vadd.f32 %v12072_v59, %v5473_v49 }
 0x653   :  { %v10174_v38 = vpop.f32.mrf.mxu0 }
 0x654   :  { %v5565_v29 = vadd.f32 %v5564_v36, %v5474_v39 }
 0x659   :  { %v5644_v50 = vpop.f32.mrf.mxu0 }
 0x65a   :  { %v5879_v1 = vpop.f32.mrf.mxu1  ;;  %v5645_v19 = vadd.f32 %v5644_v50, %v5565_v29 }
 0x65b   :  { %v10196_v40 = vpop.f32.mrf.mxu0 }
 0x65c   :  { %v10229_v43 = vpop.f32.mrf.mxu1  ;;  %v5722_v58 = vadd.f32 %v5721_v46, %v5645_v19 }
 0x663   :  { %v5804_v35 = vpop.f32.mrf.mxu0 }
 0x664   :  { %v5805_v31 = vadd.f32 %v5804_v35, %v5722_v58  ;;  %v6050_v42 = vpop.f32.mrf.mxu1 }
 0x665   :  { %v10218_v61 = vpop.f32.mrf.mxu0 }
 0x666   :  { %v5880_v6 = vadd.f32 %v5879_v1, %v5805_v31  ;;  %v10251_v28 = vpop.f32.mrf.mxu1 }
 0x668   :  { %5883 = vst.msk [vmem:[%s12443_s8 + $0x2] sm:$0x3] %vm1942_vm3, %v5880_v6 }
 0x66d   :  { %v5959_v13 = vpop.f32.mrf.mxu0 }
 0x66e   :  { %v6207_v24 = vpop.f32.mrf.mxu1  ;;  %v6051_v41 = vadd.f32 %v6050_v42, %v5959_v13 }
 0x66f   :  { %v10240_v14 = vpop.f32.mrf.mxu0 }
 0x670   :  { %v10273_v4 = vpop.f32.mrf.mxu1 }
 0x677   :  { %v6130_v32 = vpop.f32.mrf.mxu0 }
 0x678   :  { %v6365_v36 = vpop.f32.mrf.mxu1  ;;  %v6131_v8 = vadd.f32 %v6130_v32, %v6051_v41 }
 0x679   :  { %v10262_v49 = vpop.f32.mrf.mxu0 }
 0x67a   :  { %v10295_v46 = vpop.f32.mrf.mxu1  ;;  %v6208_v38 = vadd.f32 %v6207_v24, %v6131_v8 }
 0x680   :  { %v6290_v39 = vpop.f32.mrf.mxu0 }
 0x681   :  { %v6291_v50 = vadd.f32 %v6290_v39, %v6208_v38 }
 0x682   :  { %v10284_v1 = vpop.f32.mrf.mxu0 }
 0x683   :  { %v6366_v40 = vadd.f32 %v6365_v36, %v6291_v50 }
 0x685   :  { %v6369_v29 = vadd.f32 %v6366_v40, %v11318_v44 }
 0x687   :  { %10644 = vtanh.f32 %v6369_v29 }
 0x694   :  { %v10645_v43 = vpop.eup %10644 }
 0x695   :  { %v6372_v19 = vsel %vm45_vm0, %v10645_v43, 0 }
 0x696   :  { %v12081_v58 = vand.u32 4294901760, %v6372_v19 }
 0x698   :  { %10316 = vmatmul.mubr.f32.vlgmr.msra.gmra.mxu1 %v12081_v58  ;;  %v12085_v35 = vsub.f32 %v6372_v19, %v12081_v58 }
 0x699   :  { %10330 = vmatpush3.msra.mxu1 %v11219_v2  ;;  %10337 = vmatprep.mubr.msk.f32.mxu1 %vm10689_vm2, %v12468_v23 }
 0x69a   :  { %10331 = vmatprep.subr.mxu1 %v12468_v23  ;;  %v12092_v44 = vand.u32 4294901760, %v12085_v35 }
 0x69b   :  { %10332 = vmatpush3.msra.mxu1 %v11227_v18 }
 0x69c   :  { %10333 = vmatprep.subr.mxu1 %v12468_v23  ;;  %v6446_v31 = vsub.f32 %v12085_v35, %v12092_v44 }
 0x69d   :  { %10334 = vmatpush3.msra.mxu1 %v11240_v22 }
 0x69e   :  { %10335 = vmatprep.subr.mxu1 %v12468_v23  ;;  %v6447_v42 = vand.u32 4294901760, %v6446_v31 }
 0x69f   :  { %10336 = vmatpush3.msra.mxu1 %v11255_v27 }
 0x6a0   :  { %10338 = vmatmul.mubr.f32.vlgmr.msra.gmra.mxu1 %v12092_v44  ;;  %10351 = vmatprep.subr.mxu1 %v12468_v23 }
 0x6a1   :  { %10305 = vmatmul.mubr.f32.vlgmr.msra.gmra.mxu0 %v6447_v42  ;;  %10352 = vmatpush3.msra.mxu1 %v11219_v2 }
 0x6a2   :  { %10319 = vmatpush3.msra.mxu0 %v11225_v17  ;;  %10353 = vmatprep.subr.mxu1 %v12468_v23 }
 0x6a3   :  { %10320 = vmatprep.subr.mxu0 %v12468_v23  ;;  %10354 = vmatpush3.msra.mxu1 %v11227_v18 }
 0x6a4   :  { %10321 = vmatpush3.msra.mxu0 %v11238_v21  ;;  %10355 = vmatprep.subr.mxu1 %v12468_v23 }
 0x6a5   :  { %10322 = vmatprep.subr.mxu0 %v12468_v23  ;;  %10356 = vmatpush3.msra.mxu1 %v11240_v22 }
 0x6a6   :  { %10323 = vmatpush3.msra.mxu0 %v11253_v26  ;;  %10357 = vmatprep.subr.mxu1 %v12468_v23 }
 0x6a7   :  { %10324 = vmatprep.subr.mxu0 %v12468_v23  ;;  %10326 = vmatprep.mubr.msk.f32.mxu0 %vm10689_vm2, %v12468_v23 }
 0x6a8   :  { %10325 = vmatpush3.msra.mxu0 %v11267_v9  ;;  %10358 = vmatpush3.msra.mxu1 %v11255_v27 }
 0x6a9   :  { %10359 = vmatprep.mubr.msk.f32.mxu1 %vm10689_vm2, %v12468_v23  ;;  %10327 = vmatmul.mubr.f32.vlgmr.msra.gmra.mxu0 %v12085_v35 }
 0x6aa   :  { %10340 = vmatprep.subr.mxu0 %v12468_v23  ;;  %10360 = vmatmul.mubr.f32.vlgmr.msra.gmra.mxu1 %v12081_v58 }
 0x6ab   :  { %10373 = vmatprep.subr.mxu1 %v12468_v23  ;;  %10341 = vmatpush3.msra.mxu0 %v11235_v20 }
 0x6ac   :  { %10374 = vmatpush3.msra.mxu1 %v11106_v57  ;;  %10342 = vmatprep.subr.mxu0 %v12468_v23 }
 0x6ad   :  { %10375 = vmatprep.subr.mxu1 %v12468_v23  ;;  %10343 = vmatpush3.msra.mxu0 %v11250_v25 }
 0x6ae   :  { %10376 = vmatpush3.msra.mxu1 %v11117_v60  ;;  %10344 = vmatprep.subr.mxu0 %v12468_v23 }
 0x6af   :  { %10377 = vmatprep.subr.mxu1 %v12468_v23  ;;  %10345 = vmatpush3.msra.mxu0 %v11264_v30 }
 0x6b0   :  { %10378 = vmatpush3.msra.mxu1 %v11124_v16  ;;  %10346 = vmatprep.subr.mxu0 %v12468_v23 }
 0x6b1   :  { %10379 = vmatprep.subr.mxu1 %v12468_v23  ;;  %10347 = vmatpush3.msra.mxu0 %v11277_v33 }
 0x6b2   :  { %10348 = vmatprep.mubr.msk.f32.mxu0 %vm10689_vm2, %v12468_v23  ;;  %10380 = vmatpush3.msra.mxu1 %v11150_v37 }
 0x6b3   :  { %10381 = vmatprep.mubr.msk.f32.mxu1 %vm10689_vm2, %v12468_v23  ;;  %10349 = vmatmul.mubr.f32.vlgmr.msra.gmra.mxu0 %v12081_v58 }
 0x6b4   :  { %10362 = vmatprep.subr.mxu0 %v12468_v23  ;;  %10382 = vmatmul.mubr.f32.vlgmr.msra.gmra.mxu1 %v12081_v58 }
 0x6b5   :  { %10395 = vmatprep.subr.mxu1 %v12468_v23  ;;  %10363 = vmatpush3.msra.mxu0 %v11041_v45 }
 0x6b6   :  { %10396 = vmatpush3.msra.mxu1 %v11041_v45  ;;  %10364 = vmatprep.subr.mxu0 %v12468_v23 }
 0x6b7   :  { %10397 = vmatprep.subr.mxu1 %v12468_v23  ;;  %10365 = vmatpush3.msra.mxu0 %v11049_v48 }
 0x6b8   :  { %10398 = vmatpush3.msra.mxu1 %v11049_v48  ;;  %10366 = vmatprep.subr.mxu0 %v12468_v23 }
 0x6b9   :  { %10399 = vmatprep.subr.mxu1 %v12468_v23  ;;  %10367 = vmatpush3.msra.mxu0 %v11058_v53 }
 0x6ba   :  { %10400 = vmatpush3.msra.mxu1 %v11058_v53  ;;  %10368 = vmatprep.subr.mxu0 %v12468_v23 }
 0x6bb   :  { %10401 = vmatprep.subr.mxu1 %v12468_v23  ;;  %10369 = vmatpush3.msra.mxu0 %v11092_v56 }
 0x6bc   :  { %10370 = vmatprep.mubr.msk.f32.mxu0 %vm10689_vm2, %v12468_v23  ;;  %10402 = vmatpush3.msra.mxu1 %v11092_v56 }
 0x6bd   :  { %10403 = vmatprep.mubr.msk.f32.mxu1 %vm10689_vm2, %v12468_v23  ;;  %10371 = vmatmul.mubr.f32.vlgmr.msra.gmra.mxu0 %v6447_v42 }
 0x6be   :  { %10384 = vmatprep.subr.mxu0 %v12468_v23  ;;  %10404 = vmatmul.mubr.f32.vlgmr.msra.gmra.mxu1 %v12092_v44 }
 0x6bf   :  { %10417 = vmatprep.subr.mxu1 %v12468_v23  ;;  %10385 = vmatpush3.msra.mxu0 %v11056_v52 }
 0x6c0   :  { %10418 = vmatpush3.msra.mxu1 %v11041_v45  ;;  %10386 = vmatprep.subr.mxu0 %v12468_v23 }
 0x6c1   :  { %10419 = vmatprep.subr.mxu1 %v12468_v23  ;;  %10387 = vmatpush3.msra.mxu0 %v11065_v3 }
 0x6c2   :  { %10420 = vmatpush3.msra.mxu1 %v11049_v48  ;;  %10388 = vmatprep.subr.mxu0 %v12468_v23 }
 0x6c3   :  { %10421 = vmatprep.subr.mxu1 %v12468_v23  ;;  %10389 = vmatpush3.msra.mxu0 %v11073_v55 }
 0x6c4   :  { %10422 = vmatpush3.msra.mxu1 %v11058_v53  ;;  %10390 = vmatprep.subr.mxu0 %v12468_v23 }
 0x6c5   :  { %10423 = vmatprep.subr.mxu1 %v12468_v23  ;;  %10391 = vmatpush3.msra.mxu0 %v11111_v15 }
 0x6c6   :  { %10392 = vmatprep.mubr.msk.f32.mxu0 %vm10689_vm2, %v12468_v23  ;;  %10424 = vmatpush3.msra.mxu1 %v11092_v56 }
 0x6c7   :  { %10425 = vmatprep.mubr.msk.f32.mxu1 %vm10689_vm2, %v12468_v23  ;;  %10393 = vmatmul.mubr.f32.vlgmr.msra.gmra.mxu0 %v12085_v35 }
 0x6c8   :  { %10406 = vmatprep.subr.mxu0 %v12468_v23  ;;  %10426 = vmatmul.mubr.f32.vlgmr.msra.gmra.mxu1 %v12081_v58 }
 0x6c9   :  { %10407 = vmatpush3.msra.mxu0 %v11070_v54  ;;  %10414 = vmatprep.mubr.msk.f32.mxu0 %vm10689_vm2, %v12468_v23 }
 0x6ca   :  { %10408 = vmatprep.subr.mxu0 %v12468_v23  ;;  %10439 = vmatprep.subr.mxu1 %v12468_v23 }
 0x6cb   :  { %10409 = vmatpush3.msra.mxu0 %v12469_v51  ;;  %10440 = vmatpush3.msra.mxu1 %v12470_v5 }
 0x6cc   :  { %10410 = vmatprep.subr.mxu0 %v12468_v23  ;;  %10441 = vmatprep.subr.mxu1 %v12468_v23 }
 0x6cd   :  { %10411 = vmatpush3.msra.mxu0 %v12471_v12  ;;  %10442 = vmatpush3.msra.mxu1 %v12472_v63 }
 0x6ce   :  { %10412 = vmatprep.subr.mxu0 %v12468_v23  ;;  %10443 = vmatprep.subr.mxu1 %v12468_v23 }
 0x6cf   :  { %10413 = vmatpush3.msra.mxu0 %v12473_v0  ;;  %10444 = vmatpush3.msra.mxu1 %v12474_v62 }
 0x6d0   :  { %10415 = vmatmul.mubr.f32.vlgmr.msra.gmra.mxu0 %v12081_v58  ;;  %10445 = vmatprep.subr.mxu1 %v12468_v23  ;;  %v4902_v58 = vrot.slane %v11925_v11, %v11625_v10 }
 0x6d1   :  { %10446 = vmatpush3.msra.mxu1 %v12475_v34  ;;  %10428 = vmatprep.subr.mxu0 %v12468_v23 }
 0x6d2   :  { %10447 = vmatprep.mubr.msk.f32.mxu1 %vm10689_vm2, %v12468_v23  ;;  %10461 = vmatprep.subr.mxu1 %v12468_v23 }
 0x6d3   :  { %10429 = vmatpush3.msra.mxu0 %v11219_v2  ;;  %10436 = vmatprep.mubr.msk.f32.mxu0 %vm10689_vm2, %v12468_v23 }
 0x6d4   :  { %10430 = vmatprep.subr.mxu0 %v12468_v23 }
 0x6d5   :  { %10431 = vmatpush3.msra.mxu0 %v11227_v18 }
 0x6d6   :  { %10432 = vmatprep.subr.mxu0 %v12468_v23 }
 0x6d7   :  { %10433 = vmatpush3.msra.mxu0 %v11240_v22 }
 0x6d8   :  { %10434 = vmatprep.subr.mxu0 %v12468_v23 }
 0x6d9   :  { %10435 = vmatpush3.msra.mxu0 %v11255_v27 }
 0x6da   :  { %10450 = vmatprep.subr.mxu0 %v12468_v23 }
 0x758   :  { %v6540_v61 = vpop.f32.mrf.mxu1 }
 0x75a   :  { %v10317_v6 = vpop.f32.mrf.mxu1 }
 0x760   :  { %v6697_v28 = vpop.f32.mrf.mxu1 }
 0x761   :  { %v6449_v13 = vpop.f32.mrf.mxu0 }
 0x762   :  { %v10339_v24 = vpop.f32.mrf.mxu1  ;;  %v6450_v4 = vadd.f32 %v12072_v59, %v6449_v13 }
 0x763   :  { %v10306_v14 = vpop.f32.mrf.mxu0 }
 0x764   :  { %v6541_v49 = vadd.f32 %v6540_v61, %v6450_v4 }
 0x769   :  { %v6620_v32 = vpop.f32.mrf.mxu0 }
 0x76a   :  { %v6855_v36 = vpop.f32.mrf.mxu1  ;;  %v6621_v8 = vadd.f32 %v6620_v32, %v6541_v49 }
 0x76b   :  { %v10328_v41 = vpop.f32.mrf.mxu0 }
 0x76c   :  { %v10361_v46 = vpop.f32.mrf.mxu1  ;;  %v6698_v38 = vadd.f32 %v6697_v28, %v6621_v8 }
 0x773   :  { %v6780_v39 = vpop.f32.mrf.mxu0 }
 0x774   :  { %v6781_v50 = vadd.f32 %v6780_v39, %v6698_v38  ;;  %v7037_v1 = vpop.f32.mrf.mxu1 }
 0x775   :  { %v10350_v40 = vpop.f32.mrf.mxu0 }
 0x776   :  { %v6856_v29 = vadd.f32 %v6855_v36, %v6781_v50  ;;  %v10383_v43 = vpop.f32.mrf.mxu1 }
 0x778   :  { %v6866_v19 = vrot.slane %v6856_v29, %v11625_v10 }
 0x77a   :  { %6867 = vrot.lane.b32.xlu0 %v6866_v19, %s10691_s29 }
 0x77d   :  { %v6946_v35 = vpop.f32.mrf.mxu0 }
 0x77e   :  { %v7194_v44 = vpop.f32.mrf.mxu1  ;;  %4903 = vrot.lane.b32.xlu0 %v4902_v58, %s10693_s7  ;;  %v7038_v28 = vadd.f32 %v7037_v1, %v6946_v35 }
 0x77f   :  { %v10372_v31 = vpop.f32.mrf.mxu0 }
 0x780   :  { %v10405_v42 = vpop.f32.mrf.mxu1 }
 0x787   :  { %v7117_v61 = vpop.f32.mrf.mxu0 }
 0x788   :  { %v7352_v6 = vpop.f32.mrf.mxu1  ;;  %v7118_v14 = vadd.f32 %v7117_v61, %v7038_v28 }
 0x789   :  { %v10394_v13 = vpop.f32.mrf.mxu0 }
 0x78a   :  { %v10427_v24 = vpop.f32.mrf.mxu1  ;;  %v7195_v4 = vadd.f32 %v7194_v44, %v7118_v14 }
 0x790   :  { %v7277_v32 = vpop.f32.mrf.mxu0 }
 0x791   :  { %v7278_v36 = vadd.f32 %v7277_v32, %v7195_v4 }
 0x792   :  { %v10416_v41 = vpop.f32.mrf.mxu0 }
 0x793   :  { %v7353_v49 = vadd.f32 %v7352_v6, %v7278_v36 }
 0x795   :  { %v7356_v11 = vadd.f32 %v7353_v49, %v11324_v47 }
 0x797   :  { %10646 = vtanh.f32 %v7356_v11 }
 0x7a4   :  { %v10647_v46 = vpop.eup %10646 }
 0x7a5   :  { %v7359_v8 = vsel %vm45_vm0, %v10647_v46, 0 }
 0x7a6   :  { %v12229_v38 = vand.u32 4294901760, %v7359_v8 }
 0x7a8   :  { %10448 = vmatmul.mubr.f32.vlgmr.msra.gmra.mxu1 %v12229_v38  ;;  %v12233_v39 = vsub.f32 %v7359_v8, %v12229_v38 }
 0x7a9   :  { %10462 = vmatpush3.msra.mxu1 %v11219_v2  ;;  %10469 = vmatprep.mubr.msk.f32.mxu1 %vm10689_vm2, %v12468_v23 }
 0x7aa   :  { %10463 = vmatprep.subr.mxu1 %v12468_v23  ;;  %v12240_v47 = vand.u32 4294901760, %v12233_v39 }
 0x7ab   :  { %10464 = vmatpush3.msra.mxu1 %v11227_v18 }
 0x7ac   :  { %10465 = vmatprep.subr.mxu1 %v12468_v23  ;;  %v7433_v50 = vsub.f32 %v12233_v39, %v12240_v47 }
 0x7ad   :  { %10466 = vmatpush3.msra.mxu1 %v11240_v22 }
 0x7ae   :  { %10467 = vmatprep.subr.mxu1 %v12468_v23  ;;  %v7434_v1 = vand.u32 4294901760, %v7433_v50 }
 0x7af   :  { %10468 = vmatpush3.msra.mxu1 %v11255_v27 }
 0x7b0   :  { %10470 = vmatmul.mubr.f32.vlgmr.msra.gmra.mxu1 %v12240_v47  ;;  %10483 = vmatprep.subr.mxu1 %v12468_v23 }
 0x7b1   :  { %10437 = vmatmul.mubr.f32.vlgmr.msra.gmra.mxu0 %v7434_v1  ;;  %10484 = vmatpush3.msra.mxu1 %v11219_v2 }
 0x7b2   :  { %10451 = vmatpush3.msra.mxu0 %v11225_v17  ;;  %10485 = vmatprep.subr.mxu1 %v12468_v23 }
 0x7b3   :  { %10452 = vmatprep.subr.mxu0 %v12468_v23  ;;  %10486 = vmatpush3.msra.mxu1 %v11227_v18 }
 0x7b4   :  { %10453 = vmatpush3.msra.mxu0 %v11238_v21  ;;  %10487 = vmatprep.subr.mxu1 %v12468_v23 }
 0x7b5   :  { %10454 = vmatprep.subr.mxu0 %v12468_v23  ;;  %10488 = vmatpush3.msra.mxu1 %v11240_v22 }
 0x7b6   :  { %10455 = vmatpush3.msra.mxu0 %v11253_v26  ;;  %10489 = vmatprep.subr.mxu1 %v12468_v23 }
 0x7b7   :  { %10456 = vmatprep.subr.mxu0 %v12468_v23  ;;  %10458 = vmatprep.mubr.msk.f32.mxu0 %vm10689_vm2, %v12468_v23 }
 0x7b8   :  { %10457 = vmatpush3.msra.mxu0 %v11267_v9  ;;  %10490 = vmatpush3.msra.mxu1 %v11255_v27 }
 0x7b9   :  { %10491 = vmatprep.mubr.msk.f32.mxu1 %vm10689_vm2, %v12468_v23  ;;  %10459 = vmatmul.mubr.f32.vlgmr.msra.gmra.mxu0 %v12233_v39 }
 0x7ba   :  { %10472 = vmatprep.subr.mxu0 %v12468_v23  ;;  %10492 = vmatmul.mubr.f32.vlgmr.msra.gmra.mxu1 %v12229_v38 }
 0x7bb   :  { %10505 = vmatprep.subr.mxu1 %v12468_v23  ;;  %10473 = vmatpush3.msra.mxu0 %v11235_v20 }
 0x7bc   :  { %10506 = vmatpush3.msra.mxu1 %v11106_v57  ;;  %10474 = vmatprep.subr.mxu0 %v12468_v23 }
 0x7bd   :  { %10507 = vmatprep.subr.mxu1 %v12468_v23  ;;  %10475 = vmatpush3.msra.mxu0 %v11250_v25 }
 0x7be   :  { %10508 = vmatpush3.msra.mxu1 %v11117_v60  ;;  %10476 = vmatprep.subr.mxu0 %v12468_v23 }
 0x7bf   :  { %10509 = vmatprep.subr.mxu1 %v12468_v23  ;;  %10477 = vmatpush3.msra.mxu0 %v11264_v30 }
 0x7c0   :  { %10510 = vmatpush3.msra.mxu1 %v11124_v16  ;;  %10478 = vmatprep.subr.mxu0 %v12468_v23 }
 0x7c1   :  { %10511 = vmatprep.subr.mxu1 %v12468_v23  ;;  %10479 = vmatpush3.msra.mxu0 %v11277_v33 }
 0x7c2   :  { %10480 = vmatprep.mubr.msk.f32.mxu0 %vm10689_vm2, %v12468_v23  ;;  %10512 = vmatpush3.msra.mxu1 %v11150_v37 }
 0x7c3   :  { %10513 = vmatprep.mubr.msk.f32.mxu1 %vm10689_vm2, %v12468_v23  ;;  %10481 = vmatmul.mubr.f32.vlgmr.msra.gmra.mxu0 %v12229_v38 }
 0x7c4   :  { %10494 = vmatprep.subr.mxu0 %v12468_v23  ;;  %10514 = vmatmul.mubr.f32.vlgmr.msra.gmra.mxu1 %v12229_v38 }
 0x7c5   :  { %10527 = vmatprep.subr.mxu1 %v12468_v23  ;;  %10495 = vmatpush3.msra.mxu0 %v11041_v45 }
 0x7c6   :  { %10528 = vmatpush3.msra.mxu1 %v11041_v45  ;;  %10496 = vmatprep.subr.mxu0 %v12468_v23 }
 0x7c7   :  { %10529 = vmatprep.subr.mxu1 %v12468_v23  ;;  %10497 = vmatpush3.msra.mxu0 %v11049_v48 }
 0x7c8   :  { %10530 = vmatpush3.msra.mxu1 %v11049_v48  ;;  %10498 = vmatprep.subr.mxu0 %v12468_v23 }
 0x7c9   :  { %10531 = vmatprep.subr.mxu1 %v12468_v23  ;;  %10499 = vmatpush3.msra.mxu0 %v11058_v53 }
 0x7ca   :  { %10532 = vmatpush3.msra.mxu1 %v11058_v53  ;;  %10500 = vmatprep.subr.mxu0 %v12468_v23 }
 0x7cb   :  { %10533 = vmatprep.subr.mxu1 %v12468_v23  ;;  %10501 = vmatpush3.msra.mxu0 %v11092_v56 }
 0x7cc   :  { %10502 = vmatprep.mubr.msk.f32.mxu0 %vm10689_vm2, %v12468_v23  ;;  %10534 = vmatpush3.msra.mxu1 %v11092_v56 }
 0x7cd   :  { %10535 = vmatprep.mubr.msk.f32.mxu1 %vm10689_vm2, %v12468_v23  ;;  %10503 = vmatmul.mubr.f32.vlgmr.msra.gmra.mxu0 %v7434_v1 }
 0x7ce   :  { %10516 = vmatprep.subr.mxu0 %v12468_v23  ;;  %10536 = vmatmul.mubr.f32.vlgmr.msra.gmra.mxu1 %v12240_v47 }
 0x7cf   :  { %10549 = vmatprep.subr.mxu1 %v12468_v23  ;;  %10517 = vmatpush3.msra.mxu0 %v11056_v52 }
 0x7d0   :  { %10550 = vmatpush3.msra.mxu1 %v11041_v45  ;;  %10518 = vmatprep.subr.mxu0 %v12468_v23 }
 0x7d1   :  { %10551 = vmatprep.subr.mxu1 %v12468_v23  ;;  %10519 = vmatpush3.msra.mxu0 %v11065_v3 }
 0x7d2   :  { %10552 = vmatpush3.msra.mxu1 %v11049_v48  ;;  %10520 = vmatprep.subr.mxu0 %v12468_v23 }
 0x7d3   :  { %10553 = vmatprep.subr.mxu1 %v12468_v23  ;;  %10521 = vmatpush3.msra.mxu0 %v11073_v55 }
 0x7d4   :  { %10554 = vmatpush3.msra.mxu1 %v11058_v53  ;;  %10522 = vmatprep.subr.mxu0 %v12468_v23 }
 0x7d5   :  { %10555 = vmatprep.subr.mxu1 %v12468_v23  ;;  %10523 = vmatpush3.msra.mxu0 %v11111_v15 }
 0x7d6   :  { %10524 = vmatprep.mubr.msk.f32.mxu0 %vm10689_vm2, %v12468_v23  ;;  %10556 = vmatpush3.msra.mxu1 %v11092_v56 }
 0x7d7   :  { %10557 = vmatprep.mubr.msk.f32.mxu1 %vm10689_vm2, %v12468_v23  ;;  %10525 = vmatmul.mubr.f32.vlgmr.msra.gmra.mxu0 %v12233_v39 }
 0x7d8   :  { %10538 = vmatprep.subr.mxu0 %v12468_v23  ;;  %10558 = vmatmul.mubr.f32.vlgmr.msra.gmra.mxu1 %v12229_v38 }
 0x7d9   :  { %10539 = vmatpush3.msra.mxu0 %v11070_v54  ;;  %10546 = vmatprep.mubr.msk.f32.mxu0 %vm10689_vm2, %v12468_v23 }
 0x7da   :  { %10540 = vmatprep.subr.mxu0 %v12468_v23  ;;  %10571 = vmatprep.subr.mxu1 %v12468_v23 }
 0x7db   :  { %10541 = vmatpush3.msra.mxu0 %v12469_v51  ;;  %10572 = vmatpush3.msra.mxu1 %v12470_v5 }
 0x7dc   :  { %10542 = vmatprep.subr.mxu0 %v12468_v23  ;;  %10573 = vmatprep.subr.mxu1 %v12468_v23 }
 0x7dd   :  { %10543 = vmatpush3.msra.mxu0 %v12471_v12  ;;  %10574 = vmatpush3.msra.mxu1 %v12472_v63 }
 0x7de   :  { %10544 = vmatprep.subr.mxu0 %v12468_v23  ;;  %10575 = vmatprep.subr.mxu1 %v12468_v23 }
 0x7df   :  { %10545 = vmatpush3.msra.mxu0 %v12473_v0  ;;  %10576 = vmatpush3.msra.mxu1 %v12474_v62 }
 0x7e0   :  { %10547 = vmatmul.mubr.f32.vlgmr.msra.gmra.mxu0 %v12229_v38  ;;  %10577 = vmatprep.subr.mxu1 %v12468_v23 }
 0x7e1   :  { %10578 = vmatpush3.msra.mxu1 %v12475_v34  ;;  %10560 = vmatprep.subr.mxu0 %v12468_v23 }
 0x7e2   :  { %10579 = vmatprep.mubr.msk.f32.mxu1 %vm10689_vm2, %v12468_v23  ;;  %10593 = vmatprep.subr.mxu1 %v12468_v23 }
 0x7e3   :  { %10561 = vmatpush3.msra.mxu0 %v11219_v2  ;;  %10568 = vmatprep.mubr.msk.f32.mxu0 %vm10689_vm2, %v12468_v23 }
 0x7e4   :  { %10562 = vmatprep.subr.mxu0 %v12468_v23 }
 0x7e5   :  { %10563 = vmatpush3.msra.mxu0 %v11227_v18 }
 0x7e6   :  { %10564 = vmatprep.subr.mxu0 %v12468_v23 }
 0x7e7   :  { %10565 = vmatpush3.msra.mxu0 %v11240_v22 }
 0x7e8   :  { %10566 = vmatprep.subr.mxu0 %v12468_v23 }
 0x7e9   :  { %10567 = vmatpush3.msra.mxu0 %v11255_v27 }
 0x7ea   :  { %10582 = vmatprep.subr.mxu0 %v12468_v23 }
 0x7ec   :  { %v6868_v45 = vpop.permute.xlu0 %6867 }
 0x7ed   :  { %6870 = vst.msk [vmem:[%s12443_s8 + $0x2] sm:$0x3] %vm2930_vm4, %v6868_v45 }
 0x7f0   :  { %v4904_v48 = vpop.permute.xlu0 %4903 }
 0x7f1   :  { %4907 = vst.msk [vmem:[%s12443_s8] sm:$0x3] %vm4906_vm6, %v4904_v48 }
 0x868   :  { %v7527_v52 = vpop.f32.mrf.mxu1 }
 0x86a   :  { %v10449_v53 = vpop.f32.mrf.mxu1 }
 0x870   :  { %v7684_v3 = vpop.f32.mrf.mxu1 }
 0x871   :  { %v7436_v54 = vpop.f32.mrf.mxu0 }
 0x872   :  { %v10471_v55 = vpop.f32.mrf.mxu1  ;;  %v7437_v57 = vadd.f32 %v12072_v59, %v7436_v54 }
 0x873   :  { %v10438_v56 = vpop.f32.mrf.mxu0 }
 0x874   :  { %v7528_v37 = vadd.f32 %v7527_v52, %v7437_v57 }
 0x879   :  { %v7607_v15 = vpop.f32.mrf.mxu0 }
 0x87a   :  { %v7842_v60 = vpop.f32.mrf.mxu1  ;;  %v7608_v5 = vadd.f32 %v7607_v15, %v7528_v37 }
 0x87b   :  { %v10460_v16 = vpop.f32.mrf.mxu0 }
 0x87c   :  { %v10493_v51 = vpop.f32.mrf.mxu1  ;;  %v7685_v12 = vadd.f32 %v7684_v3, %v7608_v5 }
 0x883   :  { %v7767_v63 = vpop.f32.mrf.mxu0 }
 0x884   :  { %v7768_v0 = vadd.f32 %v7767_v63, %v7685_v12  ;;  %v8024_v62 = vpop.f32.mrf.mxu1 }
 0x885   :  { %v10482_v34 = vpop.f32.mrf.mxu0 }
 0x886   :  { %v7843_v40 = vadd.f32 %v7842_v60, %v7768_v0  ;;  %v10515_v29 = vpop.f32.mrf.mxu1 }
 0x888   :  { %v7853_v43 = vrot.slane %v7843_v40, %v11625_v10 }
 0x88a   :  { %7854 = vrot.lane.b32.xlu1 %v7853_v43, %s10692_s17 }
 0x88d   :  { %v7933_v19 = vpop.f32.mrf.mxu0 }
 0x88e   :  { %v8181_v58 = vpop.f32.mrf.mxu1  ;;  %v8025_v61 = vadd.f32 %v8024_v62, %v7933_v19 }
 0x88f   :  { %v10504_v35 = vpop.f32.mrf.mxu0 }
 0x890   :  { %v10537_v44 = vpop.f32.mrf.mxu1 }
 0x897   :  { %v8104_v31 = vpop.f32.mrf.mxu0 }
 0x898   :  { %v8339_v42 = vpop.f32.mrf.mxu1  ;;  %v8105_v13 = vadd.f32 %v8104_v31, %v8025_v61 }
 0x899   :  { %v10526_v6 = vpop.f32.mrf.mxu0 }
 0x89a   :  { %v10559_v28 = vpop.f32.mrf.mxu1  ;;  %v8182_v24 = vadd.f32 %v8181_v58, %v8105_v13 }
 0x8a0   :  { %v8264_v14 = vpop.f32.mrf.mxu0 }
 0x8a1   :  { %v8265_v4 = vadd.f32 %v8264_v14, %v8182_v24 }
 0x8a2   :  { %v10548_v32 = vpop.f32.mrf.mxu0 }
 0x8a3   :  { %v8340_v36 = vadd.f32 %v8339_v42, %v8265_v4 }
 0x8a5   :  { %v8343_v41 = vadd.f32 %v8340_v36, %v11322_v7 }
 0x8a7   :  { %10648 = vtanh.f32 %v8343_v41 }
 0x8b4   :  { %v10649_v49 = vpop.eup %10648 }
 0x8b5   :  { %8845 = vst.msk [vmem:[#allocation6] sm:$0x3] %vm1942_vm3, %v10649_v49  ;;  %v8346_v11 = vsel %vm45_vm0, %v10649_v49, 0 }
 0x8b6   :  { %v8417_v46 = vand.u32 4294901760, %v8346_v11 }
 0x8b8   :  { %v8418_v8 = vsub.f32 %v8346_v11, %v8417_v46  ;;  %10580 = vmatmul.mubr.f32.vlgmr.msra.gmra.mxu1 %v8417_v46 }
 0x8b9   :  { %10594 = vmatpush3.msra.mxu1 %v11219_v2  ;;  %10601 = vmatprep.mubr.msk.f32.mxu1 %vm10689_vm2, %v12468_v23 }
 0x8ba   :  { %10595 = vmatprep.subr.mxu1 %v12468_v23  ;;  %v8419_v38 = vand.u32 4294901760, %v8418_v8 }
 0x8bb   :  { %10596 = vmatpush3.msra.mxu1 %v11227_v18 }
 0x8bc   :  { %10597 = vmatprep.subr.mxu1 %v12468_v23  ;;  %v8420_v7 = vsub.f32 %v8418_v8, %v8419_v38 }
 0x8bd   :  { %10598 = vmatpush3.msra.mxu1 %v11240_v22 }
 0x8be   :  { %10599 = vmatprep.subr.mxu1 %v12468_v23  ;;  %v8421_v39 = vand.u32 4294901760, %v8420_v7 }
 0x8bf   :  { %10600 = vmatpush3.msra.mxu1 %v11255_v27 }
 0x8c0   :  { %10602 = vmatmul.mubr.f32.vlgmr.msra.gmra.mxu1 %v8419_v38  ;;  %10615 = vmatprep.subr.mxu1 %v12468_v23 }
 0x8c1   :  { %10569 = vmatmul.mubr.f32.vlgmr.msra.gmra.mxu0 %v8421_v39  ;;  %10616 = vmatpush3.msra.mxu1 %v11219_v2 }
 0x8c2   :  { %10583 = vmatpush3.msra.mxu0 %v11225_v17  ;;  %10617 = vmatprep.subr.mxu1 %v12468_v23 }
 0x8c3   :  { %10584 = vmatprep.subr.mxu0 %v12468_v23  ;;  %10618 = vmatpush3.msra.mxu1 %v11227_v18 }
 0x8c4   :  { %10585 = vmatpush3.msra.mxu0 %v11238_v21  ;;  %10619 = vmatprep.subr.mxu1 %v12468_v23 }
 0x8c5   :  { %10586 = vmatprep.subr.mxu0 %v12468_v23  ;;  %10620 = vmatpush3.msra.mxu1 %v11240_v22 }
 0x8c6   :  { %10587 = vmatpush3.msra.mxu0 %v11253_v26  ;;  %10621 = vmatprep.subr.mxu1 %v12468_v23 }
 0x8c7   :  { %10588 = vmatprep.subr.mxu0 %v12468_v23  ;;  %10590 = vmatprep.mubr.msk.f32.mxu0 %vm10689_vm2, %v12468_v23 }
 0x8c8   :  { %10589 = vmatpush3.msra.mxu0 %v11267_v9  ;;  %10622 = vmatpush3.msra.mxu1 %v11255_v27 }
 0x8c9   :  { %10623 = vmatprep.mubr.msk.f32.mxu1 %vm10689_vm2, %v12468_v23  ;;  %10591 = vmatmul.mubr.f32.vlgmr.msra.gmra.mxu0 %v8418_v8 }
 0x8ca   :  { %10604 = vmatprep.subr.mxu0 %v12468_v23  ;;  %10624 = vmatmul.mubr.f32.vlgmr.msra.gmra.mxu1 %v8417_v46 }
 0x8cb   :  { %10605 = vmatpush3.msra.mxu0 %v11235_v20  ;;  %10612 = vmatprep.mubr.msk.f32.mxu0 %vm10689_vm2, %v12468_v23 }
 0x8cc   :  { %10606 = vmatprep.subr.mxu0 %v12468_v23 }
 0x8cd   :  { %10607 = vmatpush3.msra.mxu0 %v11250_v25 }
 0x8ce   :  { %10608 = vmatprep.subr.mxu0 %v12468_v23 }
 0x8cf   :  { %10609 = vmatpush3.msra.mxu0 %v11264_v30 }
 0x8d0   :  { %10610 = vmatprep.subr.mxu0 %v12468_v23 }
 0x8d1   :  { %10611 = vmatpush3.msra.mxu0 %v11277_v33 }
 0x8d2   :  { %10613 = vmatmul.mubr.f32.vlgmr.msra.gmra.mxu0 %v8417_v46 }
 0x8fc   :  { %v7855_v2 = vpop.permute.xlu1 %7854 }
 0x8fd   :  { %7857 = vst.msk [vmem:[%s12443_s8 + $0x2] sm:$0x3] %vm3918_vm5, %v7855_v2 }
 0x978   :  { %v8514_v17 = vpop.f32.mrf.mxu1 }
 0x97a   :  { %v10581_v18 = vpop.f32.mrf.mxu1 }
 0x980   :  { %v8671_v20 = vpop.f32.mrf.mxu1 }
 0x981   :  { %v8423_v21 = vpop.f32.mrf.mxu0 }
 0x982   :  { %v10603_v22 = vpop.f32.mrf.mxu1  ;;  %v8424_v26 = vadd.f32 %v12072_v59, %v8423_v21 }
 0x983   :  { %v10570_v25 = vpop.f32.mrf.mxu0 }
 0x984   :  { %v8515_v9 = vadd.f32 %v8514_v17, %v8424_v26 }
 0x989   :  { %v8594_v27 = vpop.f32.mrf.mxu0 }
 0x98a   :  { %v8829_v30 = vpop.f32.mrf.mxu1 }
 0x98b   :  { %v10592_v33 = vpop.f32.mrf.mxu0 }
 0x98c   :  { %v10625_v23 = vpop.f32.mrf.mxu1 }
 0x98d   :  { %10674 = shalt.err (!%p10671_p9)
}
 0x98e   :  { %8857 = dma.vmem_to_hbm [thread:$0]  %s8855_s24, 32, %s12444_s9, [#allocation4]   ;;  %v8595_v59 = vadd.f32 %v8594_v27, %v8515_v9 }
 0x990   :  { %v8672_v47 = vadd.f32 %v8671_v20, %v8595_v59 }
 0x992   :  { %v8754_v50 = vpop.f32.mrf.mxu0 }
 0x993   :  { %v8755_v1 = vadd.f32 %v8754_v50, %v8672_v47 }
 0x994   :  { %v10614_v45 = vpop.f32.mrf.mxu0 }
 0x995   :  { %v8830_v48 = vadd.f32 %v8829_v30, %v8755_v1 }
 0x997   :  { %v8840_v52 = vrot.slane %v8830_v48, %v11625_v10 }
 0x999   :  { %8841 = vrot.lane.b32.xlu1 %v8840_v52, %s10693_s7 }
 0xa0b   :  { %v8842_v53 = vpop.permute.xlu1 %8841 }
 0xa0c   :  { %8844 = vst.msk [vmem:[%s12443_s8 + $0x2] sm:$0x3] %vm4906_vm6, %v8842_v53 }
 0xa0d   :  { %10685 = dma.done.wait [#allocation4], 32  }
 0xa0e   :  { %10686 = vsyncadd [#allocation4], 4294967264 }
 0xa0f   :  { %8863 = vsyncpa [#allocation4], 1 }
 0xa10   :  { %8864 = vsyncpa [#allocation5], 1 }

</bundles_post_ra>
